<compile_context>
chip_gen: v7x
topology: tpu7x:2x2x1
jax: 0.10.0
libtpu: 0.0.40
codegen_flags: <defaults>
</compile_context>

<pallas_src>
import numpy as np
import jax
import jax.numpy as jnp
from jax.experimental import pallas as pl
from jax.experimental.pallas import tpu as pltpu


# --------------------------------------------------------------------------
# wrapper-side precomputation (hoisted out of the kernel, numpy -> constants)
# --------------------------------------------------------------------------
def _pick_tb(N, C, Lp, itemsize, budget_bytes=2 * 1024 * 1024, min_grid=1):
    """Largest TB (divisor of N) whose double-buffered in+out blocks fit the
    VMEM budget.  budget_bytes is conservative for v7x's 64 MiB physical VMEM;
    raise it on v5e/v6e (128 MiB) for bigger blocks.  Set min_grid=2 on v7x
    when N allows, to feed both TensorCores."""
    per_sample = 4 * C * Lp * itemsize          # 2 bufs x (in + out)
    tb_max = max(1, budget_bytes // per_sample)
    tb_max = min(tb_max, max(1, N // min_grid))
    for tb in range(int(tb_max), 0, -1):
        if N % tb == 0:
            return tb
    return 1


def _build_dw_masks(H, W, Lp, TB, k):
    """(k*k, TB*Lp) f32 boundary masks for the roll-based depthwise conv.
    Channel-independent; tiled per sample; built once on the host."""
    p = (k - 1) // 2
    L = H * W
    l = np.arange(Lp)
    row, col = l // W, l % W
    masks = np.zeros((k * k, Lp), np.float32)
    for di in range(-p, p + 1):
        for dj in range(-p, p + 1):
            m = ((row + di >= 0) & (row + di < H) &
                 (col + dj >= 0) & (col + dj < W) & (l < L))
            masks[(di + p) * k + (dj + p)] = m.astype(np.float32)
    return np.tile(masks, (1, TB))


def _build_seg_mats(H, W, Lp, TB):
    """seg  (TB*Lp, TB): per-sample GAP (mean over valid lanes) as a matmul.
       segT (TB, TB*Lp): broadcast a per-sample scalar column back to lanes."""
    L = H * W
    seg = np.zeros((TB * Lp, TB), np.float32)
    segT = np.zeros((TB, TB * Lp), np.float32)
    for t in range(TB):
        seg[t * Lp:t * Lp + L, t] = 1.0 / L
        segT[t, t * Lp:(t + 1) * Lp] = 1.0
    return seg, segT


# --------------------------------------------------------------------------
# kernel
# --------------------------------------------------------------------------
def _make_kernel(is_LN, C, H, W, k, TB, Lp, mxu_bf16):
    p = (k - 1) // 2
    TBL = TB * Lp
    center = p * k + p
    mm_dtype = jnp.bfloat16 if mxu_bf16 else jnp.float32

    def kernel(x_ref, masks_ref, seg_ref, segT_ref,
               pw1_ref, b1_ref, dw1w_ref, dw1b_ref,
               se_a_ref, se_b_ref,
               pw2_ref, b2_ref, dw2w_ref, dw2b_ref,
               o_ref):

        def pointwise(w_ref, b_ref, h):
            # 1x1 conv (+ folded BN scale) as one lane-dense MXU matmul over
            # all TB samples; weight read at the use site.
            w = w_ref[...]
            r = jnp.dot(w.astype(mm_dtype), h.astype(mm_dtype),
                        preferred_element_type=jnp.float32)
            return r + b_ref[...]

        def dw_conv(h, kw_ref, b_ref):
            # Depthwise 'same' conv on the flat (C, TB*Lp) tile: shifted taps
            # via pltpu.roll (XLU slot) + precomputed boundary masks (the
            # masks also kill any roll wrap across sample / pad boundaries).
            kw = kw_ref[...]                                   # (C, k*k)
            acc = h * kw[:, center:center + 1]                 # centre tap
            for di in range(-p, p + 1):
                for dj in range(-p, p + 1):
                    if di == 0 and dj == 0:
                        continue
                    t_idx = (di + p) * k + (dj + p)
                    s = di * W + dj
                    tap = pltpu.roll(h, shift=(-s) % TBL, axis=1)
                    m = masks_ref[t_idx:t_idx + 1, :]          # (1, TBL)
                    acc = acc + (tap * m) * kw[:, t_idx:t_idx + 1]
            return acc + b_ref[...]

        y = x_ref[...].astype(jnp.float32)                     # (C, TBL)

        # pw1 (BN1 scale folded) + BN1 bias + SiLU
        h = pointwise(pw1_ref, b1_ref, y)
        h = h * jax.nn.sigmoid(h)

        # dw1 (depthwise, same padding, bias)
        x1 = dw_conv(h, dw1w_ref, dw1b_ref)

        # squeeze-excite, batched across the TB samples in the block
        gap = jnp.dot(x1, seg_ref[...],
                      preferred_element_type=jnp.float32)      # (C, TB)
        if is_LN:
            mu = jnp.mean(gap, axis=0, keepdims=True)
            var = jnp.mean((gap - mu) ** 2, axis=0, keepdims=True)
            sc = jax.nn.sigmoid((gap - mu) * jax.lax.rsqrt(var + 1e-5)
                                * se_a_ref[...] + se_b_ref[...])
        else:
            h1 = jnp.maximum(
                jnp.dot(se_a_ref[...], gap,
                        preferred_element_type=jnp.float32), 0.0)   # (cm, TB)
            sc = jax.nn.sigmoid(
                jnp.dot(se_b_ref[...], h1,
                        preferred_element_type=jnp.float32))        # (C, TB)
        sc_full = jnp.dot(sc, segT_ref[...],
                          preferred_element_type=jnp.float32)       # (C, TBL)
        x1 = x1 * sc_full + y

        # pw2 (BN2 scale folded) + BN2 bias + Hardswish
        h2 = pointwise(pw2_ref, b2_ref, x1)
        h2 = h2 * jnp.clip(h2 + 3.0, 0.0, 6.0) * (1.0 / 6.0)

        # dw2 + second residual
        x2 = dw_conv(h2, dw2w_ref, dw2b_ref)
        o_ref[...] = (x2 + y).astype(o_ref.dtype)

    return kernel


# --------------------------------------------------------------------------
# host wrapper
# --------------------------------------------------------------------------
def dfsebv2_pallas(x, params, is_LN, dw_s, *, mxu_bf16=False, min_grid=1):
    N, C, H, W = x.shape
    k = dw_s
    L = H * W
    Lp = ((L + 127) // 128) * 128                 # lane-dense padded length
    TB = _pick_tb(N, C, Lp, x.dtype.itemsize, min_grid=min_grid)
    TBL = TB * Lp

    # channel-major, lane-dense activation slab (layout plumbing in wrapper)
    xf = x.reshape(N, C, L)
    if Lp != L:
        xf = jnp.pad(xf, ((0, 0), (0, 0), (0, Lp - L)))
    xf = jnp.transpose(xf, (1, 0, 2)).reshape(C, N * Lp)

    masks = jnp.asarray(_build_dw_masks(H, W, Lp, TB, k))     # (k*k, TBL)
    seg_np, segT_np = _build_seg_mats(H, W, Lp, TB)
    seg, segT = jnp.asarray(seg_np), jnp.asarray(segT_np)

    # fold BN scales into the 1x1 weights (one-time, grid-invariant)
    pw1_ws = params["bn1_s"] * params["pw1_w"]                # (C,1)*(C,C)
    pw2_ws = params["bn2_s"] * params["pw2_w"]
    dw1_wf = params["dw1_w"].reshape(C, k * k)
    dw2_wf = params["dw2_w"].reshape(C, k * k)

    if is_LN:
        se_a, se_b = params["ln_g"], params["ln_b"]           # (C,1) each
    else:
        se_a, se_b = params["fc1_w"], params["fc2_w"]         # (cm,C),(C,cm)

    def const_spec(arr):
        nd = arr.ndim
        return pl.BlockSpec(arr.shape, lambda n, _nd=nd: (0,) * _nd)

    in_specs = [
        pl.BlockSpec((C, TBL), lambda n: (0, n)),             # x block
        const_spec(masks), const_spec(seg), const_spec(segT),
        const_spec(pw1_ws), const_spec(params["bn1_b"]),
        const_spec(dw1_wf), const_spec(params["dw1_b"]),
        const_spec(se_a), const_spec(se_b),
        const_spec(pw2_ws), const_spec(params["bn2_b"]),
        const_spec(dw2_wf), const_spec(params["dw2_b"]),
    ]
    out_specs = pl.BlockSpec((C, TBL), lambda n: (0, n))

    itemsize = x.dtype.itemsize
    flops = int(N * (2 * 2 * C * C * L + 2 * 2 * k * k * C * L + 14 * C * L))
    transc = int(N * (C * L + 2 * C))
    bytes_acc = int(2 * N * C * Lp * itemsize
                    + (2 * C * C + 2 * C * k * k + 8 * C) * 4
                    + (k * k * TBL + 2 * TB * TBL) * 4)
    cost = pl.CostEstimate(flops=flops, transcendentals=transc,
                           bytes_accessed=bytes_acc)

    kern = _make_kernel(is_LN, C, H, W, k, TB, Lp, mxu_bf16)
    out = pl.pallas_call(
        kern,
        out_shape=jax.ShapeDtypeStruct((C, N * Lp), x.dtype),
        grid=(N // TB,),
        in_specs=in_specs,
        out_specs=out_specs,
        compiler_params=pltpu.CompilerParams(
            dimension_semantics=("parallel",),
            vmem_limit_bytes=32 * 1024 * 1024),
        cost_estimate=cost,
    )(xf, masks, seg, segT,
      pw1_ws, params["bn1_b"], dw1_wf, params["dw1_b"],
      se_a, se_b,
      pw2_ws, params["bn2_b"], dw2_wf, params["dw2_b"])

    out = out.reshape(C, N, Lp)[:, :, :L].reshape(C, N, H, W)
    return jnp.transpose(out, (1, 0, 2, 3))


# --------------------------------------------------------------------------
# pure-JAX reference mirroring the PyTorch forward (eval-mode BN)
# --------------------------------------------------------------------------
def dfsebv2_ref(x, params, is_LN, dw_s):
    N, C, H, W = x.shape
    k = dw_s
    p = (k - 1) // 2

    def dw(xx, kw, b):
        xp = jnp.pad(xx, ((0, 0), (0, 0), (p, p), (p, p)))
        acc = jnp.zeros_like(xx)
        for i in range(k):
            for j in range(k):
                acc = acc + xp[:, :, i:i + H, j:j + W] * kw[None, :, i, j, None, None]
        return acc + b.reshape(1, C, 1, 1)

    y = x
    h = jnp.einsum('oc,nchw->nohw', params["pw1_w"], x, precision='highest')
    h = h * params["bn1_s"].reshape(1, C, 1, 1) + params["bn1_b"].reshape(1, C, 1, 1)
    h = h * jax.nn.sigmoid(h)
    h = dw(h, params["dw1_w"], params["dw1_b"])
    m = h.mean(axis=(2, 3))                                   # (N, C)
    if is_LN:
        mu = m.mean(-1, keepdims=True)
        var = jnp.mean((m - mu) ** 2, -1, keepdims=True)
        s = jax.nn.sigmoid((m - mu) / jnp.sqrt(var + 1e-5)
                           * params["ln_g"].reshape(1, C)
                           + params["ln_b"].reshape(1, C))
    else:
        h1 = jnp.maximum(m @ params["fc1_w"].T, 0.0)
        s = jax.nn.sigmoid(h1 @ params["fc2_w"].T)
    h = h * s[:, :, None, None]
    h = h + y
    h2 = jnp.einsum('oc,nchw->nohw', params["pw2_w"], h, precision='highest')
    h2 = h2 * params["bn2_s"].reshape(1, C, 1, 1) + params["bn2_b"].reshape(1, C, 1, 1)
    h2 = h2 * jnp.clip(h2 + 3.0, 0.0, 6.0) / 6.0
    h2 = dw(h2, params["dw2_w"], params["dw2_b"])
    return h2 + y


# --------------------------------------------------------------------------
# demo / self-test
# --------------------------------------------------------------------------
def _make_params(key, C, k):
    keys = jax.random.split(key, 18)
    cm = int(C / 3)

    def fold_bn(kg, kb, km, kv):
        gamma = jax.random.uniform(kg, (C,), jnp.float32, 0.5, 1.5)
        beta = jax.random.normal(kb, (C,), jnp.float32) * 0.1
        mean = jax.random.normal(km, (C,), jnp.float32) * 0.1
        var = jax.random.uniform(kv, (C,), jnp.float32, 0.5, 1.5)
        s = gamma * jax.lax.rsqrt(var + 1e-5)
        b = beta - mean * s
        return s.reshape(C, 1), b.reshape(C, 1)

    bn1_s, bn1_b = fold_bn(keys[0], keys[1], keys[2], keys[3])
    bn2_s, bn2_b = fold_bn(keys[4], keys[5], keys[6], keys[7])
    return dict(
        pw1_w=jax.random.normal(keys[8], (C, C), jnp.float32) * 0.3,
        bn1_s=bn1_s, bn1_b=bn1_b,
        dw1_w=jax.random.normal(keys[9], (C, k, k), jnp.float32) * 0.3,
        dw1_b=(jax.random.normal(keys[10], (C,), jnp.float32) * 0.1).reshape(C, 1),
        ln_g=jax.random.uniform(keys[11], (C,), jnp.float32, 0.5, 1.5).reshape(C, 1),
        ln_b=(jax.random.normal(keys[12], (C,), jnp.float32) * 0.1).reshape(C, 1),
        fc1_w=jax.random.normal(keys[13], (cm, C), jnp.float32) * 0.3,
        fc2_w=jax.random.normal(keys[14], (C, cm), jnp.float32) * 0.3,
        pw2_w=jax.random.normal(keys[15], (C, C), jnp.float32) * 0.3,
        bn2_s=bn2_s, bn2_b=bn2_b,
        dw2_w=jax.random.normal(keys[16], (C, k, k), jnp.float32) * 0.3,
        dw2_b=(jax.random.normal(keys[17], (C,), jnp.float32) * 0.1).reshape(C, 1),
    )


if __name__ == "__main__":
    key = jax.random.PRNGKey(0)
    kx, kp = jax.random.split(key)

    # config 1: cin=8, dw_s=3, H*W already a multiple of 128
    N, C, H, W, k = 4, 8, 16, 16, 3
    x = jax.random.normal(kx, (N, C, H, W), jnp.float32)
    params = _make_params(kp, C, k)

    for is_LN in (True, False):                 # SE_LN and SE branches
        out = jax.block_until_ready(dfsebv2_pallas(x, params, is_LN, k))
        ref = jax.block_until_ready(dfsebv2_ref(x, params, is_LN, k))
        assert out.shape == x.shape
        err = float(jnp.max(jnp.abs(out - ref)))
        assert err < 1e-2, (is_LN, err)

    # bf16-input MXU path (v6e/v7x perf option) -- smoke test only
    out_bf16 = jax.block_until_ready(
        dfsebv2_pallas(x, params, False, k, mxu_bf16=True))
    assert out_bf16.shape == x.shape
    assert bool(jnp.isfinite(out_bf16).all())

    # config 2: non-128-multiple spatial size (H*W=100 -> padded to 128 lanes)
    N2, H2, W2 = 3, 10, 10
    x2 = jax.random.normal(jax.random.PRNGKey(1), (N2, C, H2, W2), jnp.float32)
    out2 = jax.block_until_ready(dfsebv2_pallas(x2, params, False, k))
    ref2 = jax.block_until_ready(dfsebv2_ref(x2, params, False, k))
    err2 = float(jnp.max(jnp.abs(out2 - ref2)))
    assert out2.shape == x2.shape and err2 < 1e-2, err2

    print("KERNEL_OK")
</pallas_src>

<mosaic_0001>
module attributes {stable_mosaic.version = 11 : i64} {
  func.func @kernel(%arg0: i32, %arg1: memref<8x1024xf32, #tpu.memory_space<vmem>>, %arg2: memref<9x1024xf32, #tpu.memory_space<vmem>>, %arg3: memref<1024x4xf32, #tpu.memory_space<vmem>>, %arg4: memref<4x1024xf32, #tpu.memory_space<vmem>>, %arg5: memref<8x8xf32, #tpu.memory_space<vmem>>, %arg6: memref<8x1xf32, #tpu.memory_space<vmem>>, %arg7: memref<8x9xf32, #tpu.memory_space<vmem>>, %arg8: memref<8x1xf32, #tpu.memory_space<vmem>>, %arg9: memref<8x1xf32, #tpu.memory_space<vmem>>, %arg10: memref<8x1xf32, #tpu.memory_space<vmem>>, %arg11: memref<8x8xf32, #tpu.memory_space<vmem>>, %arg12: memref<8x1xf32, #tpu.memory_space<vmem>>, %arg13: memref<8x9xf32, #tpu.memory_space<vmem>>, %arg14: memref<8x1xf32, #tpu.memory_space<vmem>>, %arg15: memref<8x1024xf32, #tpu.memory_space<vmem>>) attributes {dimension_semantics = [#tpu.dimension_semantics<parallel>], iteration_bounds = array<i64: 1>, scalar_prefetch = 0 : i64, scratch_operands = 0 : i64, tpu.core_type = #tpu.core_type<tc>, window_params = [{transform_indices = @transform_0, window_bounds = array<i64: 8, 1024>}, {pipeline_mode = #tpu.pipeline_mode<synchronous>, transform_indices = @transform_1, window_bounds = array<i64: 9, 1024>}, {pipeline_mode = #tpu.pipeline_mode<synchronous>, transform_indices = @transform_2, window_bounds = array<i64: 1024, 4>}, {pipeline_mode = #tpu.pipeline_mode<synchronous>, transform_indices = @transform_3, window_bounds = array<i64: 4, 1024>}, {pipeline_mode = #tpu.pipeline_mode<synchronous>, transform_indices = @transform_4, window_bounds = array<i64: 8, 8>}, {pipeline_mode = #tpu.pipeline_mode<synchronous>, transform_indices = @transform_5, window_bounds = array<i64: 8, 1>}, {pipeline_mode = #tpu.pipeline_mode<synchronous>, transform_indices = @transform_6, window_bounds = array<i64: 8, 9>}, {pipeline_mode = #tpu.pipeline_mode<synchronous>, transform_indices = @transform_7, window_bounds = array<i64: 8, 1>}, {pipeline_mode = #tpu.pipeline_mode<synchronous>, transform_indices = @transform_8, window_bounds = array<i64: 8, 1>}, {pipeline_mode = #tpu.pipeline_mode<synchronous>, transform_indices = @transform_9, window_bounds = array<i64: 8, 1>}, {pipeline_mode = #tpu.pipeline_mode<synchronous>, transform_indices = @transform_10, window_bounds = array<i64: 8, 8>}, {pipeline_mode = #tpu.pipeline_mode<synchronous>, transform_indices = @transform_11, window_bounds = array<i64: 8, 1>}, {pipeline_mode = #tpu.pipeline_mode<synchronous>, transform_indices = @transform_12, window_bounds = array<i64: 8, 9>}, {pipeline_mode = #tpu.pipeline_mode<synchronous>, transform_indices = @transform_13, window_bounds = array<i64: 8, 1>}, {transform_indices = @transform_14, window_bounds = array<i64: 8, 1024>}]} {
    %c0 = arith.constant 0 : index
    %c0_0 = arith.constant 0 : index
    %0 = vector.load %arg1[%c0, %c0_0] : memref<8x1024xf32, #tpu.memory_space<vmem>>, vector<8x1024xf32>
    %c0_1 = arith.constant 0 : index
    %c0_2 = arith.constant 0 : index
    %1 = vector.load %arg5[%c0_1, %c0_2] : memref<8x8xf32, #tpu.memory_space<vmem>>, vector<8x8xf32>
    %cst = arith.constant dense<0.000000e+00> : vector<8x1024xf32>
    %2 = tpu.matmul %1, %0, %cst {dimension_numbers = #tpu.dot_dimension_numbers<[1], [0], [0], [1], [0, 0, 1, 1], [], []>} : vector<8x8xf32>, vector<8x1024xf32>, vector<8x1024xf32> -> vector<8x1024xf32>
    %c0_3 = arith.constant 0 : index
    %c0_4 = arith.constant 0 : index
    %3 = vector.load %arg6[%c0_3, %c0_4] : memref<8x1xf32, #tpu.memory_space<vmem>>, vector<8x1xf32>
    %4 = vector.broadcast %3 : vector<8x1xf32> to vector<8x1024xf32>
    %5 = arith.addf %2, %4 : vector<8x1024xf32>
    %6 = arith.negf %5 : vector<8x1024xf32>
    %7 = math.exp %6 : vector<8x1024xf32>
    %cst_5 = arith.constant 1.000000e+00 : f32
    %8 = vector.broadcast %cst_5 : f32 to vector<8x1024xf32>
    %9 = arith.addf %8, %7 : vector<8x1024xf32>
    %10 = arith.divf %8, %9 : vector<8x1024xf32>
    %11 = arith.mulf %5, %10 : vector<8x1024xf32>
    %c0_6 = arith.constant 0 : index
    %c0_7 = arith.constant 0 : index
    %12 = vector.load %arg7[%c0_6, %c0_7] : memref<8x9xf32, #tpu.memory_space<vmem>>, vector<8x9xf32>
    %13 = vector.extract_strided_slice %12 {offsets = [0, 4], sizes = [8, 1], strides = [1, 1]} : vector<8x9xf32> to vector<8x1xf32>
    %14 = vector.broadcast %13 : vector<8x1xf32> to vector<8x1024xf32>
    %15 = arith.mulf %11, %14 : vector<8x1024xf32>
    %c17_i32 = arith.constant 17 : i32
    %16 = tpu.dynamic_rotate %11 by %c17_i32 dim 1 : vector<8x1024xf32>, i32 -> vector<8x1024xf32>
    %c0_8 = arith.constant 0 : index
    %c0_9 = arith.constant 0 : index
    %17 = vector.load %arg2[%c0_8, %c0_9] : memref<9x1024xf32, #tpu.memory_space<vmem>>, vector<1x1024xf32>
    %18 = vector.broadcast %17 : vector<1x1024xf32> to vector<8x1024xf32>
    %19 = arith.mulf %16, %18 : vector<8x1024xf32>
    %20 = vector.extract_strided_slice %12 {offsets = [0, 0], sizes = [8, 1], strides = [1, 1]} : vector<8x9xf32> to vector<8x1xf32>
    %21 = vector.broadcast %20 : vector<8x1xf32> to vector<8x1024xf32>
    %22 = arith.mulf %19, %21 : vector<8x1024xf32>
    %23 = arith.addf %15, %22 : vector<8x1024xf32>
    %c16_i32 = arith.constant 16 : i32
    %24 = tpu.dynamic_rotate %11 by %c16_i32 dim 1 : vector<8x1024xf32>, i32 -> vector<8x1024xf32>
    %c1 = arith.constant 1 : index
    %c0_10 = arith.constant 0 : index
    %25 = vector.load %arg2[%c1, %c0_10] : memref<9x1024xf32, #tpu.memory_space<vmem>>, vector<1x1024xf32>
    %26 = vector.broadcast %25 : vector<1x1024xf32> to vector<8x1024xf32>
    %27 = arith.mulf %24, %26 : vector<8x1024xf32>
    %28 = vector.extract_strided_slice %12 {offsets = [0, 1], sizes = [8, 1], strides = [1, 1]} : vector<8x9xf32> to vector<8x1xf32>
    %29 = vector.broadcast %28 : vector<8x1xf32> to vector<8x1024xf32>
    %30 = arith.mulf %27, %29 : vector<8x1024xf32>
    %31 = arith.addf %23, %30 : vector<8x1024xf32>
    %c15_i32 = arith.constant 15 : i32
    %32 = tpu.dynamic_rotate %11 by %c15_i32 dim 1 : vector<8x1024xf32>, i32 -> vector<8x1024xf32>
    %c2 = arith.constant 2 : index
    %c0_11 = arith.constant 0 : index
    %33 = vector.load %arg2[%c2, %c0_11] : memref<9x1024xf32, #tpu.memory_space<vmem>>, vector<1x1024xf32>
    %34 = vector.broadcast %33 : vector<1x1024xf32> to vector<8x1024xf32>
    %35 = arith.mulf %32, %34 : vector<8x1024xf32>
    %36 = vector.extract_strided_slice %12 {offsets = [0, 2], sizes = [8, 1], strides = [1, 1]} : vector<8x9xf32> to vector<8x1xf32>
    %37 = vector.broadcast %36 : vector<8x1xf32> to vector<8x1024xf32>
    %38 = arith.mulf %35, %37 : vector<8x1024xf32>
    %39 = arith.addf %31, %38 : vector<8x1024xf32>
    %c1_i32 = arith.constant 1 : i32
    %40 = tpu.dynamic_rotate %11 by %c1_i32 dim 1 : vector<8x1024xf32>, i32 -> vector<8x1024xf32>
    %c3 = arith.constant 3 : index
    %c0_12 = arith.constant 0 : index
    %41 = vector.load %arg2[%c3, %c0_12] : memref<9x1024xf32, #tpu.memory_space<vmem>>, vector<1x1024xf32>
    %42 = vector.broadcast %41 : vector<1x1024xf32> to vector<8x1024xf32>
    %43 = arith.mulf %40, %42 : vector<8x1024xf32>
    %44 = vector.extract_strided_slice %12 {offsets = [0, 3], sizes = [8, 1], strides = [1, 1]} : vector<8x9xf32> to vector<8x1xf32>
    %45 = vector.broadcast %44 : vector<8x1xf32> to vector<8x1024xf32>
    %46 = arith.mulf %43, %45 : vector<8x1024xf32>
    %47 = arith.addf %39, %46 : vector<8x1024xf32>
    %c1023_i32 = arith.constant 1023 : i32
    %48 = tpu.dynamic_rotate %11 by %c1023_i32 dim 1 : vector<8x1024xf32>, i32 -> vector<8x1024xf32>
    %c5 = arith.constant 5 : index
    %c0_13 = arith.constant 0 : index
    %49 = vector.load %arg2[%c5, %c0_13] : memref<9x1024xf32, #tpu.memory_space<vmem>>, vector<1x1024xf32>
    %50 = vector.broadcast %49 : vector<1x1024xf32> to vector<8x1024xf32>
    %51 = arith.mulf %48, %50 : vector<8x1024xf32>
    %52 = vector.extract_strided_slice %12 {offsets = [0, 5], sizes = [8, 1], strides = [1, 1]} : vector<8x9xf32> to vector<8x1xf32>
    %53 = vector.broadcast %52 : vector<8x1xf32> to vector<8x1024xf32>
    %54 = arith.mulf %51, %53 : vector<8x1024xf32>
    %55 = arith.addf %47, %54 : vector<8x1024xf32>
    %c1009_i32 = arith.constant 1009 : i32
    %56 = tpu.dynamic_rotate %11 by %c1009_i32 dim 1 : vector<8x1024xf32>, i32 -> vector<8x1024xf32>
    %c6 = arith.constant 6 : index
    %c0_14 = arith.constant 0 : index
    %57 = vector.load %arg2[%c6, %c0_14] : memref<9x1024xf32, #tpu.memory_space<vmem>>, vector<1x1024xf32>
    %58 = vector.broadcast %57 : vector<1x1024xf32> to vector<8x1024xf32>
    %59 = arith.mulf %56, %58 : vector<8x1024xf32>
    %60 = vector.extract_strided_slice %12 {offsets = [0, 6], sizes = [8, 1], strides = [1, 1]} : vector<8x9xf32> to vector<8x1xf32>
    %61 = vector.broadcast %60 : vector<8x1xf32> to vector<8x1024xf32>
    %62 = arith.mulf %59, %61 : vector<8x1024xf32>
    %63 = arith.addf %55, %62 : vector<8x1024xf32>
    %c1008_i32 = arith.constant 1008 : i32
    %64 = tpu.dynamic_rotate %11 by %c1008_i32 dim 1 : vector<8x1024xf32>, i32 -> vector<8x1024xf32>
    %c7 = arith.constant 7 : index
    %c0_15 = arith.constant 0 : index
    %65 = vector.load %arg2[%c7, %c0_15] : memref<9x1024xf32, #tpu.memory_space<vmem>>, vector<1x1024xf32>
    %66 = vector.broadcast %65 : vector<1x1024xf32> to vector<8x1024xf32>
    %67 = arith.mulf %64, %66 : vector<8x1024xf32>
    %68 = vector.extract_strided_slice %12 {offsets = [0, 7], sizes = [8, 1], strides = [1, 1]} : vector<8x9xf32> to vector<8x1xf32>
    %69 = vector.broadcast %68 : vector<8x1xf32> to vector<8x1024xf32>
    %70 = arith.mulf %67, %69 : vector<8x1024xf32>
    %71 = arith.addf %63, %70 : vector<8x1024xf32>
    %c1007_i32 = arith.constant 1007 : i32
    %72 = tpu.dynamic_rotate %11 by %c1007_i32 dim 1 : vector<8x1024xf32>, i32 -> vector<8x1024xf32>
    %c8 = arith.constant 8 : index
    %c0_16 = arith.constant 0 : index
    %73 = vector.load %arg2[%c8, %c0_16] : memref<9x1024xf32, #tpu.memory_space<vmem>>, vector<1x1024xf32>
    %74 = vector.broadcast %73 : vector<1x1024xf32> to vector<8x1024xf32>
    %75 = arith.mulf %72, %74 : vector<8x1024xf32>
    %76 = vector.extract_strided_slice %12 {offsets = [0, 8], sizes = [8, 1], strides = [1, 1]} : vector<8x9xf32> to vector<8x1xf32>
    %77 = vector.broadcast %76 : vector<8x1xf32> to vector<8x1024xf32>
    %78 = arith.mulf %75, %77 : vector<8x1024xf32>
    %79 = arith.addf %71, %78 : vector<8x1024xf32>
    %c0_17 = arith.constant 0 : index
    %c0_18 = arith.constant 0 : index
    %80 = vector.load %arg8[%c0_17, %c0_18] : memref<8x1xf32, #tpu.memory_space<vmem>>, vector<8x1xf32>
    %81 = vector.broadcast %80 : vector<8x1xf32> to vector<8x1024xf32>
    %82 = arith.addf %79, %81 : vector<8x1024xf32>
    %c0_19 = arith.constant 0 : index
    %c0_20 = arith.constant 0 : index
    %83 = vector.load %arg3[%c0_19, %c0_20] : memref<1024x4xf32, #tpu.memory_space<vmem>>, vector<1024x4xf32>
    %cst_21 = arith.constant dense<0.000000e+00> : vector<8x4xf32>
    %84 = tpu.matmul %82, %83, %cst_21 {dimension_numbers = #tpu.dot_dimension_numbers<[1], [0], [0], [1], [0, 0, 1, 1], [], []>} : vector<8x1024xf32>, vector<1024x4xf32>, vector<8x4xf32> -> vector<8x4xf32>
    %cst_22 = arith.constant dense<0.000000e+00> : vector<4xf32>
    %85 = vector.multi_reduction <add>, %84, %cst_22 [0] : vector<8x4xf32> to vector<4xf32>
    %86 = vector.shape_cast %85 : vector<4xf32> to vector<1x4xf32>
    %cst_23 = arith.constant 8.000000e+00 : f32
    %87 = vector.broadcast %cst_23 : f32 to vector<1x4xf32>
    %88 = arith.divf %86, %87 : vector<1x4xf32>
    %89 = vector.broadcast %88 : vector<1x4xf32> to vector<8x4xf32>
    %90 = arith.subf %84, %89 : vector<8x4xf32>
    %91 = arith.mulf %90, %90 : vector<8x4xf32>
    %cst_24 = arith.constant dense<0.000000e+00> : vector<4xf32>
    %92 = vector.multi_reduction <add>, %91, %cst_24 [0] : vector<8x4xf32> to vector<4xf32>
    %93 = vector.shape_cast %92 : vector<4xf32> to vector<1x4xf32>
    %cst_25 = arith.constant 8.000000e+00 : f32
    %94 = vector.broadcast %cst_25 : f32 to vector<1x4xf32>
    %95 = arith.divf %93, %94 : vector<1x4xf32>
    %96 = vector.broadcast %88 : vector<1x4xf32> to vector<8x4xf32>
    %97 = arith.subf %84, %96 : vector<8x4xf32>
    %cst_26 = arith.constant 9.99999974E-6 : f32
    %98 = vector.broadcast %cst_26 : f32 to vector<1x4xf32>
    %99 = arith.addf %95, %98 : vector<1x4xf32>
    %100 = math.rsqrt %99 : vector<1x4xf32>
    %101 = vector.broadcast %100 : vector<1x4xf32> to vector<8x4xf32>
    %102 = arith.mulf %97, %101 : vector<8x4xf32>
    %c0_27 = arith.constant 0 : index
    %c0_28 = arith.constant 0 : index
    %103 = vector.load %arg9[%c0_27, %c0_28] : memref<8x1xf32, #tpu.memory_space<vmem>>, vector<8x1xf32>
    %104 = vector.broadcast %103 : vector<8x1xf32> to vector<8x4xf32>
    %105 = arith.mulf %102, %104 : vector<8x4xf32>
    %c0_29 = arith.constant 0 : index
    %c0_30 = arith.constant 0 : index
    %106 = vector.load %arg10[%c0_29, %c0_30] : memref<8x1xf32, #tpu.memory_space<vmem>>, vector<8x1xf32>
    %107 = vector.broadcast %106 : vector<8x1xf32> to vector<8x4xf32>
    %108 = arith.addf %105, %107 : vector<8x4xf32>
    %109 = arith.negf %108 : vector<8x4xf32>
    %110 = math.exp %109 : vector<8x4xf32>
    %cst_31 = arith.constant 1.000000e+00 : f32
    %111 = vector.broadcast %cst_31 : f32 to vector<8x4xf32>
    %112 = arith.addf %111, %110 : vector<8x4xf32>
    %113 = arith.divf %111, %112 : vector<8x4xf32>
    %c0_32 = arith.constant 0 : index
    %c0_33 = arith.constant 0 : index
    %114 = vector.load %arg4[%c0_32, %c0_33] : memref<4x1024xf32, #tpu.memory_space<vmem>>, vector<4x1024xf32>
    %cst_34 = arith.constant dense<0.000000e+00> : vector<8x1024xf32>
    %115 = tpu.matmul %113, %114, %cst_34 {dimension_numbers = #tpu.dot_dimension_numbers<[1], [0], [0], [1], [0, 0, 1, 1], [], []>} : vector<8x4xf32>, vector<4x1024xf32>, vector<8x1024xf32> -> vector<8x1024xf32>
    %116 = arith.mulf %82, %115 : vector<8x1024xf32>
    %117 = arith.addf %116, %0 : vector<8x1024xf32>
    %c0_35 = arith.constant 0 : index
    %c0_36 = arith.constant 0 : index
    %118 = vector.load %arg11[%c0_35, %c0_36] : memref<8x8xf32, #tpu.memory_space<vmem>>, vector<8x8xf32>
    %cst_37 = arith.constant dense<0.000000e+00> : vector<8x1024xf32>
    %119 = tpu.matmul %118, %117, %cst_37 {dimension_numbers = #tpu.dot_dimension_numbers<[1], [0], [0], [1], [0, 0, 1, 1], [], []>} : vector<8x8xf32>, vector<8x1024xf32>, vector<8x1024xf32> -> vector<8x1024xf32>
    %c0_38 = arith.constant 0 : index
    %c0_39 = arith.constant 0 : index
    %120 = vector.load %arg12[%c0_38, %c0_39] : memref<8x1xf32, #tpu.memory_space<vmem>>, vector<8x1xf32>
    %121 = vector.broadcast %120 : vector<8x1xf32> to vector<8x1024xf32>
    %122 = arith.addf %119, %121 : vector<8x1024xf32>
    %cst_40 = arith.constant 3.000000e+00 : f32
    %123 = vector.broadcast %cst_40 : f32 to vector<8x1024xf32>
    %124 = arith.addf %122, %123 : vector<8x1024xf32>
    %cst_41 = arith.constant 0.000000e+00 : f32
    %cst_42 = arith.constant 6.000000e+00 : f32
    %125 = vector.broadcast %cst_41 : f32 to vector<8x1024xf32>
    %126 = arith.maximumf %125, %124 : vector<8x1024xf32>
    %127 = vector.broadcast %cst_42 : f32 to vector<8x1024xf32>
    %128 = arith.minimumf %127, %126 : vector<8x1024xf32>
    %129 = arith.mulf %122, %128 : vector<8x1024xf32>
    %cst_43 = arith.constant 0.166666672 : f32
    %130 = vector.broadcast %cst_43 : f32 to vector<8x1024xf32>
    %131 = arith.mulf %129, %130 : vector<8x1024xf32>
    %c0_44 = arith.constant 0 : index
    %c0_45 = arith.constant 0 : index
    %132 = vector.load %arg13[%c0_44, %c0_45] : memref<8x9xf32, #tpu.memory_space<vmem>>, vector<8x9xf32>
    %133 = vector.extract_strided_slice %132 {offsets = [0, 4], sizes = [8, 1], strides = [1, 1]} : vector<8x9xf32> to vector<8x1xf32>
    %134 = vector.broadcast %133 : vector<8x1xf32> to vector<8x1024xf32>
    %135 = arith.mulf %131, %134 : vector<8x1024xf32>
    %c17_i32_46 = arith.constant 17 : i32
    %136 = tpu.dynamic_rotate %131 by %c17_i32_46 dim 1 : vector<8x1024xf32>, i32 -> vector<8x1024xf32>
    %c0_47 = arith.constant 0 : index
    %c0_48 = arith.constant 0 : index
    %137 = vector.load %arg2[%c0_47, %c0_48] : memref<9x1024xf32, #tpu.memory_space<vmem>>, vector<1x1024xf32>
    %138 = vector.broadcast %137 : vector<1x1024xf32> to vector<8x1024xf32>
    %139 = arith.mulf %136, %138 : vector<8x1024xf32>
    %140 = vector.extract_strided_slice %132 {offsets = [0, 0], sizes = [8, 1], strides = [1, 1]} : vector<8x9xf32> to vector<8x1xf32>
    %141 = vector.broadcast %140 : vector<8x1xf32> to vector<8x1024xf32>
    %142 = arith.mulf %139, %141 : vector<8x1024xf32>
    %143 = arith.addf %135, %142 : vector<8x1024xf32>
    %c16_i32_49 = arith.constant 16 : i32
    %144 = tpu.dynamic_rotate %131 by %c16_i32_49 dim 1 : vector<8x1024xf32>, i32 -> vector<8x1024xf32>
    %c1_50 = arith.constant 1 : index
    %c0_51 = arith.constant 0 : index
    %145 = vector.load %arg2[%c1_50, %c0_51] : memref<9x1024xf32, #tpu.memory_space<vmem>>, vector<1x1024xf32>
    %146 = vector.broadcast %145 : vector<1x1024xf32> to vector<8x1024xf32>
    %147 = arith.mulf %144, %146 : vector<8x1024xf32>
    %148 = vector.extract_strided_slice %132 {offsets = [0, 1], sizes = [8, 1], strides = [1, 1]} : vector<8x9xf32> to vector<8x1xf32>
    %149 = vector.broadcast %148 : vector<8x1xf32> to vector<8x1024xf32>
    %150 = arith.mulf %147, %149 : vector<8x1024xf32>
    %151 = arith.addf %143, %150 : vector<8x1024xf32>
    %c15_i32_52 = arith.constant 15 : i32
    %152 = tpu.dynamic_rotate %131 by %c15_i32_52 dim 1 : vector<8x1024xf32>, i32 -> vector<8x1024xf32>
    %c2_53 = arith.constant 2 : index
    %c0_54 = arith.constant 0 : index
    %153 = vector.load %arg2[%c2_53, %c0_54] : memref<9x1024xf32, #tpu.memory_space<vmem>>, vector<1x1024xf32>
    %154 = vector.broadcast %153 : vector<1x1024xf32> to vector<8x1024xf32>
    %155 = arith.mulf %152, %154 : vector<8x1024xf32>
    %156 = vector.extract_strided_slice %132 {offsets = [0, 2], sizes = [8, 1], strides = [1, 1]} : vector<8x9xf32> to vector<8x1xf32>
    %157 = vector.broadcast %156 : vector<8x1xf32> to vector<8x1024xf32>
    %158 = arith.mulf %155, %157 : vector<8x1024xf32>
    %159 = arith.addf %151, %158 : vector<8x1024xf32>
    %c1_i32_55 = arith.constant 1 : i32
    %160 = tpu.dynamic_rotate %131 by %c1_i32_55 dim 1 : vector<8x1024xf32>, i32 -> vector<8x1024xf32>
    %c3_56 = arith.constant 3 : index
    %c0_57 = arith.constant 0 : index
    %161 = vector.load %arg2[%c3_56, %c0_57] : memref<9x1024xf32, #tpu.memory_space<vmem>>, vector<1x1024xf32>
    %162 = vector.broadcast %161 : vector<1x1024xf32> to vector<8x1024xf32>
    %163 = arith.mulf %160, %162 : vector<8x1024xf32>
    %164 = vector.extract_strided_slice %132 {offsets = [0, 3], sizes = [8, 1], strides = [1, 1]} : vector<8x9xf32> to vector<8x1xf32>
    %165 = vector.broadcast %164 : vector<8x1xf32> to vector<8x1024xf32>
    %166 = arith.mulf %163, %165 : vector<8x1024xf32>
    %167 = arith.addf %159, %166 : vector<8x1024xf32>
    %c1023_i32_58 = arith.constant 1023 : i32
    %168 = tpu.dynamic_rotate %131 by %c1023_i32_58 dim 1 : vector<8x1024xf32>, i32 -> vector<8x1024xf32>
    %c5_59 = arith.constant 5 : index
    %c0_60 = arith.constant 0 : index
    %169 = vector.load %arg2[%c5_59, %c0_60] : memref<9x1024xf32, #tpu.memory_space<vmem>>, vector<1x1024xf32>
    %170 = vector.broadcast %169 : vector<1x1024xf32> to vector<8x1024xf32>
    %171 = arith.mulf %168, %170 : vector<8x1024xf32>
    %172 = vector.extract_strided_slice %132 {offsets = [0, 5], sizes = [8, 1], strides = [1, 1]} : vector<8x9xf32> to vector<8x1xf32>
    %173 = vector.broadcast %172 : vector<8x1xf32> to vector<8x1024xf32>
    %174 = arith.mulf %171, %173 : vector<8x1024xf32>
    %175 = arith.addf %167, %174 : vector<8x1024xf32>
    %c1009_i32_61 = arith.constant 1009 : i32
    %176 = tpu.dynamic_rotate %131 by %c1009_i32_61 dim 1 : vector<8x1024xf32>, i32 -> vector<8x1024xf32>
    %c6_62 = arith.constant 6 : index
    %c0_63 = arith.constant 0 : index
    %177 = vector.load %arg2[%c6_62, %c0_63] : memref<9x1024xf32, #tpu.memory_space<vmem>>, vector<1x1024xf32>
    %178 = vector.broadcast %177 : vector<1x1024xf32> to vector<8x1024xf32>
    %179 = arith.mulf %176, %178 : vector<8x1024xf32>
    %180 = vector.extract_strided_slice %132 {offsets = [0, 6], sizes = [8, 1], strides = [1, 1]} : vector<8x9xf32> to vector<8x1xf32>
    %181 = vector.broadcast %180 : vector<8x1xf32> to vector<8x1024xf32>
    %182 = arith.mulf %179, %181 : vector<8x1024xf32>
    %183 = arith.addf %175, %182 : vector<8x1024xf32>
    %c1008_i32_64 = arith.constant 1008 : i32
    %184 = tpu.dynamic_rotate %131 by %c1008_i32_64 dim 1 : vector<8x1024xf32>, i32 -> vector<8x1024xf32>
    %c7_65 = arith.constant 7 : index
    %c0_66 = arith.constant 0 : index
    %185 = vector.load %arg2[%c7_65, %c0_66] : memref<9x1024xf32, #tpu.memory_space<vmem>>, vector<1x1024xf32>
    %186 = vector.broadcast %185 : vector<1x1024xf32> to vector<8x1024xf32>
    %187 = arith.mulf %184, %186 : vector<8x1024xf32>
    %188 = vector.extract_strided_slice %132 {offsets = [0, 7], sizes = [8, 1], strides = [1, 1]} : vector<8x9xf32> to vector<8x1xf32>
    %189 = vector.broadcast %188 : vector<8x1xf32> to vector<8x1024xf32>
    %190 = arith.mulf %187, %189 : vector<8x1024xf32>
    %191 = arith.addf %183, %190 : vector<8x1024xf32>
    %c1007_i32_67 = arith.constant 1007 : i32
    %192 = tpu.dynamic_rotate %131 by %c1007_i32_67 dim 1 : vector<8x1024xf32>, i32 -> vector<8x1024xf32>
    %c8_68 = arith.constant 8 : index
    %c0_69 = arith.constant 0 : index
    %193 = vector.load %arg2[%c8_68, %c0_69] : memref<9x1024xf32, #tpu.memory_space<vmem>>, vector<1x1024xf32>
    %194 = vector.broadcast %193 : vector<1x1024xf32> to vector<8x1024xf32>
    %195 = arith.mulf %192, %194 : vector<8x1024xf32>
    %196 = vector.extract_strided_slice %132 {offsets = [0, 8], sizes = [8, 1], strides = [1, 1]} : vector<8x9xf32> to vector<8x1xf32>
    %197 = vector.broadcast %196 : vector<8x1xf32> to vector<8x1024xf32>
    %198 = arith.mulf %195, %197 : vector<8x1024xf32>
    %199 = arith.addf %191, %198 : vector<8x1024xf32>
    %c0_70 = arith.constant 0 : index
    %c0_71 = arith.constant 0 : index
    %200 = vector.load %arg14[%c0_70, %c0_71] : memref<8x1xf32, #tpu.memory_space<vmem>>, vector<8x1xf32>
    %201 = vector.broadcast %200 : vector<8x1xf32> to vector<8x1024xf32>
    %202 = arith.addf %199, %201 : vector<8x1024xf32>
    %203 = arith.addf %202, %0 : vector<8x1024xf32>
    %c0_72 = arith.constant 0 : index
    %c0_73 = arith.constant 0 : index
    %204 = vector.load %arg15[%c0_72, %c0_73] : memref<8x1024xf32, #tpu.memory_space<vmem>>, vector<8x1024xf32>
    tpu.vector_store %arg15[%c0_72, %c0_73], %203 {strides = array<i32>} : memref<8x1024xf32, #tpu.memory_space<vmem>>, vector<8x1024xf32>,
    return
  }
  func.func @transform_0(%arg0: i32) -> (i32, i32) {
    %c0_i32 = arith.constant 0 : i32
    %c0_i32_0 = arith.constant 0 : i32
    return %c0_i32, %arg0 : i32, i32
  }
  func.func @transform_1(%arg0: i32) -> (i32, i32) {
    %c0_i32 = arith.constant 0 : i32
    %c0_i32_0 = arith.constant 0 : i32
    %c0_i32_1 = arith.constant 0 : i32
    return %c0_i32, %c0_i32_0 : i32, i32
  }
  func.func @transform_2(%arg0: i32) -> (i32, i32) {
    %c0_i32 = arith.constant 0 : i32
    %c0_i32_0 = arith.constant 0 : i32
    %c0_i32_1 = arith.constant 0 : i32
    return %c0_i32, %c0_i32_0 : i32, i32
  }
  func.func @transform_3(%arg0: i32) -> (i32, i32) {
    %c0_i32 = arith.constant 0 : i32
    %c0_i32_0 = arith.constant 0 : i32
    %c0_i32_1 = arith.constant 0 : i32
    return %c0_i32, %c0_i32_0 : i32, i32
  }
  func.func @transform_4(%arg0: i32) -> (i32, i32) {
    %c0_i32 = arith.constant 0 : i32
    %c0_i32_0 = arith.constant 0 : i32
    %c0_i32_1 = arith.constant 0 : i32
    return %c0_i32, %c0_i32_0 : i32, i32
  }
  func.func @transform_5(%arg0: i32) -> (i32, i32) {
    %c0_i32 = arith.constant 0 : i32
    %c0_i32_0 = arith.constant 0 : i32
    %c0_i32_1 = arith.constant 0 : i32
    return %c0_i32, %c0_i32_0 : i32, i32
  }
  func.func @transform_6(%arg0: i32) -> (i32, i32) {
    %c0_i32 = arith.constant 0 : i32
    %c0_i32_0 = arith.constant 0 : i32
    %c0_i32_1 = arith.constant 0 : i32
    return %c0_i32, %c0_i32_0 : i32, i32
  }
  func.func @transform_7(%arg0: i32) -> (i32, i32) {
    %c0_i32 = arith.constant 0 : i32
    %c0_i32_0 = arith.constant 0 : i32
    %c0_i32_1 = arith.constant 0 : i32
    return %c0_i32, %c0_i32_0 : i32, i32
  }
  func.func @transform_8(%arg0: i32) -> (i32, i32) {
    %c0_i32 = arith.constant 0 : i32
    %c0_i32_0 = arith.constant 0 : i32
    %c0_i32_1 = arith.constant 0 : i32
    return %c0_i32, %c0_i32_0 : i32, i32
  }
  func.func @transform_9(%arg0: i32) -> (i32, i32) {
    %c0_i32 = arith.constant 0 : i32
    %c0_i32_0 = arith.constant 0 : i32
    %c0_i32_1 = arith.constant 0 : i32
    return %c0_i32, %c0_i32_0 : i32, i32
  }
  func.func @transform_10(%arg0: i32) -> (i32, i32) {
    %c0_i32 = arith.constant 0 : i32
    %c0_i32_0 = arith.constant 0 : i32
    %c0_i32_1 = arith.constant 0 : i32
    return %c0_i32, %c0_i32_0 : i32, i32
  }
  func.func @transform_11(%arg0: i32) -> (i32, i32) {
    %c0_i32 = arith.constant 0 : i32
    %c0_i32_0 = arith.constant 0 : i32
    %c0_i32_1 = arith.constant 0 : i32
    return %c0_i32, %c0_i32_0 : i32, i32
  }
  func.func @transform_12(%arg0: i32) -> (i32, i32) {
    %c0_i32 = arith.constant 0 : i32
    %c0_i32_0 = arith.constant 0 : i32
    %c0_i32_1 = arith.constant 0 : i32
    return %c0_i32, %c0_i32_0 : i32, i32
  }
  func.func @transform_13(%arg0: i32) -> (i32, i32) {
    %c0_i32 = arith.constant 0 : i32
    %c0_i32_0 = arith.constant 0 : i32
    %c0_i32_1 = arith.constant 0 : i32
    return %c0_i32, %c0_i32_0 : i32, i32
  }
  func.func @transform_14(%arg0: i32) -> (i32, i32) {
    %c0_i32 = arith.constant 0 : i32
    %c0_i32_0 = arith.constant 0 : i32
    return %c0_i32, %arg0 : i32, i32
  }
}

</mosaic_0001>

<bundles_post_ra>
// kernel: tpu_custom_call.1
= control target key start
LH: loop header
LB: loop body
LE: loop exit
PB: predicated region body
PF: predicated region fallthrough
CT: control target
= control target key end

     0   :  { %vm63_vm0 = vcmask 64512   ;;  %v5722_v5 = vmov 0.0   ;;  %s5700_s0 = inlined_call_operand.vmem [shape: f32[8,1024], index: 0, kind: input, shape index: {}]   ;;  %s5701_s1 = inlined_call_operand.vmem [shape: f32[9,1024], index: 1, kind: input, shape index: {}]   ;;  %s5702_s2 = inlined_call_operand.vmem [shape: f32[1024,4], index: 2, kind: input, shape index: {}]   ;;  %s5703_s3 = inlined_call_operand.vmem [shape: f32[4,1024], index: 3, kind: input, shape index: {}]   ;;  %s5704_s4 = inlined_call_operand.vmem [shape: f32[8,8], index: 4, kind: input, shape index: {}]   ;;  %s5705_s5 = inlined_call_operand.vmem [shape: f32[8,1], index: 5, kind: input, shape index: {}]   ;;  %s5706_s6 = inlined_call_operand.vmem [shape: f32[8,9], index: 6, kind: input, shape index: {}]   ;;  %s5707_s7 = inlined_call_operand.vmem [shape: f32[8,1], index: 7, kind: input, shape index: {}]   ;;  %s5708_s8 = inlined_call_operand.vmem [shape: f32[8,1], index: 8, kind: input, shape index: {}]   ;;  %s5709_s9 = inlined_call_operand.vmem [shape: f32[8,1], index: 9, kind: input, shape index: {}]   ;;  %s5710_s10 = inlined_call_operand.vmem [shape: f32[8,8], index: 10, kind: input, shape index: {}]   ;;  %s5711_s11 = inlined_call_operand.vmem [shape: f32[8,1], index: 11, kind: input, shape index: {}]   ;;  %s5712_s12 = inlined_call_operand.vmem [shape: f32[8,9], index: 12, kind: input, shape index: {}]   ;;  %s5713_s13 = inlined_call_operand.vmem [shape: f32[8,1], index: 13, kind: input, shape index: {}]   ;;  %s5714_s14 = inlined_call_operand.hbm [shape: f32[8,1024], index: 14, kind: output, shape index: {}]  }
   0x1   :  { %v49_v0 = vld [vmem:[%s5700_s0 + $0x8] sm:$0xff]  ;;  %v51_v1 = vld [vmem:[%s5700_s0 + $0x18] sm:$0xff]  ;;  %v48_v2 = vld [vmem:[%s5700_s0] sm:$0xff]  ;;  %131 = vmatprep.mubr.f32.mxu0 %v5722_v5  ;;  %202 = vmatprep.mubr.f32.mxu1 %v5722_v5 }
   0x2   :  { %67 = vmatprep.subr.mxu0 %v49_v0  ;;  %138 = vmatprep.subr.mxu1 %v51_v1  ;;  %v50_v3 = vld [vmem:[%s5700_s0 + $0x10] sm:$0xff]  ;;  %v56_v4 = vld [vmem:[%s5704_s4] sm:$0xff]  ;;  %v53_v6 = vld [vmem:[%s5700_s0 + $0x28] sm:$0xff] }
   0x3   :  { %68 = vmatpush1.msra.mxu0 %v48_v2  ;;  %v55_v7 = vld [vmem:[%s5700_s0 + $0x38] sm:$0xff]  ;;  %139 = vmatpush1.msra.mxu1 %v50_v3  ;;  %v52_v8 = vld [vmem:[%s5700_s0 + $0x20] sm:$0xff] }
   0x4   :  { %19 = vsyncpa [#allocation3], 0  ;;  %2811 = vmatmul.mubr.msk.f32.vlgmr.msra.gmra.mrb[0].mxu0 %vm63_vm0, %v56_v4  ;;  %2812 = vmatmul.mubr.msk.f32.vlgmr.msra.gmra.mrb[0].mxu1 %vm63_vm0, %v56_v4  ;;  %v54_v9 = vld [vmem:[%s5700_s0 + $0x30] sm:$0xff]  ;;  %v57_v10 = vld [vmem:[%s5705_s5] sm:$0xff]  ;;  %v5715_v11 = vmov 0   ;;  %v3238_v13 = vmov 4  }
   0x5   :  { %209 = vmatprep.subr.mxu0 %v53_v6  ;;  %280 = vmatprep.subr.mxu1 %v55_v7  ;;  %v407_v12 = vld [vmem:[%s5706_s6] sm:$0xff]  ;;  %v5721_v14 = vmov 1   ;;  %v5719_v15 = vmov 2   ;;  %v5718_v16 = vmov 3   ;;  %v5717_v17 = vmov 5   ;;  %s3247_s18 = smov 127  }
   0x6   :  { %210 = vmatpush1.msra.mxu0 %v52_v8  ;;  %273 = vmatprep.mubr.f32.mxu0 %v5722_v5  ;;  %v3243_v18 = vmov 6   ;;  %v5720_v19 = vmov 7   ;;  %v5716_v20 = vmov 8   ;;  %v1206_v21 = vld [vmem:[%s5707_s7] sm:$0xff]  ;;  %s3246_s7 = smov 17   ;;  %s3248_s19 = smov 16  }
   0x7   :  { %281 = vmatpush1.msra.mxu1 %v54_v9  ;;  %344 = vmatprep.mubr.f32.mxu1 %v5722_v5  ;;  %s3249_s20 = smov 113   ;;  %s3250_s21 = smov 15   ;;  %v1268_v57 = vld [vmem:[%s5702_s2 + $0x180] sm:$0xff]  ;;  %v1269_v58 = vld [vmem:[%s5702_s2 + $0x188] sm:$0xff]  ;;  %v1270_v1 = vld [vmem:[%s5702_s2 + $0x190] sm:$0xff]  ;;  %vm1686_vm9 = vcmask 1043456  }
   0x8   :  { %2813 = vmatmul.mubr.msk.f32.vlgmr.msra.gmra.mrb[2].mxu0 %vm63_vm0, %v56_v4  ;;  %2814 = vmatmul.mubr.msk.f32.vlgmr.msra.gmra.mrb[2].mxu1 %vm63_vm0, %v56_v4  ;;  %s3251_s22 = smov 112   ;;  %s3252_s23 = smov 1   ;;  %v3026_v59 = vpack.c.bf16 %v1269_v58, %v1268_v57  ;;  %v1252_v60 = vld [vmem:[%s5702_s2 + $0x100] sm:$0xff]  ;;  %v1253_v61 = vld [vmem:[%s5702_s2 + $0x108] sm:$0xff]  ;;  %v1271_v2 = vld [vmem:[%s5702_s2 + $0x198] sm:$0xff]  ;;  %vm1628_vm10 = vcmask 31744  }
   0x9   :  { %3141 = vset.pattern.permute.xlu0 %v5715_v11  ;;  %3143 = vset.pattern.permute.xlu1 %v5715_v11  ;;  %s3253_s15 = smov 111   ;;  %v3028_v63 = vpack.c.bf16 %v1253_v61, %v1252_v60  ;;  %v1254_v3 = vld [vmem:[%s5702_s2 + $0x110] sm:$0xff]  ;;  %v3030_v6 = vpack.c.bf16 %v1271_v2, %v1270_v1  ;;  %v1255_v7 = vld [vmem:[%s5702_s2 + $0x118] sm:$0xff]  ;;  %v1264_v60 = vld [vmem:[%s5702_s2 + $0x160] sm:$0xff] }
   0xa   :  { %60 = vperm.xlu0 %3141, %v57_v10   ;;  %501 = vperm.xlu1 %3143, %v407_v12   ;;  %v3032_v9 = vpack.c.bf16 %v1255_v7, %v1254_v3  ;;  %v1265_v61 = vld [vmem:[%s5702_s2 + $0x168] sm:$0xff]  ;;  %v1282_v2 = vld [vmem:[%s5702_s2 + $0x1f0] sm:$0xff] }
   0xb   :  { %3027 = vmatprep.subr.bf16.mxu1 %v3026_v59  ;;  %v1237_v1 = vld [vmem:[%s5702_s2 + $0x88] sm:$0xff] }
   0xc   :  { %3029 = vmatpush3.bf16.msra.mxu1 %v3028_v63  ;;  %v3052_v63 = vpack.c.bf16 %v1265_v61, %v1264_v60  ;;  %v1221_v7 = vld [vmem:[%s5702_s2 + $0x8] sm:$0xff] }
   0xd   :  { %3031 = vmatprep.subr.bf16.mxu1 %v3030_v6  ;;  %v1220_v6 = vld [vmem:[%s5702_s2] sm:$0xff]  ;;  %v1229_v60 = vld [vmem:[%s5702_s2 + $0x48] sm:$0xff] }
   0xe   :  { %3142 = vset.pattern.permute.xlu0 %v3238_v13  ;;  %3144 = vset.pattern.permute.xlu1 %v5721_v14  ;;  %v2835_v5 = vld [vmem:[%s5701_s1 + $0x40] ss:$8 sm:$0xf] }
   0xf   :  { %410 = vperm.xlu0 %3142, %v407_v12   ;;  %599 = vperm.xlu1 %3144, %v407_v12  }
  0x10   :  { %3033 = vmatpush3.bf16.msra.mxu1 %v3032_v9 }
  0x13   :  { %3145 = vset.pattern.permute.xlu1 %v5719_v15  ;;  %3151 = vset.pattern.permute.xlu0 %v5715_v11  ;;  %v2832_v15 = vld [vmem:[%s5701_s1 + $0x6] ss:$8 sm:$0xf0] }
  0x14   :  { %697 = vperm.xlu1 %3145, %v407_v12   ;;  %1209 = vperm.xlu0 %3151, %v1206_v21   ;;  %v1273_v21 = vld [vmem:[%s5702_s2 + $0x1a8] sm:$0xff] }
  0x18   :  { %3146 = vset.pattern.permute.xlu1 %v5718_v16  ;;  %v2831_v16 = vld [vmem:[%s5701_s1 + $0x6] ss:$8 sm:$0xf] }
  0x19   :  { %795 = vperm.xlu1 %3146, %v407_v12  }
  0x1d   :  { %3147 = vset.pattern.permute.xlu1 %v5717_v17 }
  0x1e   :  { %893 = vperm.xlu1 %3147, %v407_v12  }
  0x22   :  { %3148 = vset.pattern.permute.xlu1 %v3243_v18 }
  0x23   :  { %991 = vperm.xlu1 %3148, %v407_v12  }
  0x27   :  { %3149 = vset.pattern.permute.xlu1 %v5720_v19 }
  0x28   :  { %1089 = vperm.xlu1 %3149, %v407_v12  }
  0x2c   :  { %3150 = vset.pattern.permute.xlu1 %v5716_v20 }
  0x2d   :  { %1187 = vperm.xlu1 %3150, %v407_v12   ;;  %v1272_v12 = vld [vmem:[%s5702_s2 + $0x1a0] sm:$0xff] }
  0x31   :  { %3152 = vset.pattern.permute.xlu1 %v5715_v11  ;;  %v2834_v11 = vld [vmem:[%s5701_s1 + $0x7] ss:$8 sm:$0xf0] }
  0x89   :  { %v3386_v22 = vpop.permute.xlu0 %60 }
  0xd7   :  { %v133_v23 = vpop.f32.mrb[0].mxu0  ;;  %v204_v24 = vpop.f32.mrb[0].mxu1 }
  0xd8   :  { %v134_v25 = vadd.f32 %v133_v23, %v3386_v22  ;;  %v205_v26 = vadd.f32 %v204_v24, %v3386_v22  ;;  %v135_v27 = vpop.f32.mrb[1].mxu0  ;;  %v206_v28 = vpop.f32.mrb[1].mxu1  ;;  %v3034_v23 = vpack.c.bf16 %v1273_v21, %v1272_v12  ;;  %v1256_v24 = vld [vmem:[%s5702_s2 + $0x120] sm:$0xff]  ;;  %v1266_v12 = vld [vmem:[%s5702_s2 + $0x170] sm:$0xff]  ;;  %v1267_v21 = vld [vmem:[%s5702_s2 + $0x178] sm:$0xff] }
  0xd9   :  { %v136_v35 = vadd.f32 %v135_v27, %v3386_v22  ;;  %v207_v40 = vadd.f32 %v206_v28, %v3386_v22  ;;  %v1274_v28 = vld [vmem:[%s5702_s2 + $0x1b0] sm:$0xff] }
  0xda   :  { %v2815_v29 = vmul.f32 -1.442695, %v134_v25  ;;  %v2817_v30 = vmul.f32 -1.442695, %v205_v26  ;;  %3035 = vmatprep.subr.bf16.mxu1 %v3034_v23  ;;  %v3056_v23 = vpack.c.bf16 %v1267_v21, %v1266_v12  ;;  %v1233_v12 = vld [vmem:[%s5702_s2 + $0x68] sm:$0xff] }
  0xdb   :  { %v275_v31 = vpop.f32.mrb[2].mxu0  ;;  %v3390_v32 = vpop.f32.mrb[2].mxu1  ;;  %v2816_v39 = vmul.f32 -1.442695, %v136_v35  ;;  %v2818_v42 = vmul.f32 -1.442695, %v207_v40 }
  0xdc   :  { %3166 = vpow2.f32 %v2815_v29  ;;  %v3392_v33 = vpop.f32.mrb[3].mxu0  ;;  %v3394_v34 = vpop.f32.mrb[3].mxu1  ;;  %v3427_v54 = vadd.f32 %v275_v31, %v3386_v22  ;;  %v3460_v62 = vadd.f32 %v3390_v32, %v3386_v22  ;;  %v1275_v29 = vld [vmem:[%s5702_s2 + $0x1b8] sm:$0xff]  ;;  %v1258_v31 = vld [vmem:[%s5702_s2 + $0x130] sm:$0xff] }
  0xdd   :  { %3168 = vpow2.f32 %v2817_v30  ;;  %v3483_v8 = vadd.f32 %v3394_v34, %v3386_v22  ;;  %v3038_v30 = vpack.c.bf16 %v1275_v29, %v1274_v28  ;;  %v1259_v32 = vld [vmem:[%s5702_s2 + $0x138] sm:$0xff]  ;;  %v1222_v28 = vld [vmem:[%s5702_s2 + $0x10] sm:$0xff] }
  0xde   :  { %v2819_v56 = vmul.f32 -1.442695, %v3427_v54  ;;  %v2821_v4 = vmul.f32 -1.442695, %v3460_v62  ;;  %v3040_v34 = vpack.c.bf16 %v1259_v32, %v1258_v31  ;;  %v1223_v29 = vld [vmem:[%s5702_s2 + $0x18] sm:$0xff]  ;;  %v1240_v32 = vld [vmem:[%s5702_s2 + $0xa0] sm:$0xff] }
  0xe6   :  { %v3167_v36 = vpop.eup %3166 }
  0xe7   :  { %v3169_v37 = vpop.eup %3168  ;;  %v375_v38 = vadd.f32 1.0, %v3167_v36  ;;  %v1277_v36 = vld [vmem:[%s5702_s2 + $0x1c8] sm:$0xff] }
  0xe8   :  { %v377_v41 = vadd.f32 1.0, %v3169_v37 }
  0xe9   :  { %3170 = vrcp.f32 %v375_v38  ;;  %v1260_v38 = vld [vmem:[%s5702_s2 + $0x140] sm:$0xff] }
  0xea   :  { %3172 = vrcp.f32 %v377_v41 }
  0xeb   :  { %3174 = vpow2.f32 %v2816_v39  ;;  %v1261_v39 = vld [vmem:[%s5702_s2 + $0x148] sm:$0xff] }
  0xec   :  { %3176 = vpow2.f32 %v2818_v42  ;;  %v3044_v41 = vpack.c.bf16 %v1261_v39, %v1260_v38  ;;  %v1225_v38 = vld [vmem:[%s5702_s2 + $0x28] sm:$0xff] }
  0xf3   :  { %v3171_v43 = vpop.eup %3170 }
  0xf4   :  { %v3173_v44 = vpop.eup %3172  ;;  %v3398_v45 = vmul.f32 %v3171_v43, %v134_v25  ;;  %v1257_v25 = vld [vmem:[%s5702_s2 + $0x128] sm:$0xff]  ;;  %v1278_v43 = vld [vmem:[%s5702_s2 + $0x1d0] sm:$0xff] }
  0xf5   :  { %v3175_v46 = vpop.eup %3174  ;;  %v3400_v47 = vmul.f32 %v3173_v44, %v205_v26  ;;  %v2822_v26 = vmul.f32 -1.442695, %v3483_v8  ;;  %v3036_v27 = vpack.c.bf16 %v1257_v25, %v1256_v24  ;;  %v1279_v44 = vld [vmem:[%s5702_s2 + $0x1d8] sm:$0xff]  ;;  %v3604_v24 = vpop.permute.xlu1 %501  ;;  %v1238_v25 = vld [vmem:[%s5702_s2 + $0x90] sm:$0xff] }
  0xf6   :  { %421 = vrot.lane.b32.xlu1 %v3398_v45, %s3246_s7  ;;  %v376_v48 = vadd.f32 1.0, %v3175_v46  ;;  %v3177_v49 = vpop.eup %3176  ;;  %v1263_v46 = vld [vmem:[%s5702_s2 + $0x158] sm:$0xff]  ;;  %5848 = vst [vmem:[#allocation5_spill] sm:$0xff] %v3604_v24 }
  0xf7   :  { %818 = vrot.lane.b32.xlu0 %v3400_v47, %s3247_s18  ;;  %v378_v50 = vadd.f32 1.0, %v3177_v49  ;;  %3037 = vmatpush3.bf16.msra.mxu1 %v3036_v27 }
  0xf8   :  { %3178 = vrcp.f32 %v376_v48  ;;  %3039 = vmatprep.subr.bf16.mxu1 %v3038_v30  ;;  %v3000_v30 = vpack.c.bf16 %v1223_v29, %v1222_v28  ;;  %v1234_v29 = vld [vmem:[%s5702_s2 + $0x70] sm:$0xff] }
  0xf9   :  { %3180 = vrcp.f32 %v378_v50  ;;  %v3636_v39 = vpop.permute.xlu1 %599 }
  0xfa   :  { %425 = vrot.lane.b32.xlu1 %v3400_v47, %s3246_s7  ;;  %3182 = vpow2.f32 %v2819_v56  ;;  %v1281_v56 = vld [vmem:[%s5702_s2 + $0x1e8] sm:$0xff] }
  0xfb   :  { %814 = vrot.lane.b32.xlu0 %v3398_v45, %s3247_s18  ;;  %3184 = vpow2.f32 %v2821_v4  ;;  %3041 = vmatpush3.bf16.msra.mxu1 %v3040_v34  ;;  %v1283_v4 = vld [vmem:[%s5702_s2 + $0x1f8] sm:$0xff]  ;;  %v1241_v34 = vld [vmem:[%s5702_s2 + $0xa8] sm:$0xff] }
  0xfc   :  { %v3054_v9 = vpack.c.bf16 %v1283_v4, %v1282_v2  ;;  %v1248_v4 = vld [vmem:[%s5702_s2 + $0xe0] sm:$0xff] }
  0xfe   :  { %520 = vrot.lane.b32.xlu1 %v3398_v45, %s3248_s19 }
  0xff   :  { %916 = vrot.lane.b32.xlu0 %v3400_v47, %s3249_s20 }
 0x102   :  { %524 = vrot.lane.b32.xlu1 %v3400_v47, %s3248_s19  ;;  %v3179_v51 = vpop.eup %3178 }
 0x103   :  { %912 = vrot.lane.b32.xlu0 %v3398_v45, %s3249_s20  ;;  %v3422_v52 = vmul.f32 %v3179_v51, %v136_v35  ;;  %v3181_v53 = vpop.eup %3180  ;;  %v1276_v35 = vld [vmem:[%s5702_s2 + $0x1c0] sm:$0xff] }
 0x104   :  { %v3431_v55 = vmul.f32 %v3181_v53, %v207_v40  ;;  %v3183_v0 = vpop.eup %3182  ;;  %v3042_v37 = vpack.c.bf16 %v1277_v36, %v1276_v35  ;;  %v3534_v40 = vadd.f32 %v3392_v33, %v3386_v22  ;;  %v3046_v22 = vpack.c.bf16 %v1279_v44, %v1278_v43  ;;  %v1262_v33 = vld [vmem:[%s5702_s2 + $0x150] sm:$0xff]  ;;  %v1280_v53 = vld [vmem:[%s5702_s2 + $0x1e0] sm:$0xff] }
 0x105   :  { %v379_v10 = vadd.f32 1.0, %v3183_v0  ;;  %v3185_v42 = vpop.eup %3184  ;;  %v3048_v50 = vpack.c.bf16 %v1263_v46, %v1262_v33  ;;  %v3050_v59 = vpack.c.bf16 %v1281_v56, %v1280_v53  ;;  %v1236_v0 = vld [vmem:[%s5702_s2 + $0x80] sm:$0xff]  ;;  %v3002_v36 = vpack.c.bf16 %v1241_v34, %v1240_v32  ;;  %v1242_v44 = vld [vmem:[%s5702_s2 + $0xb0] sm:$0xff]  ;;  %v1245_v53 = vld [vmem:[%s5702_s2 + $0xc8] sm:$0xff] }
 0x106   :  { %618 = vrot.lane.b32.xlu1 %v3398_v45, %s3250_s21  ;;  %3043 = vmatprep.subr.bf16.mxu1 %v3042_v37  ;;  %v2820_v49 = vmul.f32 -1.442695, %v3534_v40  ;;  %v381_v51 = vadd.f32 1.0, %v3185_v42  ;;  %v2994_v3 = vpack.c.bf16 %v1237_v1, %v1236_v0  ;;  %v1224_v37 = vld [vmem:[%s5702_s2 + $0x20] sm:$0xff]  ;;  %v1226_v46 = vld [vmem:[%s5702_s2 + $0x30] sm:$0xff]  ;;  %v1231_v1 = vld [vmem:[%s5702_s2 + $0x58] sm:$0xff] }
 0x107   :  { %1014 = vrot.lane.b32.xlu0 %v3400_v47, %s3251_s22  ;;  %3186 = vrcp.f32 %v379_v10  ;;  %3045 = vmatpush3.bf16.msra.mxu1 %v3044_v41  ;;  %v2996_v10 = vpack.c.bf16 %v1221_v7, %v1220_v6  ;;  %v3004_v41 = vpack.c.bf16 %v1225_v38, %v1224_v37  ;;  %v1230_v0 = vld [vmem:[%s5702_s2 + $0x50] sm:$0xff]  ;;  %v1249_v6 = vld [vmem:[%s5702_s2 + $0xe8] sm:$0xff] }
 0x108   :  { %3188 = vpow2.f32 %v2822_v26  ;;  %3047 = vmatprep.subr.bf16.mxu1 %v3046_v22  ;;  %2995 = vmatprep.subr.bf16.mxu0 %v2994_v3  ;;  %v1239_v26 = vld [vmem:[%s5702_s2 + $0x98] sm:$0xff]  ;;  %v3016_v3 = vpack.c.bf16 %v1231_v1, %v1230_v0  ;;  %v1301_v32 = vld [vmem:[%s5702_s2 + $0x288] sm:$0xff]  ;;  %v2004_v1 = vld [vmem:[%s5711_s11] sm:$0xff] }
 0x109   :  { %3190 = vpow2.f32 %v2820_v49  ;;  %2997 = vmatpush3.bf16.msra.mxu0 %v2996_v10  ;;  %v2998_v27 = vpack.c.bf16 %v1239_v26, %v1238_v25  ;;  %v1243_v22 = vld [vmem:[%s5702_s2 + $0xb8] sm:$0xff]  ;;  %v1232_v10 = vld [vmem:[%s5702_s2 + $0x60] sm:$0xff]  ;;  %v1250_v26 = vld [vmem:[%s5702_s2 + $0xf0] sm:$0xff] }
 0x10a   :  { %622 = vrot.lane.b32.xlu1 %v3400_v47, %s3250_s21  ;;  %3192 = vrcp.f32 %v381_v51  ;;  %v3006_v33 = vpack.c.bf16 %v1243_v22, %v1242_v44  ;;  %v1244_v51 = vld [vmem:[%s5702_s2 + $0xc0] sm:$0xff]  ;;  %v3020_v21 = vpack.c.bf16 %v1233_v12, %v1232_v10  ;;  %v1333_v37 = vld [vmem:[%s5702_s2 + $0x388] sm:$0xff] }
 0x10b   :  { %423 = vrot.lane.b32.xlu0 %v3422_v52, %s3246_s7  ;;  %3049 = vmatpush3.bf16.msra.mxu1 %v3048_v50  ;;  %v3659_v50 = vpop.permute.xlu1 %697  ;;  %v448_v12 = vld [vmem:[%s5701_s1] ss:$8 sm:$0xf] }
 0x10c   :  { %3051 = vmatprep.subr.bf16.mxu1 %v3050_v59  ;;  %2999 = vmatprep.subr.bf16.mxu0 %v2998_v27  ;;  %v1228_v59 = vld [vmem:[%s5702_s2 + $0x40] sm:$0xff]  ;;  %v1251_v27 = vld [vmem:[%s5702_s2 + $0xf8] sm:$0xff] }
 0x10d   :  { %3001 = vmatpush3.bf16.msra.mxu0 %v3000_v30  ;;  %v3012_v61 = vpack.c.bf16 %v1229_v60, %v1228_v59  ;;  %v3022_v28 = vpack.c.bf16 %v1251_v27, %v1250_v26 }
 0x10e   :  { %716 = vrot.lane.b32.xlu1 %v3398_v45, %s3252_s23  ;;  %3003 = vmatprep.subr.bf16.mxu0 %v3002_v36  ;;  %v1332_v36 = vld [vmem:[%s5702_s2 + $0x380] sm:$0xff] }
 0x10f   :  { %427 = vrot.lane.b32.xlu0 %v3431_v55, %s3246_s7  ;;  %3053 = vmatpush3.bf16.msra.mxu1 %v3052_v63  ;;  %v1247_v63 = vld [vmem:[%s5702_s2 + $0xd8] sm:$0xff]  ;;  %v3694_v2 = vpop.permute.xlu1 %795  ;;  %v3090_v38 = vpack.c.bf16 %v1333_v37, %v1332_v36 }
 0x110   :  { %3055 = vmatprep.subr.bf16.mxu1 %v3054_v9  ;;  %v3018_v9 = vpack.c.bf16 %v1249_v6, %v1248_v4 }
 0x111   :  { %v3187_v48 = vpop.eup %3186  ;;  %3005 = vmatpush3.bf16.msra.mxu0 %v3004_v41 }
 0x112   :  { %720 = vrot.lane.b32.xlu1 %v3400_v47, %s3252_s23  ;;  %v3189_v57 = vpop.eup %3188  ;;  %v3564_v58 = vmul.f32 %v3187_v48, %v3427_v54  ;;  %v1227_v48 = vld [vmem:[%s5702_s2 + $0x38] sm:$0xff]  ;;  %3007 = vmatprep.subr.bf16.mxu0 %v3006_v33 }
 0x113   :  { %522 = vrot.lane.b32.xlu0 %v3422_v52, %s3248_s19  ;;  %v382_v54 = vadd.f32 1.0, %v3189_v57  ;;  %3057 = vmatpush3.bf16.msra.mxu1 %v3056_v23  ;;  %v3191_v31 = vpop.eup %3190  ;;  %v3008_v49 = vpack.c.bf16 %v1227_v48, %v1226_v46  ;;  %v3010_v57 = vpack.c.bf16 %v1245_v53, %v1244_v51  ;;  %v3717_v25 = vpop.permute.xlu1 %893 }
 0x114   :  { %v3193_v35 = vpop.eup %3192  ;;  %v380_v42 = vadd.f32 1.0, %v3191_v31  ;;  %v1300_v31 = vld [vmem:[%s5702_s2 + $0x280] sm:$0xff]  ;;  %3091 = vmatprep.subr.bf16.mxu1 %v3090_v38 }
 0x115   :  { %3194 = vrcp.f32 %v382_v54  ;;  %v3641_v43 = vmul.f32 %v3193_v35, %v3460_v62  ;;  %3009 = vmatpush3.bf16.msra.mxu0 %v3008_v49  ;;  %v3058_v34 = vpack.c.bf16 %v1301_v32, %v1300_v31  ;;  %v2827_v38 = vld [vmem:[%s5701_s1 + $0x3] ss:$8 sm:$0xf] }
 0x116   :  { %1010 = vrot.lane.b32.xlu1 %v3398_v45, %s3251_s22  ;;  %3196 = vrcp.f32 %v380_v42  ;;  %3011 = vmatprep.subr.bf16.mxu0 %v3010_v57  ;;  %v3761_v42 = vpop.permute.xlu0 %410 }
 0x117   :  { %526 = vrot.lane.b32.xlu0 %v3431_v55, %s3248_s19  ;;  %5849 = vst [vmem:[#allocation6_spill] sm:$0xff] %v3641_v43  ;;  %v3743_v35 = vpop.permute.xlu1 %991 }
 0x119   :  { %3013 = vmatpush3.bf16.msra.mxu0 %v3012_v61 }
 0x11a   :  { %1112 = vrot.lane.b32.xlu1 %v3400_v47, %s3253_s15  ;;  %v3771_v22 = vpop.permute.xlu0 %1209 }
 0x11b   :  { %620 = vrot.lane.b32.xlu0 %v3422_v52, %s3250_s21  ;;  %v3757_v41 = vpop.permute.xlu1 %1089  ;;  %5852 = vst [vmem:[#allocation9_spill] sm:$0xff] %v3771_v22 }
 0x11e   :  { %1108 = vrot.lane.b32.xlu1 %v3398_v45, %s3253_s15 }
 0x11f   :  { %624 = vrot.lane.b32.xlu0 %v3431_v55, %s3250_s21  ;;  %v3195_v62 = vpop.eup %3194  ;;  %v3767_v44 = vpop.permute.xlu1 %1187 }
 0x120   :  { %v3668_v56 = vmul.f32 %v3195_v62, %v3483_v8  ;;  %v1246_v8 = vld [vmem:[%s5702_s2 + $0xd0] sm:$0xff]  ;;  %v3197_v7 = vpop.eup %3196 }
 0x121   :  { %v3014_v54 = vpack.c.bf16 %v1247_v63, %v1246_v8  ;;  %v3715_v23 = vmul.f32 %v3197_v7, %v3534_v40  ;;  %v1235_v40 = vld [vmem:[%s5702_s2 + $0x78] sm:$0xff]  ;;  %v1658_v8 = vld [vmem:[%s5709_s9] sm:$0xff] }
 0x122   :  { %816 = vrot.lane.b32.xlu1 %v3422_v52, %s3247_s18  ;;  %5850 = vst [vmem:[#allocation7_spill] sm:$0xff] %v3668_v56  ;;  %v3024_v30 = vpack.c.bf16 %v1235_v40, %v1234_v29  ;;  %v2825_v29 = vld [vmem:[%s5701_s1 + $0x2] ss:$8 sm:$0xf] }
 0x123   :  { %718 = vrot.lane.b32.xlu0 %v3422_v52, %s3252_s23  ;;  %3015 = vmatprep.subr.bf16.mxu0 %v3014_v54  ;;  %5851 = vst [vmem:[#allocation8_spill] sm:$0xff] %v3715_v23  ;;  %v1651_v54 = vld [vmem:[%s5708_s8] sm:$0xff] }
 0x124   :  { %3017 = vmatpush3.bf16.msra.mxu0 %v3016_v3  ;;  %v437_v3 = vlaneseq  ;;  %v2826_v40 = vld [vmem:[%s5701_s1 + $0x2] ss:$8 sm:$0xf0] }
 0x125   :  { %3019 = vmatprep.subr.bf16.mxu0 %v3018_v9 }
 0x126   :  { %820 = vrot.lane.b32.xlu1 %v3431_v55, %s3247_s18  ;;  %v3829_v7 = vshrl.u32 %v437_v3, 7  ;;  %v3834_v10 = vand.u32 127, %v437_v3  ;;  %v2830_v3 = vld [vmem:[%s5701_s1 + $0x5] ss:$8 sm:$0xf0] }
 0x127   :  { %722 = vrot.lane.b32.xlu0 %v3431_v55, %s3252_s23 }
 0x128   :  { %3021 = vmatpush3.bf16.msra.mxu0 %v3020_v21  ;;  %v3845_v26 = vsub.s32 1, %v3829_v7  ;;  %vm439_vm1 = vcmp.lt.s32.totalorder %v3834_v10, 17  ;;  %v3865_v31 = vsub.s32 2, %v3829_v7  ;;  %v3868_v32 = vsub.s32 3, %v3829_v7 }
 0x129   :  { %3023 = vmatprep.subr.bf16.mxu0 %v3022_v28  ;;  %v2824_v28 = vld [vmem:[%s5701_s1 + $0x1] ss:$8 sm:$0xf0]  ;;  %vm536_vm2 = vcmp.lt.s32.totalorder %v3834_v10, 16  ;;  %vm634_vm3 = vcmp.lt.s32.totalorder %v3834_v10, 15  ;;  %vm732_vm4 = vcmp.lt.s32.totalorder %v3834_v10, 1 }
 0x12a   :  { %914 = vrot.lane.b32.xlu1 %v3422_v52, %s3249_s20  ;;  %vm830_vm5 = vcmp.lt.s32.totalorder %v3834_v10, 127  ;;  %vm928_vm6 = vcmp.lt.s32.totalorder %v3834_v10, 113  ;;  %vm1124_vm7 = vcmp.lt.s32.totalorder %v3834_v10, 111  ;;  %vm1026_vm8 = vcmp.lt.s32.totalorder %v3834_v10, 112 }
 0x12b   :  { %1016 = vrot.lane.b32.xlu0 %v3431_v55, %s3251_s22 }
 0x12c   :  { %3025 = vmatpush3.bf16.msra.mxu0 %v3024_v30 }
 0x12d   :  { %3059 = vmatprep.subr.bf16.mxu0 %v3058_v34 }
 0x12e   :  { %918 = vrot.lane.b32.xlu1 %v3431_v55, %s3249_s20 }
 0x12f   :  { %1110 = vrot.lane.b32.xlu0 %v3422_v52, %s3253_s15 }
 0x132   :  { %1012 = vrot.lane.b32.xlu1 %v3422_v52, %s3251_s22 }
 0x133   :  { %822 = vrot.lane.b32.xlu0 %v3564_v58, %s3247_s18 }
 0x136   :  { %1114 = vrot.lane.b32.xlu1 %v3431_v55, %s3253_s15 }
 0x137   :  { %920 = vrot.lane.b32.xlu0 %v3564_v58, %s3249_s20 }
 0x13a   :  { %1018 = vrot.lane.b32.xlu1 %v3564_v58, %s3251_s22 }
 0x13b   :  { %1116 = vrot.lane.b32.xlu0 %v3564_v58, %s3253_s15 }
 0x13e   :  { %429 = vrot.lane.b32.xlu1 %v3564_v58, %s3246_s7 }
 0x13f   :  { %528 = vrot.lane.b32.xlu0 %v3564_v58, %s3248_s19 }
 0x142   :  { %433 = vrot.lane.b32.xlu1 %v3641_v43, %s3246_s7 }
 0x143   :  { %532 = vrot.lane.b32.xlu0 %v3641_v43, %s3248_s19 }
 0x146   :  { %626 = vrot.lane.b32.xlu1 %v3564_v58, %s3250_s21 }
 0x147   :  { %435 = vrot.lane.b32.xlu0 %v3668_v56, %s3246_s7 }
 0x14a   :  { %630 = vrot.lane.b32.xlu1 %v3641_v43, %s3250_s21 }
 0x14b   :  { %534 = vrot.lane.b32.xlu0 %v3668_v56, %s3248_s19 }
 0x14e   :  { %924 = vrot.lane.b32.xlu1 %v3641_v43, %s3249_s20 }
 0x14f   :  { %632 = vrot.lane.b32.xlu0 %v3668_v56, %s3250_s21 }
 0x152   :  { %530 = vrot.lane.b32.xlu1 %v3715_v23, %s3248_s19 }
 0x153   :  { %730 = vrot.lane.b32.xlu0 %v3668_v56, %s3252_s23 }
 0x156   :  { %726 = vrot.lane.b32.xlu1 %v3715_v23, %s3252_s23 }
 0x157   :  { %724 = vrot.lane.b32.xlu0 %v3564_v58, %s3252_s23 }
 0x15a   :  { %824 = vrot.lane.b32.xlu1 %v3715_v23, %s3247_s18 }
 0x15b   :  { %728 = vrot.lane.b32.xlu0 %v3641_v43, %s3252_s23 }
 0x15e   :  { %828 = vrot.lane.b32.xlu1 %v3668_v56, %s3247_s18 }
 0x15f   :  { %826 = vrot.lane.b32.xlu0 %v3641_v43, %s3247_s18 }
 0x162   :  { %1020 = vrot.lane.b32.xlu1 %v3715_v23, %s3251_s22 }
 0x163   :  { %1022 = vrot.lane.b32.xlu0 %v3641_v43, %s3251_s22 }
 0x166   :  { %1024 = vrot.lane.b32.xlu1 %v3668_v56, %s3251_s22 }
 0x167   :  { %431 = vrot.lane.b32.xlu0 %v3715_v23, %s3246_s7 }
 0x168   :  { %v3777_v33 = vpop.permute.xlu1 %421 }
 0x169   :  { %5853 = vst [vmem:[#allocation10_spill] sm:$0xff] %v3777_v33  ;;  %v3779_v46 = vpop.permute.xlu0 %818 }
 0x16a   :  { %1120 = vrot.lane.b32.xlu1 %v3641_v43, %s3253_s15 }
 0x16b   :  { %628 = vrot.lane.b32.xlu0 %v3715_v23, %s3250_s21 }
 0x16c   :  { %v3785_v48 = vpop.permute.xlu1 %425 }
 0x16d   :  { %v3787_v62 = vpop.permute.xlu0 %814 }
 0x16e   :  { %5854 = vst [vmem:[#allocation11_spill] sm:$0xff] %v3787_v62  ;;  %1654 = vperm.xlu1 %3152, %v1651_v54   ;;  %v3882_v54 = vor.u32 %v2826_v40, %v2825_v29  ;;  %v2833_v40 = vld [vmem:[%s5701_s1 + $0x7] ss:$8 sm:$0xf] }
 0x16f   :  { %922 = vrot.lane.b32.xlu0 %v3715_v23, %s3249_s20  ;;  %v3975_v62 = vor.u32 %v2834_v11, %v2833_v40 }
 0x170   :  { %v3791_v49 = vpop.permute.xlu1 %520  ;;  %5864 = vst [vmem:[#allocation21_spill] sm:$0xff] %v3882_v54 }
 0x171   :  { %5855 = vst [vmem:[#allocation12_spill] sm:$0xff] %v3791_v49  ;;  %v3793_v51 = vpop.permute.xlu0 %916 }
 0x172   :  { %2007 = vperm.xlu1 %3152, %v2004_v1   ;;  %v2829_v1 = vld [vmem:[%s5701_s1 + $0x5] ss:$8 sm:$0xf] }
 0x173   :  { %926 = vrot.lane.b32.xlu0 %v3668_v56, %s3249_s20  ;;  %v3936_v17 = vor.u32 %v2830_v3, %v2829_v1  ;;  %v3954_v1 = vrot.slane %v3882_v54, %v3845_v26  ;;  %v3958_v3 = vrot.slane %v3882_v54, %v3865_v31 }
 0x174   :  { %v3797_v53 = vpop.permute.xlu1 %524 }
 0x175   :  { %v3799_v57 = vpop.permute.xlu0 %912  ;;  %5873 = vst [vmem:[#allocation30_spill] sm:$0xff] %v3954_v1  ;;  %5874 = vst [vmem:[#allocation31_spill] sm:$0xff] %v3958_v3 }
 0x176   :  { %5856 = vst [vmem:[#allocation13_spill] sm:$0xff] %v3799_v57  ;;  %3158 = vset.pattern.permute.xlu1 %v3243_v18  ;;  %v2823_v18 = vld [vmem:[%s5701_s1 + $0x1] ss:$8 sm:$0xf]  ;;  %v3972_v57 = vrot.slane %v3882_v54, %v3868_v32 }
 0x177   :  { %1118 = vrot.lane.b32.xlu0 %v3715_v23, %s3253_s15  ;;  %v3872_v36 = vor.u32 %v2824_v28, %v2823_v18 }
 0x178   :  { %v3803_v59 = vpop.permute.xlu1 %618  ;;  %5875 = vst [vmem:[#allocation32_spill] sm:$0xff] %v3972_v57 }
 0x179   :  { %5857 = vst [vmem:[#allocation14_spill] sm:$0xff] %v3803_v59  ;;  %v3805_v60 = vpop.permute.xlu0 %1014  ;;  %5863 = vst [vmem:[#allocation20_spill] sm:$0xff] %v3872_v36  ;;  %v3946_v19 = vrot.slane %v3872_v36, %v3865_v31  ;;  %v3950_v14 = vrot.slane %v3872_v36, %v3868_v32 }
 0x17b   :  { %1122 = vrot.lane.b32.xlu0 %v3668_v56, %s3253_s15  ;;  %5871 = vst [vmem:[#allocation28_spill] sm:$0xff] %v3946_v19  ;;  %5872 = vst [vmem:[#allocation29_spill] sm:$0xff] %v3950_v14 }
 0x17c   :  { %v3809_v61 = vpop.permute.xlu1 %622 }
 0x17d   :  { %v3814_v63 = vpop.permute.xlu0 %423 }
 0x17e   :  { %v446_v20 = vsel %vm439_vm1, %v3777_v33, %v3814_v63 }
 0x17f   :  { %1661 = vperm.xlu0 %3151, %v1658_v8   ;;  %v2828_v8 = vld [vmem:[%s5701_s1 + $0x3] ss:$8 sm:$0xf0] }
 0x180   :  { %v3819_v0 = vpop.permute.xlu1 %716 }
 0x181   :  { %5858 = vst [vmem:[#allocation15_spill] sm:$0xff] %v3819_v0  ;;  %v3824_v4 = vpop.permute.xlu0 %427 }
 0x182   :  { %5859 = vst [vmem:[#allocation16_spill] sm:$0xff] %v3824_v4 }
 0x183   :  { %3153 = vset.pattern.permute.xlu0 %v3238_v13  ;;  %v449_v13 = vld [vmem:[%s5701_s1] ss:$8 sm:$0xf0] }
 0x184   :  { %v3827_v6 = vpop.permute.xlu1 %720  ;;  %v3862_v30 = vor.u32 %v449_v13, %v448_v12  ;;  %v3892_v12 = vmul.f32 %v3761_v42, %v3422_v52  ;;  %v3896_v13 = vmul.f32 %v3761_v42, %v3400_v47  ;;  %v3910_v52 = vmul.f32 %v3761_v42, %v3431_v55 }
 0x185   :  { %v3831_v9 = vpop.permute.xlu0 %522  ;;  %v3914_v47 = vor.u32 %v2828_v8, %v2827_v38  ;;  %v3932_v38 = vrot.slane %v3872_v36, %v3845_v26 }
 0x186   :  { %5862 = vst [vmem:[#allocation19_spill] sm:$0xff] %v3862_v30  ;;  %v3902_v18 = vrot.slane %v3862_v30, %v3845_v26  ;;  %v3906_v28 = vrot.slane %v3862_v30, %v3865_v31  ;;  %v3928_v55 = vrot.slane %v3862_v30, %v3868_v32 }
 0x187   :  { %5868 = vst [vmem:[#allocation25_spill] sm:$0xff] %v3914_v47  ;;  %5870 = vst [vmem:[#allocation27_spill] sm:$0xff] %v3932_v38  ;;  %v3980_v36 = vrot.slane %v3914_v47, %v3845_v26  ;;  %v3984_v30 = vrot.slane %v3914_v47, %v3865_v31  ;;  %v4012_v54 = vrot.slane %v3914_v47, %v3868_v32 }
 0x188   :  { %v3839_v21 = vpop.permute.xlu1 %1010  ;;  %5865 = vst [vmem:[#allocation22_spill] sm:$0xff] %v3902_v18  ;;  %5866 = vst [vmem:[#allocation23_spill] sm:$0xff] %v3906_v28  ;;  %v493_v33 = vmul.f32 %v3902_v18, %v446_v20  ;;  %v3997_v20 = vrot.slane %v3936_v17, %v3845_v26 }
 0x189   :  { %5860 = vst [vmem:[#allocation17_spill] sm:$0xff] %v3839_v21  ;;  %v3847_v27 = vpop.permute.xlu0 %526  ;;  %5869 = vst [vmem:[#allocation26_spill] sm:$0xff] %v3928_v55  ;;  %v543_v21 = vsel %vm536_vm2, %v3791_v49, %v3831_v9  ;;  %v3988_v49 = vor.u32 %v2832_v15, %v2831_v16  ;;  %v445_v15 = vsel %vm439_vm1, %v3814_v63, %v3785_v48 }
 0x18a   :  { %5861 = vst [vmem:[#allocation18_spill] sm:$0xff] %v3847_v27  ;;  %5876 = vst [vmem:[#allocation33_spill] sm:$0xff] %v3980_v36  ;;  %v444_v16 = vsel %vm439_vm1, %v3785_v48, %v3824_v4  ;;  %v4023_v63 = vrot.slane %v3975_v62, %v3865_v31  ;;  %v505_v48 = vmul.f32 %v3604_v24, %v493_v33 }
 0x18b   :  { %5877 = vst [vmem:[#allocation34_spill] sm:$0xff] %v3984_v30  ;;  %5879 = vst [vmem:[#allocation36_spill] sm:$0xff] %v3988_v49  ;;  %v494_v47 = vmul.f32 %v3906_v28, %v445_v15  ;;  %v495_v23 = vmul.f32 %v3928_v55, %v444_v16  ;;  %v4055_v15 = vrot.slane %v3936_v17, %v3868_v32 }
 0x18c   :  { %v3870_v34 = vpop.permute.xlu1 %1112  ;;  %5880 = vst [vmem:[#allocation37_spill] sm:$0xff] %v3997_v20  ;;  %5882 = vst [vmem:[#allocation39_spill] sm:$0xff] %v4012_v54  ;;  %v4060_v55 = vrot.slane %v3975_v62, %v3845_v26  ;;  %v4064_v28 = vrot.slane %v3988_v49, %v3868_v32 }
 0x18d   :  { %v3874_v37 = vpop.permute.xlu0 %620  ;;  %5884 = vst [vmem:[#allocation41_spill] sm:$0xff] %v4023_v63  ;;  %5888 = vst [vmem:[#allocation45_spill] sm:$0xff] %v4055_v15 }
 0x18e   :  { %v641_v11 = vsel %vm634_vm3, %v3803_v59, %v3874_v37  ;;  %v591_v59 = vmul.f32 %v3932_v38, %v543_v21  ;;  %v542_v21 = vsel %vm536_vm2, %v3831_v9, %v3797_v53  ;;  %5889 = vst [vmem:[#allocation46_spill] sm:$0xff] %v4060_v55  ;;  %5890 = vst [vmem:[#allocation47_spill] sm:$0xff] %v4064_v28 }
 0x18f   :  { %v689_v38 = vmul.f32 %v3954_v1, %v641_v11  ;;  %v4051_v1 = vrot.slane %v3988_v49, %v3865_v31  ;;  %v592_v16 = vmul.f32 %v3946_v19, %v542_v21 }
 0x190   :  { %v3912_v29 = vpop.permute.xlu1 %1108  ;;  %v603_v9 = vmul.f32 %v3636_v39, %v591_v59 }
 0x191   :  { %5867 = vst [vmem:[#allocation24_spill] sm:$0xff] %v3912_v29  ;;  %v3934_v8 = vpop.permute.xlu0 %624  ;;  %v2836_v29 = vld [vmem:[%s5701_s1 + $0x40] ss:$8 sm:$0xf0]  ;;  %5887 = vst [vmem:[#allocation44_spill] sm:$0xff] %v4051_v1  ;;  %v701_v21 = vmul.f32 %v3659_v50, %v689_v38 }
 0x192   :  { %v3999_v18 = vor.u32 %v2836_v29, %v2835_v5  ;;  %v4019_v29 = vrot.slane %v3936_v17, %v3865_v31 }
 0x194   :  { %v3986_v56 = vpop.permute.xlu1 %816  ;;  %5881 = vst [vmem:[#allocation38_spill] sm:$0xff] %v3999_v18  ;;  %5883 = vst [vmem:[#allocation40_spill] sm:$0xff] %v4019_v29  ;;  %v4045_v33 = vrot.slane %v3999_v18, %v3845_v26  ;;  %v4068_v59 = vrot.slane %v3999_v18, %v3865_v31  ;;  %v506_v31 = vmul.f32 %v3604_v24, %v494_v47 }
 0x195   :  { %5878 = vst [vmem:[#allocation35_spill] sm:$0xff] %v3986_v56  ;;  %v719_v40 = vpop.permute.xlu0 %718  ;;  %v639_v47 = vsel %vm634_vm3, %v3809_v61, %v3934_v8 }
 0x196   :  { %v739_v5 = vsel %vm732_vm4, %v3819_v0, %v719_v40  ;;  %v4036_v0 = vrot.slane %v3988_v49, %v3845_v26  ;;  %5886 = vst [vmem:[#allocation43_spill] sm:$0xff] %v4045_v33  ;;  %5891 = vst [vmem:[#allocation48_spill] sm:$0xff] %v4068_v59  ;;  %v640_v26 = vsel %vm634_vm3, %v3874_v37, %v3809_v61 }
 0x197   :  { %v787_v11 = vmul.f32 %v3980_v36, %v739_v5  ;;  %v513_v5 = vadd.f32 %v505_v48, %v3892_v12  ;;  %v541_v36 = vsel %vm536_vm2, %v3797_v53, %v3847_v27  ;;  %v507_v12 = vmul.f32 %v3604_v24, %v495_v23 }
 0x198   :  { %v4032_v4 = vpop.permute.xlu1 %820  ;;  %5885 = vst [vmem:[#allocation42_spill] sm:$0xff] %v4036_v0  ;;  %v836_v53 = vsel %vm830_vm5, %v3986_v56, %v3779_v46  ;;  %v738_v23 = vsel %vm732_vm4, %v719_v40, %v3827_v6  ;;  %v604_v56 = vmul.f32 %v3636_v39, %v592_v16  ;;  %v593_v24 = vmul.f32 %v3950_v14, %v541_v36  ;;  %v1320_v14 = vld [vmem:[%s5702_s2 + $0x320] sm:$0xff] }
 0x199   :  { %v4040_v43 = vpop.permute.xlu0 %722  ;;  %v611_v38 = vadd.f32 %v603_v9, %v513_v5  ;;  %v799_v27 = vmul.f32 %v3694_v2, %v787_v11  ;;  %v690_v49 = vmul.f32 %v3958_v3, %v640_v26  ;;  %v4108_v9 = vrot.slane %v3999_v18, %v3868_v32 }
 0x19a   :  { %v835_v61 = vsel %vm830_vm5, %v3779_v46, %v4032_v4  ;;  %v691_v16 = vmul.f32 %v3972_v57, %v639_v47  ;;  %v788_v36 = vmul.f32 %v3984_v30, %v738_v23  ;;  %v737_v26 = vsel %vm732_vm4, %v3827_v6, %v4040_v43 }
 0x19b   :  { %5893 = vst [vmem:[#allocation50_spill] sm:$0xff] %v4108_v9  ;;  %v709_v5 = vadd.f32 %v701_v21, %v611_v38  ;;  %v514_v46 = vadd.f32 %v506_v31, %v3896_v13  ;;  %v605_v23 = vmul.f32 %v3636_v39, %v593_v24  ;;  %v886_v6 = vmul.f32 %v4019_v29, %v835_v61 }
 0x19c   :  { %v4081_v19 = vpop.permute.xlu1 %914  ;;  %v703_v24 = vmul.f32 %v3659_v50, %v691_v16 }
 0x19d   :  { %5892 = vst [vmem:[#allocation49_spill] sm:$0xff] %v4081_v19  ;;  %v4089_v48 = vpop.permute.xlu0 %1016  ;;  %v934_v37 = vsel %vm928_vm6, %v4081_v19, %v3793_v51  ;;  %v885_v19 = vmul.f32 %v3997_v20, %v836_v53  ;;  %v4126_v53 = vrot.slane %v3975_v62, %v3868_v32  ;;  %v807_v38 = vadd.f32 %v799_v27, %v709_v5 }
 0x19e   :  { %v983_v40 = vmul.f32 %v4036_v0, %v934_v37  ;;  %v515_v37 = vadd.f32 %v507_v12, %v3910_v52  ;;  %v702_v0 = vmul.f32 %v3659_v50, %v690_v49  ;;  %v612_v20 = vadd.f32 %v604_v56, %v514_v46 }
 0x19f   :  { %5894 = vst [vmem:[#allocation51_spill] sm:$0xff] %v4126_v53  ;;  %v897_v13 = vmul.f32 %v3717_v25, %v885_v19  ;;  %v789_v27 = vmul.f32 %v4012_v54, %v737_v26  ;;  %v800_v49 = vmul.f32 %v3694_v2, %v788_v36  ;;  %v898_v26 = vmul.f32 %v3717_v25, %v886_v6 }
 0x1a0   :  { %v919_v11 = vpop.permute.xlu1 %918  ;;  %v995_v52 = vmul.f32 %v3743_v35, %v983_v40  ;;  %v613_v16 = vadd.f32 %v605_v23, %v515_v37  ;;  %v710_v36 = vadd.f32 %v702_v0, %v612_v20 }
 0x1a1   :  { %v4122_v21 = vpop.permute.xlu0 %1110  ;;  %v933_v47 = vsel %vm928_vm6, %v3793_v51, %v919_v11  ;;  %v905_v19 = vadd.f32 %v897_v13, %v807_v38  ;;  %v1031_v38 = vsel %vm1026_vm8, %v3805_v60, %v4089_v48 }
 0x1a2   :  { %v1130_v32 = vsel %vm1124_vm7, %v4122_v21, %v3870_v34  ;;  %v984_v51 = vmul.f32 %v4051_v1, %v933_v47  ;;  %v801_v47 = vmul.f32 %v3694_v2, %v789_v27  ;;  %v808_v1 = vadd.f32 %v800_v49, %v710_v36 }
 0x1a3   :  { %v1179_v5 = vmul.f32 %v4045_v33, %v1130_v32  ;;  %v1003_v32 = vadd.f32 %v995_v52, %v905_v19 }
 0x1a4   :  { %v4143_v31 = vpop.permute.xlu1 %1012  ;;  %v996_v37 = vmul.f32 %v3743_v35, %v984_v51  ;;  %v906_v52 = vadd.f32 %v898_v26, %v808_v1 }
 0x1a5   :  { %v4148_v12 = vpop.permute.xlu0 %822  ;;  %v1032_v56 = vsel %vm1026_vm8, %v4143_v31, %v3805_v60  ;;  %v1191_v23 = vmul.f32 %v3767_v44, %v1179_v5 }
 0x1a6   :  { %5895 = vst [vmem:[#allocation52_spill] sm:$0xff] %v4148_v12  ;;  %v834_v61 = vsel %vm830_vm5, %v4032_v4, %v4148_v12  ;;  %v1081_v40 = vmul.f32 %v4060_v55, %v1032_v56  ;;  %v711_v4 = vadd.f32 %v703_v24, %v613_v16  ;;  %v1082_v24 = vmul.f32 %v4023_v63, %v1031_v38  ;;  %v5919_v63 = vld [vmem:[#allocation10_spill] sm:$0xff] }
 0x1a7   :  { %v887_v46 = vmul.f32 %v4055_v15, %v834_v61  ;;  %v1004_v61 = vadd.f32 %v996_v37, %v906_v52 }
 0x1a8   :  { %v1093_v13 = vmul.f32 %v3757_v41, %v1081_v40  ;;  %v1115_v33 = vpop.permute.xlu1 %1114  ;;  %v809_v56 = vadd.f32 %v801_v47, %v711_v4 }
 0x1a9   :  { %v4169_v0 = vpop.permute.xlu0 %920  ;;  %v1129_v20 = vsel %vm1124_vm7, %v3870_v34, %v1115_v33  ;;  %v899_v6 = vmul.f32 %v3717_v25, %v887_v46  ;;  %v1094_v46 = vmul.f32 %v3757_v41, %v1082_v24 }
 0x1aa   :  { %5896 = vst [vmem:[#allocation53_spill] sm:$0xff] %v4169_v0  ;;  %v932_v60 = vsel %vm928_vm6, %v919_v11, %v4169_v0  ;;  %v1101_v27 = vadd.f32 %v1093_v13, %v1003_v32  ;;  %v1180_v51 = vmul.f32 %v4068_v59, %v1129_v20 }
 0x1ab   :  { %v985_v49 = vmul.f32 %v4064_v28, %v932_v60  ;;  %v907_v11 = vadd.f32 %v899_v6, %v809_v56  ;;  %v1102_v4 = vadd.f32 %v1094_v46, %v1004_v61  ;;  %v1316_v6 = vld [vmem:[%s5702_s2 + $0x300] sm:$0xff]  ;;  %v1317_v60 = vld [vmem:[%s5702_s2 + $0x308] sm:$0xff]  ;;  %v4225_v56 = vmul.f32 %v3761_v42, %v3564_v58  ;;  %v5916_v28 = vld [vmem:[#allocation20_spill] sm:$0xff] }
 0x1ac   :  { %v4182_v19 = vpop.permute.xlu1 %1018  ;;  %v1199_v34 = vadd.f32 %v1191_v23, %v1101_v27  ;;  %v1192_v47 = vmul.f32 %v3767_v44, %v1180_v51  ;;  %v454_v27 = vsub.s32 0, %v3829_v7  ;;  %v1335_v51 = vld [vmem:[%s5702_s2 + $0x398] sm:$0xff]  ;;  %v4231_v61 = vmul.f32 %v3761_v42, %v3398_v45 }
 0x1ad   :  { %5897 = vst [vmem:[#allocation54_spill] sm:$0xff] %v4182_v19  ;;  %v997_v5 = vmul.f32 %v3743_v35, %v985_v49  ;;  %v4185_v40 = vpop.permute.xlu0 %1116  ;;  %v1030_v1 = vsel %vm1026_vm8, %v4089_v48, %v4182_v19  ;;  %v1334_v49 = vld [vmem:[%s5702_s2 + $0x390] sm:$0xff]  ;;  %5900 = vst [vmem:[#allocation57_spill] sm:$0xff] %v4225_v56  ;;  %v4244_v58 = vsub.s32 7, %v3829_v7 }
 0x1ae   :  { %5898 = vst [vmem:[#allocation55_spill] sm:$0xff] %v4185_v40  ;;  %v1128_v16 = vsel %vm1124_vm7, %v1115_v33, %v4185_v40  ;;  %v1083_v36 = vmul.f32 %v4126_v53, %v1030_v1  ;;  %v4196_v26 = vadd.f32 %v3771_v22, %v1199_v34  ;;  %v1200_v23 = vadd.f32 %v1192_v47, %v1102_v4  ;;  %v5905_v47 = vld [vmem:[#allocation8_spill] sm:$0xff] }
 0x1af   :  { %v1181_v38 = vmul.f32 %v4108_v9, %v1128_v16  ;;  %v1005_v32 = vadd.f32 %v997_v5, %v907_v11  ;;  %v4234_v5 = vsub.s32 4, %v3829_v7  ;;  %v5902_v11 = vld [vmem:[#allocation6_spill] sm:$0xff]  ;;  %v4251_v45 = vmul.f32 %v3761_v42, %v5905_v47  ;;  %v5914_v47 = vld [vmem:[#allocation19_spill] sm:$0xff] }
 0x1b0   :  { %5899 = vst [vmem:[#allocation56_spill] sm:$0xff] %v4196_v26  ;;  %v1095_v13 = vmul.f32 %v3757_v41, %v1083_v36  ;;  %1412 = vmatprep.mubr.f32.mxu0 %v4196_v26  ;;  %v4203_v48 = vpop.permute.xlu1 %429  ;;  %v4241_v16 = vmul.f32 %v3761_v42, %v5902_v11  ;;  %v3092_v36 = vpack.c.bf16 %v1317_v60, %v1316_v6  ;;  %v5911_v6 = vld [vmem:[#allocation7_spill] sm:$0xff]  ;;  %v4294_v53 = vsub.s32 6, %v3829_v7  ;;  %v1339_v26 = vld [vmem:[%s5702_s2 + $0x3b8] sm:$0xff] }
 0x1b1   :  { %v4205_v33 = vpop.permute.xlu0 %528  ;;  %v1193_v37 = vmul.f32 %v3767_v44, %v1181_v38  ;;  %v4247_v46 = vadd.f32 %v3771_v22, %v1200_v23  ;;  %5906 = vst [vmem:[#allocation8_spill] sm:$0xff] %v4251_v45  ;;  %v3094_v38 = vpack.c.bf16 %v1335_v51, %v1334_v49  ;;  %v4260_v4 = vrot.slane %v3936_v17, %v454_v27  ;;  %v1336_v49 = vld [vmem:[%s5702_s2 + $0x3a0] sm:$0xff]  ;;  %v1337_v51 = vld [vmem:[%s5702_s2 + $0x3a8] sm:$0xff] }
 0x1b2   :  { %v1103_v20 = vadd.f32 %v1095_v13, %v1005_v32  ;;  %5903 = vst [vmem:[#allocation6_spill] sm:$0xff] %v4241_v16  ;;  %v1318_v32 = vld [vmem:[%s5702_s2 + $0x310] sm:$0xff]  ;;  %v1319_v13 = vld [vmem:[%s5702_s2 + $0x318] sm:$0xff]  ;;  %v4266_v23 = vrot.slane %v3999_v18, %v454_v27  ;;  %v4270_v60 = vmul.f32 %v3761_v42, %v5911_v6  ;;  %v4282_v11 = vrot.slane %v3975_v62, %v454_v27  ;;  %v1324_v18 = vld [vmem:[%s5702_s2 + $0x340] sm:$0xff] }
 0x1b3   :  { %5904 = vst [vmem:[#allocation59_spill] sm:$0xff] %v4247_v46  ;;  %5907 = vst [vmem:[#allocation60_spill] sm:$0xff] %v4260_v4  ;;  %v4285_v9 = vrot.slane %v5914_v47, %v454_v27  ;;  %v4291_v6 = vsub.s32 5, %v3829_v7  ;;  %v4298_v15 = vrot.slane %v5916_v28, %v4234_v5  ;;  %v4302_v59 = vrot.slane %v5914_v47, %v4234_v5  ;;  %v5921_v7 = vld [vmem:[#allocation21_spill] sm:$0xff]  ;;  %v5932_v16 = vld [vmem:[#allocation12_spill] sm:$0xff] }
 0x1b4   :  { %v4215_v52 = vpop.permute.xlu1 %433  ;;  %v1201_v24 = vadd.f32 %v1193_v37, %v1103_v20  ;;  %v5908_v37 = vld [vmem:[#allocation36_spill] sm:$0xff]  ;;  %5910 = vst [vmem:[#allocation61_spill] sm:$0xff] %v4266_v23  ;;  %5912 = vst [vmem:[#allocation7_spill] sm:$0xff] %v4270_v60  ;;  %v3096_v54 = vpack.c.bf16 %v1319_v13, %v1318_v32  ;;  %v4310_v30 = vrot.slane %v5914_v47, %v4244_v58 }
 0x1b5   :  { %v4227_v34 = vpop.permute.xlu0 %532  ;;  %v4263_v20 = vrot.slane %v5908_v37, %v454_v27  ;;  %5913 = vst [vmem:[#allocation62_spill] sm:$0xff] %v4282_v11  ;;  %5915 = vst [vmem:[#allocation19_spill] sm:$0xff] %v4285_v9  ;;  %v4314_v29 = vrot.slane %v5921_v7, %v4234_v5  ;;  %v4317_v57 = vrot.slane %v5916_v28, %v454_v27  ;;  %v4401_v60 = vld [vmem:[%s5702_s2 + $0x298] sm:$0xff] }
 0x1b6   :  { %v4237_v1 = vadd.f32 %v3771_v22, %v1201_v24  ;;  %5917 = vst [vmem:[#allocation20_spill] sm:$0xff] %v4298_v15  ;;  %5918 = vst [vmem:[#allocation63_spill] sm:$0xff] %v4302_v59  ;;  %v3098_v3 = vpack.c.bf16 %v1337_v51, %v1336_v49  ;;  %v4332_v13 = vrot.slane %v5921_v7, %v454_v27  ;;  %v5927_v49 = vld [vmem:[#allocation25_spill] sm:$0xff] }
 0x1b7   :  { %5909 = vst [vmem:[#allocation36_spill] sm:$0xff] %v4263_v20  ;;  %5920 = vst [vmem:[#allocation10_spill] sm:$0xff] %v4310_v30  ;;  %v4339_v51 = vrot.slane %v5927_v49, %v454_v27  ;;  %v4352_v19 = vrot.slane %v5916_v28, %v4291_v6  ;;  %v4356_v27 = vrot.slane %v5916_v28, %v4294_v53 }
 0x1b8   :  { %5901 = vst [vmem:[#allocation58_spill] sm:$0xff] %v4237_v1  ;;  %1482 = vmatprep.mubr.f32.mxu1 %v4237_v1  ;;  %v4273_v24 = vpop.permute.xlu1 %626  ;;  %5922 = vst [vmem:[#allocation21_spill] sm:$0xff] %v4314_v29  ;;  %v1338_v1 = vld [vmem:[%s5702_s2 + $0x3b0] sm:$0xff]  ;;  %v4360_v0 = vrot.slane %v5927_v49, %v4234_v5 }
 0x1b9   :  { %v4287_v42 = vpop.permute.xlu0 %435  ;;  %1483 = vmatmul.mubr.f32.vlgmr.msra.gmra.mrb[4].mxu1 %v4247_v46  ;;  %5923 = vst [vmem:[#allocation64_spill] sm:$0xff] %v4317_v57  ;;  %5925 = vst [vmem:[#allocation66_spill] sm:$0xff] %v4332_v13  ;;  %v3102_v22 = vpack.c.bf16 %v1339_v26, %v1338_v1  ;;  %v4425_v26 = vrot.slane %v3975_v62, %v4234_v5  ;;  %v4430_v1 = vld [vmem:[%s5702_s2 + $0x210] sm:$0xff] }
 0x1ba   :  { %v447_v55 = vsel %vm439_vm1, %v4287_v42, %v5919_v63  ;;  %3093 = vmatpush3.bf16.msra.mxu1 %v3092_v36  ;;  %v1321_v63 = vld [vmem:[%s5702_s2 + $0x328] sm:$0xff]  ;;  %v4327_v36 = vrot.slane %v5916_v28, %v4244_v58  ;;  %5928 = vst [vmem:[#allocation25_spill] sm:$0xff] %v4339_v51  ;;  %5929 = vst [vmem:[#allocation68_spill] sm:$0xff] %v4352_v19  ;;  %v4377_v28 = vld [vmem:[%s5702_s2 + $0x200] sm:$0xff]  ;;  %v4396_v19 = vrot.slane %v3936_v17, %v4234_v5 }
 0x1bb   :  { %3095 = vmatprep.subr.bf16.mxu1 %v3094_v38  ;;  %v4336_v38 = vrot.slane %v5921_v7, %v4244_v58  ;;  %v492_v46 = vmul.f32 %v4285_v9, %v447_v55  ;;  %5930 = vst [vmem:[#allocation69_spill] sm:$0xff] %v4356_v27  ;;  %5931 = vst [vmem:[#allocation70_spill] sm:$0xff] %v4360_v0  ;;  %v4368_v55 = vrot.slane %v5927_v49, %v4291_v6  ;;  %v4382_v27 = vld [vmem:[%s5702_s2 + $0x208] sm:$0xff] }
 0x1bc   :  { %5924 = vst [vmem:[#allocation65_spill] sm:$0xff] %v4327_v36  ;;  %v4329_v32 = vpop.permute.xlu1 %630  ;;  %v4372_v9 = vrot.slane %v5927_v49, %v4294_v53  ;;  %5935 = vst [vmem:[#allocation72_spill] sm:$0xff] %v4377_v28  ;;  %v4472_v28 = vrot.slane %v5914_v47, %v4294_v53 }
 0x1bd   :  { %5926 = vst [vmem:[#allocation67_spill] sm:$0xff] %v4336_v38  ;;  %v4348_v40 = vpop.permute.xlu0 %534  ;;  %5933 = vst [vmem:[#allocation12_spill] sm:$0xff] %v4368_v55  ;;  %v3100_v55 = vpack.c.bf16 %v1321_v63, %v1320_v14  ;;  %v1322_v14 = vld [vmem:[%s5702_s2 + $0x330] sm:$0xff]  ;;  %v4413_v63 = vrot.slane %v3936_v17, %v4291_v6 }
 0x1be   :  { %v544_v45 = vsel %vm536_vm2, %v4348_v40, %v5932_v16  ;;  %5934 = vst [vmem:[#allocation71_spill] sm:$0xff] %v4372_v9  ;;  %5936 = vst [vmem:[#allocation73_spill] sm:$0xff] %v4382_v27  ;;  %v4387_v16 = vld [vmem:[%s5702_s2 + $0x290] sm:$0xff]  ;;  %3097 = vmatpush3.bf16.msra.mxu1 %v3096_v54  ;;  %v4392_v9 = vrot.slane %v5927_v49, %v4244_v58  ;;  %v1323_v54 = vld [vmem:[%s5702_s2 + $0x338] sm:$0xff]  ;;  %v4417_v49 = vrot.slane %v3936_v17, %v4294_v53 }
 0x1bf   :  { %5937 = vst [vmem:[#allocation74_spill] sm:$0xff] %v4387_v16  ;;  %v590_v12 = vmul.f32 %v4317_v57, %v544_v45  ;;  %5939 = vst [vmem:[#allocation76_spill] sm:$0xff] %v4396_v19  ;;  %3099 = vmatprep.subr.bf16.mxu1 %v3098_v3  ;;  %v4421_v3 = vrot.slane %v3936_v17, %v4244_v58  ;;  %v1340_v57 = vld [vmem:[%s5702_s2 + $0x3c0] sm:$0xff]  ;;  %v4454_v19 = vld [vmem:[%s5702_s2 + $0x218] sm:$0xff]  ;;  %v3104_v0 = vpack.c.bf16 %v1323_v54, %v1322_v14 }
 0x1c0   :  { %5938 = vst [vmem:[#allocation75_spill] sm:$0xff] %v4392_v9  ;;  %5940 = vst [vmem:[#allocation77_spill] sm:$0xff] %v4401_v60  ;;  %v4409_v45 = vpop.permute.xlu1 %924  ;;  %v4449_v9 = vrot.slane %v5914_v47, %v4291_v6  ;;  %v1325_v27 = vld [vmem:[%s5702_s2 + $0x348] sm:$0xff]  ;;  %v5956_v14 = vld [vmem:[#allocation35_spill] sm:$0xff] }
 0x1c1   :  { %5941 = vst [vmem:[#allocation78_spill] sm:$0xff] %v4409_v45  ;;  %5942 = vst [vmem:[#allocation79_spill] sm:$0xff] %v4413_v63  ;;  %v5947_v45 = vld [vmem:[#allocation5_spill] sm:$0xff]  ;;  %v5953_v63 = vld [vmem:[#allocation14_spill] sm:$0xff]  ;;  %v602_v38 = vmul.f32 %v3636_v39, %v590_v12 }
 0x1c2   :  { %5943 = vst [vmem:[#allocation80_spill] sm:$0xff] %v4417_v49  ;;  %5944 = vst [vmem:[#allocation81_spill] sm:$0xff] %v4421_v3  ;;  %v1341_v49 = vld [vmem:[%s5702_s2 + $0x3c8] sm:$0xff]  ;;  %v504_v17 = vmul.f32 %v5947_v45, %v492_v46  ;;  %v4439_v3 = vpop.permute.xlu0 %632  ;;  %v4459_v46 = vld [vmem:[%s5702_s2 + $0x2a0] sm:$0xff]  ;;  %3101 = vmatpush3.bf16.msra.mxu1 %v3100_v55 }
 0x1c3   :  { %5945 = vst [vmem:[#allocation82_spill] sm:$0xff] %v4425_v26  ;;  %5946 = vst [vmem:[#allocation83_spill] sm:$0xff] %v4430_v1  ;;  %v4443_v26 = vrot.slane %v3975_v62, %v4291_v6  ;;  %3103 = vmatprep.subr.bf16.mxu1 %v3102_v22  ;;  %v3106_v47 = vpack.c.bf16 %v1341_v49, %v1340_v57  ;;  %v1342_v55 = vld [vmem:[%s5702_s2 + $0x3d0] sm:$0xff]  ;;  %v1343_v12 = vld [vmem:[%s5702_s2 + $0x3d8] sm:$0xff]  ;;  %v4502_v22 = vrot.slane %v3975_v62, %v4244_v58 }
 0x1c4   :  { %5949 = vst [vmem:[#allocation84_spill] sm:$0xff] %v4449_v9  ;;  %5950 = vst [vmem:[#allocation85_spill] sm:$0xff] %v4454_v19  ;;  %v642_v9 = vsel %vm634_vm3, %v4439_v3, %v5953_v63  ;;  %v4483_v63 = vrot.slane %v3975_v62, %v4294_v53  ;;  %v5961_v16 = vld [vmem:[#allocation13_spill] sm:$0xff]  ;;  %v4523_v57 = vrot.slane %v5921_v7, %v4291_v6  ;;  %v4528_v49 = vld [vmem:[%s5702_s2 + $0x228] sm:$0xff] }
 0x1c5   :  { %5948 = vst [vmem:[#allocation5_spill] sm:$0xff] %v4443_v26  ;;  %5951 = vst [vmem:[#allocation86_spill] sm:$0xff] %v4459_v46  ;;  %v4464_v26 = vld [vmem:[%s5702_s2 + $0x2a8] sm:$0xff]  ;;  %v688_v56 = vmul.f32 %v4332_v13, %v642_v9  ;;  %v5957_v9 = vld [vmem:[#allocation11_spill] sm:$0xff]  ;;  %v4498_v13 = vpop.permute.xlu1 %530 }
 0x1c6   :  { %5952 = vst [vmem:[#allocation87_spill] sm:$0xff] %v4464_v26  ;;  %5954 = vst [vmem:[#allocation14_spill] sm:$0xff] %v4472_v28  ;;  %v837_v54 = vsel %vm830_vm5, %v5957_v9, %v5956_v14  ;;  %v5960_v28 = vld [vmem:[#allocation49_spill] sm:$0xff]  ;;  %v512_v9 = vadd.f32 %v504_v17, %v4231_v61  ;;  %v4533_v46 = vld [vmem:[%s5702_s2 + $0x2b0] sm:$0xff]  ;;  %v4546_v17 = vrot.slane %v5921_v7, %v4294_v53  ;;  %3105 = vmatpush3.bf16.msra.mxu1 %v3104_v0 }
 0x1c7   :  { %5955 = vst [vmem:[#allocation88_spill] sm:$0xff] %v4483_v63  ;;  %5958 = vst [vmem:[#allocation35_spill] sm:$0xff] %v4498_v13  ;;  %v4511_v63 = vld [vmem:[%s5702_s2 + $0x220] sm:$0xff]  ;;  %v935_v14 = vsel %vm928_vm6, %v5961_v16, %v5960_v28  ;;  %v700_v62 = vmul.f32 %v3659_v50, %v688_v56  ;;  %v4538_v56 = vld [vmem:[%s5702_s2 + $0x2b8] sm:$0xff]  ;;  %v3108_v16 = vpack.c.bf16 %v1325_v27, %v1324_v18  ;;  %3107 = vmatprep.subr.bf16.mxu1 %v3106_v47 }
 0x1c8   :  { %5959 = vst [vmem:[#allocation89_spill] sm:$0xff] %v4502_v22  ;;  %v4519_v22 = vpop.permute.xlu0 %730  ;;  %5962 = vst [vmem:[#allocation49_spill] sm:$0xff] %v4523_v57  ;;  %v5965_v61 = vld [vmem:[#allocation15_spill] sm:$0xff]  ;;  %v3110_v57 = vpack.c.bf16 %v1343_v12, %v1342_v55  ;;  %v884_v1 = vmul.f32 %v4260_v4, %v837_v54  ;;  %v5966_v19 = vld [vmem:[#allocation16_spill] sm:$0xff]  ;;  %v610_v13 = vadd.f32 %v602_v38, %v512_v9 }
 0x1c9   :  { %5963 = vst [vmem:[#allocation90_spill] sm:$0xff] %v4533_v46  ;;  %5964 = vst [vmem:[#allocation91_spill] sm:$0xff] %v4538_v56  ;;  %v740_v28 = vsel %vm732_vm4, %v4519_v22, %v5965_v61  ;;  %v1326_v26 = vld [vmem:[%s5702_s2 + $0x350] sm:$0xff]  ;;  %v443_v60 = vsel %vm439_vm1, %v5966_v19, %v4203_v48  ;;  %v1327_v18 = vld [vmem:[%s5702_s2 + $0x358] sm:$0xff]  ;;  %v982_v27 = vmul.f32 %v4263_v20, %v935_v14 }
 0x1ca   :  { %v786_v61 = vmul.f32 %v4339_v51, %v740_v28  ;;  %v1344_v0 = vld [vmem:[%s5702_s2 + $0x3e0] sm:$0xff]  ;;  %v1345_v7 = vld [vmem:[%s5702_s2 + $0x3e8] sm:$0xff]  ;;  %v4578_v12 = vld [vmem:[%s5702_s2 + $0x230] sm:$0xff]  ;;  %v708_v9 = vadd.f32 %v700_v62, %v610_v13  ;;  %v4585_v28 = vrot.slane %v5908_v37, %v4234_v5  ;;  %v496_v20 = vmul.f32 %v4302_v59, %v443_v60  ;;  %v4611_v51 = vpop.permute.xlu1 %726  ;;  %3109 = vmatpush3.bf16.msra.mxu1 %v3108_v16 }
 0x1cb   :  { %v5967_v19 = vld [vmem:[#allocation17_spill] sm:$0xff]  ;;  %v4594_v55 = vld [vmem:[%s5702_s2 + $0x238] sm:$0xff]  ;;  %v4604_v62 = vld [vmem:[%s5702_s2 + $0x2c8] sm:$0xff]  ;;  %v3112_v4 = vpack.c.bf16 %v1327_v18, %v1326_v26  ;;  %v440_v46 = vsel %vm439_vm1, %v4215_v52, %v4287_v42  ;;  %3111 = vmatprep.subr.bf16.mxu1 %v3110_v57  ;;  %v994_v16 = vmul.f32 %v3743_v35, %v982_v27 }
 0x1cc   :  { %v1033_v38 = vsel %vm1026_vm8, %v5967_v19, %v4143_v31  ;;  %v798_v54 = vmul.f32 %v3694_v2, %v786_v61  ;;  %v4581_v14 = vpop.permute.xlu0 %724  ;;  %5968 = vst [vmem:[#allocation15_spill] sm:$0xff] %v4585_v28  ;;  %v4589_v31 = vrot.slane %v5908_v37, %v4291_v6  ;;  %v4599_v13 = vld [vmem:[%s5702_s2 + $0x2c0] sm:$0xff]  ;;  %v5970_v61 = vld [vmem:[#allocation24_spill] sm:$0xff]  ;;  %v3114_v19 = vpack.c.bf16 %v1345_v7, %v1344_v0  ;;  %v1329_v60 = vld [vmem:[%s5702_s2 + $0x368] sm:$0xff] }
 0x1cd   :  { %v1131_v47 = vsel %vm1124_vm7, %v5970_v61, %v4122_v21  ;;  %v1080_v28 = vmul.f32 %v4282_v11, %v1033_v38  ;;  %v1328_v21 = vld [vmem:[%s5702_s2 + $0x360] sm:$0xff]  ;;  %v1346_v57 = vld [vmem:[%s5702_s2 + $0x3f0] sm:$0xff]  ;;  %v1347_v18 = vld [vmem:[%s5702_s2 + $0x3f8] sm:$0xff]  ;;  %v638_v38 = vsel %vm634_vm3, %v3934_v8, %v4273_v24  ;;  %v499_v26 = vmul.f32 %v4310_v30, %v440_v46 }
 0x1ce   :  { %5969 = vst [vmem:[#allocation16_spill] sm:$0xff] %v4589_v31  ;;  %v896_v31 = vmul.f32 %v3717_v25, %v884_v1  ;;  %v806_v56 = vadd.f32 %v798_v54, %v708_v9  ;;  %v4630_v1 = vrot.slane %v5908_v37, %v4294_v53  ;;  %v1178_v0 = vmul.f32 %v4266_v23, %v1131_v47  ;;  %v5972_v7 = vld [vmem:[#allocation18_spill] sm:$0xff]  ;;  %v4654_v42 = vld [vmem:[%s5702_s2 + $0x240] sm:$0xff]  ;;  %v4680_v46 = vld [vmem:[%s5702_s2 + $0x2d8] sm:$0xff] }
 0x1cf   :  { %v540_v27 = vsel %vm536_vm2, %v5972_v7, %v4205_v33  ;;  %v4659_v47 = vld [vmem:[%s5702_s2 + $0x248] sm:$0xff]  ;;  %v508_v7 = vmul.f32 %v5947_v45, %v496_v20  ;;  %v537_v8 = vsel %vm536_vm2, %v4227_v34, %v4348_v40  ;;  %3113 = vmatpush3.bf16.msra.mxu1 %v3112_v4  ;;  %v1092_v23 = vmul.f32 %v3757_v41, %v1080_v28  ;;  %v1330_v30 = vld [vmem:[%s5702_s2 + $0x370] sm:$0xff]  ;;  %v1331_v4 = vld [vmem:[%s5702_s2 + $0x378] sm:$0xff] }
 0x1d0   :  { %5971 = vst [vmem:[#allocation92_spill] sm:$0xff] %v4630_v1  ;;  %v904_v9 = vadd.f32 %v896_v31, %v806_v56  ;;  %v4649_v54 = vpop.permute.xlu0 %728  ;;  %v4670_v56 = vld [vmem:[%s5702_s2 + $0x2d0] sm:$0xff]  ;;  %v3116_v31 = vpack.c.bf16 %v1329_v60, %v1328_v21  ;;  %v4675_v20 = vrot.slane %v5908_v37, %v4244_v58  ;;  %3115 = vmatprep.subr.bf16.mxu1 %v3114_v19  ;;  %v4694_v60 = vpop.permute.xlu1 %824  ;;  %v5976_v59 = vld [vmem:[#allocation38_spill] sm:$0xff]  ;;  %v5985_v61 = vld [vmem:[#allocation68_spill] sm:$0xff] }
 0x1d1   :  { %v3118_v40 = vpack.c.bf16 %v1347_v18, %v1346_v57  ;;  %v594_v28 = vmul.f32 %v4298_v15, %v540_v27  ;;  %v692_v37 = vmul.f32 %v4314_v29, %v638_v38  ;;  %v635_v21 = vsel %vm634_vm3, %v4329_v32, %v4439_v3  ;;  %v5975_v19 = vld [vmem:[#allocation67_spill] sm:$0xff] }
 0x1d2   :  { %v1002_v11 = vadd.f32 %v994_v16, %v904_v9  ;;  %5973 = vst [vmem:[#allocation18_spill] sm:$0xff] %v4675_v20  ;;  %v1190_v16 = vmul.f32 %v3767_v44, %v1178_v0  ;;  %v597_v57 = vmul.f32 %v4327_v36, %v537_v8  ;;  %v736_v18 = vsel %vm732_vm4, %v4040_v43, %v4581_v14  ;;  %v5974_v9 = vld [vmem:[#allocation57_spill] sm:$0xff]  ;;  %v4713_v0 = vld [vmem:[%s5702_s2 + $0x250] sm:$0xff] }
 0x1d3   :  { %v516_v29 = vadd.f32 %v508_v7, %v5974_v9  ;;  %v511_v3 = vmul.f32 %v5947_v45, %v499_v26  ;;  %3117 = vmatpush3.bf16.msra.mxu1 %v3116_v31  ;;  %v3120_v8 = vpack.c.bf16 %v1331_v4, %v1330_v30  ;;  %v695_v36 = vmul.f32 %v5975_v19, %v635_v21  ;;  %v4727_v26 = vld [vmem:[%s5702_s2 + $0x258] sm:$0xff]  ;;  %v4732_v30 = vld [vmem:[%s5702_s2 + $0x2e0] sm:$0xff]  ;;  %v4737_v7 = vld [vmem:[%s5702_s2 + $0x2e8] sm:$0xff] }
 0x1d4   :  { %v4704_v27 = vpop.permute.xlu0 %826  ;;  %v1100_v38 = vadd.f32 %v1092_v23, %v1002_v11  ;;  %v4718_v23 = vrot.slane %v5976_v59, %v4234_v5  ;;  %v4722_v11 = vrot.slane %v5976_v59, %v4291_v6  ;;  %5979 = vst [vmem:[#allocation93_spill] sm:$0xff] %v4732_v30  ;;  %3119 = vmatprep.subr.bf16.mxu1 %v3118_v40  ;;  %v5980_v31 = vld [vmem:[#allocation35_spill] sm:$0xff]  ;;  %v5981_v21 = vld [vmem:[#allocation70_spill] sm:$0xff] }
 0x1d5   :  { %v606_v5 = vmul.f32 %v3636_v39, %v594_v28  ;;  %v704_v6 = vmul.f32 %v3659_v50, %v692_v37  ;;  %v539_v4 = vsel %vm536_vm2, %v4205_v33, %v5980_v31  ;;  %v538_v9 = vsel %vm536_vm2, %v5980_v31, %v4227_v34  ;;  %v5982_v37 = vld [vmem:[#allocation9_spill] sm:$0xff]  ;;  %v5984_v33 = vld [vmem:[#allocation7_spill] sm:$0xff]  ;;  %v5988_v34 = vld [vmem:[#allocation12_spill] sm:$0xff] }
 0x1d6   :  { %v1198_v43 = vadd.f32 %v1190_v16, %v1100_v38  ;;  %5977 = vst [vmem:[#allocation57_spill] sm:$0xff] %v4718_v23  ;;  %5978 = vst [vmem:[#allocation38_spill] sm:$0xff] %v4722_v11  ;;  %v790_v16 = vmul.f32 %v5981_v21, %v736_v18  ;;  %v609_v38 = vmul.f32 %v3636_v39, %v597_v57  ;;  %v829_v21 = vpop.permute.xlu1 %828  ;;  %v5989_v57 = vld [vmem:[#allocation73_spill] sm:$0xff] }
 0x1d7   :  { %v735_v40 = vsel %vm732_vm4, %v4581_v14, %v4611_v51  ;;  %v519_v19 = vadd.f32 %v511_v3, %v5984_v33  ;;  %v614_v18 = vadd.f32 %v606_v5, %v516_v29  ;;  %3121 = vmatpush3.bf16.msra.mxu1 %v3120_v8  ;;  %v707_v31 = vmul.f32 %v3659_v50, %v695_v36  ;;  %v5986_v3 = vld [vmem:[#allocation52_spill] sm:$0xff]  ;;  %v5987_v5 = vld [vmem:[#allocation69_spill] sm:$0xff] }
 0x1d8   :  { %v4755_v28 = vpop.permute.xlu0 %1022  ;;  %v4758_v15 = vadd.f32 %v5982_v37, %v1198_v43  ;;  %v595_v14 = vmul.f32 %v5985_v61, %v539_v4  ;;  %v734_v43 = vsel %vm732_vm4, %v4611_v51, %v4649_v54  ;;  %v833_v29 = vsel %vm830_vm5, %v5986_v3, %v4694_v60  ;;  %v5990_v4 = vld [vmem:[#allocation72_spill] sm:$0xff] }
 0x1d9   :  { %v596_v33 = vmul.f32 %v5987_v5, %v538_v9  ;;  %v802_v8 = vmul.f32 %v3694_v2, %v790_v16  ;;  %v791_v36 = vmul.f32 %v5988_v34, %v735_v40  ;;  %v5991_v61 = vpack.c.bf16 %v5989_v57, %v5990_v4  ;;  %v5993_v5 = vld [vmem:[#allocation77_spill] sm:$0xff]  ;;  %v5994_v16 = vld [vmem:[#allocation74_spill] sm:$0xff]  ;;  %v6003_v34 = vld [vmem:[#allocation83_spill] sm:$0xff] }
 0x1da   :  { %5983 = vst [vmem:[#allocation35_spill] sm:$0xff] %v4758_v15  ;;  %1413 = vmatmul.mubr.f32.vlgmr.msra.gmra.mrb[4].mxu0 %v4758_v15  ;;  %v4784_v51 = vrot.slane %v5976_v59, %v4294_v53  ;;  %v712_v37 = vadd.f32 %v704_v6, %v614_v18  ;;  %v617_v30 = vadd.f32 %v609_v38, %v519_v19  ;;  %v5998_v53 = vld [vmem:[#allocation76_spill] sm:$0xff]  ;;  %v6000_v18 = vld [vmem:[#allocation14_spill] sm:$0xff] }
 0x1db   :  { %3061 = vmatpush3.bf16.msra.mxu0 %v5991_v61  ;;  %v733_v3 = vsel %vm732_vm4, %v4649_v54, %v4519_v22  ;;  %v5995_v15 = vpack.c.bf16 %v5993_v5, %v5994_v16  ;;  %v4795_v40 = vrot.slane %v5976_v59, %v4244_v58  ;;  %v5997_v61 = vld [vmem:[#allocation71_spill] sm:$0xff]  ;;  %v888_v4 = vmul.f32 %v5998_v53, %v833_v29 }
 0x1dc   :  { %5992 = vst [vmem:[#allocation7_spill] sm:$0xff] %v4784_v51  ;;  %v432_v9 = vpop.permute.xlu0 %431  ;;  %v792_v57 = vmul.f32 %v5997_v61, %v734_v43  ;;  %v715_v54 = vadd.f32 %v707_v31, %v617_v30  ;;  %v607_v6 = vmul.f32 %v3636_v39, %v595_v14  ;;  %v608_v58 = vmul.f32 %v3636_v39, %v596_v33  ;;  %v6001_v5 = vld [vmem:[#allocation75_spill] sm:$0xff]  ;;  %v1021_v61 = vpop.permute.xlu1 %1020 }
 0x1dd   :  { %3063 = vmatprep.subr.bf16.mxu0 %v5995_v15  ;;  %5996 = vst [vmem:[#allocation52_spill] sm:$0xff] %v4795_v40  ;;  %v441_v19 = vsel %vm439_vm1, %v432_v9, %v4215_v52  ;;  %v442_v22 = vsel %vm439_vm1, %v4203_v48, %v432_v9  ;;  %v5999_v15 = vld [vmem:[#allocation84_spill] sm:$0xff]  ;;  %v810_v43 = vadd.f32 %v802_v8, %v712_v37  ;;  %v6002_v52 = vld [vmem:[#allocation85_spill] sm:$0xff]  ;;  %v6005_v30 = vld [vmem:[#allocation11_spill] sm:$0xff] }
 0x1de   :  { %v497_v38 = vmul.f32 %v5999_v15, %v442_v22  ;;  %v498_v59 = vmul.f32 %v6000_v18, %v441_v19  ;;  %v803_v29 = vmul.f32 %v3694_v2, %v791_v36  ;;  %v793_v16 = vmul.f32 %v6001_v5, %v733_v3  ;;  %v6006_v33 = vld [vmem:[#allocation87_spill] sm:$0xff]  ;;  %v6007_v8 = vld [vmem:[#allocation86_spill] sm:$0xff] }
 0x1df   :  { %v6004_v53 = vpack.c.bf16 %v6002_v52, %v6003_v34  ;;  %v832_v48 = vsel %vm830_vm5, %v4694_v60, %v4704_v27  ;;  %v838_v31 = vsel %vm830_vm5, %v829_v21, %v6005_v30  ;;  %v6008_v36 = vpack.c.bf16 %v6006_v33, %v6007_v8  ;;  %v6012_v30 = vld [vmem:[#allocation79_spill] sm:$0xff]  ;;  %v6013_v33 = vld [vmem:[#allocation81_spill] sm:$0xff] }
 0x1e0   :  { %v509_v39 = vmul.f32 %v5947_v45, %v497_v38  ;;  %v510_v37 = vmul.f32 %v5947_v45, %v498_v59  ;;  %v629_v14 = vpop.permute.xlu0 %628  ;;  %v804_v34 = vmul.f32 %v3694_v2, %v792_v57  ;;  %v900_v3 = vmul.f32 %v3717_v25, %v888_v4  ;;  %v6010_v45 = vld [vmem:[#allocation6_spill] sm:$0xff]  ;;  %v6011_v38 = vld [vmem:[#allocation49_spill] sm:$0xff] }
 0x1e1   :  { %3065 = vmatpush3.bf16.msra.mxu0 %v6004_v53  ;;  %v636_v60 = vsel %vm634_vm3, %v629_v14, %v4329_v32  ;;  %v637_v9 = vsel %vm634_vm3, %v4273_v24, %v629_v14  ;;  %v6009_v53 = vld [vmem:[#allocation8_spill] sm:$0xff]  ;;  %v805_v57 = vmul.f32 %v3694_v2, %v793_v16  ;;  %v889_v4 = vmul.f32 %v6012_v30, %v832_v48  ;;  %v6015_v2 = vld [vmem:[#allocation91_spill] sm:$0xff]  ;;  %v6016_v16 = vld [vmem:[#allocation90_spill] sm:$0xff] }
 0x1e2   :  { %3067 = vmatprep.subr.bf16.mxu0 %v6008_v36  ;;  %v517_v19 = vadd.f32 %v509_v39, %v6009_v53  ;;  %v518_v22 = vadd.f32 %v510_v37, %v6010_v45  ;;  %v693_v59 = vmul.f32 %v6011_v38, %v637_v9  ;;  %v694_v52 = vmul.f32 %v4546_v17, %v636_v60  ;;  %v6020_v53 = vld [vmem:[#allocation15_spill] sm:$0xff]  ;;  %v6021_v45 = vld [vmem:[#allocation16_spill] sm:$0xff] }
 0x1e3   :  { %v831_v32 = vsel %vm830_vm5, %v4704_v27, %v829_v21  ;;  %v891_v8 = vmul.f32 %v6013_v33, %v838_v31  ;;  %v6014_v24 = vpack.c.bf16 %v4528_v49, %v4511_v63  ;;  %v6017_v48 = vpack.c.bf16 %v6015_v2, %v6016_v16  ;;  %v1025_v21 = vpop.permute.xlu1 %1024  ;;  %v6018_v31 = vld [vmem:[#allocation78_spill] sm:$0xff]  ;;  %v6019_v49 = vld [vmem:[#allocation53_spill] sm:$0xff] }
 0x1e4   :  { %v615_v39 = vadd.f32 %v607_v6, %v517_v19  ;;  %v616_v37 = vadd.f32 %v608_v58, %v518_v22  ;;  %v705_v14 = vmul.f32 %v3659_v50, %v693_v59  ;;  %v706_v36 = vmul.f32 %v3659_v50, %v694_v52  ;;  %v923_v60 = vpop.permute.xlu0 %922  ;;  %v6022_v59 = vld [vmem:[#allocation80_spill] sm:$0xff]  ;;  %v6024_v16 = vld [vmem:[#allocation54_spill] sm:$0xff] }
 0x1e5   :  { %3069 = vmatpush3.bf16.msra.mxu0 %v6014_v24  ;;  %v908_v9 = vadd.f32 %v900_v3, %v810_v43  ;;  %v1028_v27 = vsel %vm1026_vm8, %v1021_v61, %v4755_v28  ;;  %v930_v63 = vsel %vm928_vm6, %v923_v60, %v6018_v31  ;;  %v931_v6 = vsel %vm928_vm6, %v6019_v49, %v923_v60  ;;  %v1296_v49 = vld [vmem:[%s5702_s2 + $0x260] sm:$0xff] }
 0x1e6   :  { %3071 = vmatprep.subr.bf16.mxu0 %v6017_v48  ;;  %v713_v50 = vadd.f32 %v705_v14, %v615_v39  ;;  %v714_v58 = vadd.f32 %v706_v36, %v616_v37  ;;  %v986_v19 = vmul.f32 %v6020_v53, %v931_v6  ;;  %v987_v22 = vmul.f32 %v6021_v45, %v930_v63  ;;  %v6025_v37 = vld [vmem:[#allocation5_spill] sm:$0xff]  ;;  %v6031_v6 = vld [vmem:[#allocation88_spill] sm:$0xff] }
 0x1e7   :  { %v813_v43 = vadd.f32 %v805_v57, %v715_v54  ;;  %v901_v3 = vmul.f32 %v3717_v25, %v889_v4  ;;  %v890_v52 = vmul.f32 %v6022_v59, %v831_v32  ;;  %v903_v24 = vmul.f32 %v3717_v25, %v891_v8  ;;  %v6027_v8 = vld [vmem:[#allocation17_spill] sm:$0xff]  ;;  %v6068_v59 = vld [vmem:[#allocation40_spill] sm:$0xff] }
 0x1e8   :  { %v6023_v2 = vpack.c.bf16 %v4594_v55, %v4578_v12  ;;  %v1029_v39 = vsel %vm1026_vm8, %v6024_v16, %v1021_v61  ;;  %v1085_v14 = vmul.f32 %v6025_v37, %v1028_v27  ;;  %v1027_v54 = vsel %vm1026_vm8, %v4755_v28, %v1025_v21  ;;  %v927_v4 = vpop.permute.xlu0 %926  ;;  %v6028_v36 = vld [vmem:[#allocation13_spill] sm:$0xff]  ;;  %v6063_v37 = vld [vmem:[#allocation63_spill] sm:$0xff] }
 0x1e9   :  { %v811_v57 = vadd.f32 %v803_v29, %v713_v50  ;;  %v6026_v32 = vpack.c.bf16 %v4604_v62, %v4599_v13  ;;  %v1034_v55 = vsel %vm1026_vm8, %v1025_v21, %v6027_v8  ;;  %v812_v12 = vadd.f32 %v804_v34, %v714_v58  ;;  %v6029_v21 = vld [vmem:[#allocation82_spill] sm:$0xff]  ;;  %v6032_v58 = vld [vmem:[#allocation89_spill] sm:$0xff] }
 0x1ea   :  { %3073 = vmatpush3.bf16.msra.mxu0 %v6023_v2  ;;  %v929_v61 = vsel %vm928_vm6, %v6018_v31, %v927_v4  ;;  %v936_v60 = vsel %vm928_vm6, %v927_v4, %v6028_v36  ;;  %v998_v29 = vmul.f32 %v3743_v35, %v986_v19  ;;  %v999_v48 = vmul.f32 %v3743_v35, %v987_v22  ;;  %v1121_v22 = vpop.permute.xlu1 %1120 }
 0x1eb   :  { %3075 = vmatprep.subr.bf16.mxu0 %v6026_v32  ;;  %v909_v28 = vadd.f32 %v901_v3, %v811_v57  ;;  %v988_v13 = vmul.f32 %v4630_v1, %v929_v61  ;;  %v902_v62 = vmul.f32 %v3717_v25, %v890_v52  ;;  %v911_v27 = vadd.f32 %v903_v24, %v813_v43  ;;  %v1315_v24 = vld [vmem:[%s5702_s2 + $0x2f8] sm:$0xff] }
 0x1ec   :  { %v1084_v34 = vmul.f32 %v6029_v21, %v1029_v39  ;;  %v989_v63 = vmul.f32 %v4675_v20, %v936_v60  ;;  %v6030_v31 = vpack.c.bf16 %v4659_v47, %v4654_v42  ;;  %v1086_v50 = vmul.f32 %v6031_v6, %v1027_v54  ;;  %v1119_v43 = vpop.permute.xlu0 %1118  ;;  %v1297_v42 = vld [vmem:[%s5702_s2 + $0x268] sm:$0xff]  ;;  %v1314_v47 = vld [vmem:[%s5702_s2 + $0x2f0] sm:$0xff]  ;;  %v6062_v20 = vld [vmem:[#allocation29_spill] sm:$0xff] }
 0x1ed   :  { %v1087_v19 = vmul.f32 %v6032_v58, %v1034_v55  ;;  %v1007_v3 = vadd.f32 %v999_v48, %v909_v28  ;;  %v1000_v25 = vmul.f32 %v3743_v35, %v988_v13  ;;  %v6033_v52 = vpack.c.bf16 %v4680_v46, %v4670_v56  ;;  %v6034_v56 = vld [vmem:[#allocation55_spill] sm:$0xff] }
 0x1ee   :  { %3077 = vmatpush3.bf16.msra.mxu0 %v6030_v31  ;;  %v910_v2 = vadd.f32 %v902_v62, %v812_v12  ;;  %v1001_v16 = vmul.f32 %v3743_v35, %v989_v63  ;;  %v1126_v39 = vsel %vm1124_vm7, %v1119_v43, %v1121_v22  ;;  %v1127_v46 = vsel %vm1124_vm7, %v6034_v56, %v1119_v43  ;;  %v1298_v48 = vld [vmem:[%s5702_s2 + $0x270] sm:$0xff] }
 0x1ef   :  { %3079 = vmatprep.subr.bf16.mxu0 %v6033_v52  ;;  %v1097_v54 = vmul.f32 %v3757_v41, %v1085_v14  ;;  %v1006_v57 = vadd.f32 %v998_v29, %v908_v9  ;;  %v1182_v4 = vmul.f32 %v4718_v23, %v1127_v46  ;;  %v1183_v32 = vmul.f32 %v4722_v11, %v1126_v39  ;;  %v6036_v9 = vld [vmem:[#allocation93_spill] sm:$0xff] }
 0x1f0   :  { %v1008_v8 = vadd.f32 %v1000_v25, %v910_v2  ;;  %v1009_v55 = vadd.f32 %v1001_v16, %v911_v27  ;;  %v6035_v12 = vpack.c.bf16 %v4727_v26, %v4713_v0  ;;  %v3084_v35 = vpack.c.bf16 %v1297_v42, %v1296_v49  ;;  %v1123_v14 = vpop.permute.xlu0 %1122  ;;  %v1299_v0 = vld [vmem:[%s5702_s2 + $0x278] sm:$0xff] }
 0x1f1   :  { %v3086_v61 = vpack.c.bf16 %v1315_v24, %v1314_v47  ;;  %v1096_v36 = vmul.f32 %v3757_v41, %v1084_v34  ;;  %v1194_v60 = vmul.f32 %v3767_v44, %v1182_v4  ;;  %v1195_v28 = vmul.f32 %v3767_v44, %v1183_v32  ;;  %v6038_v34 = vld [vmem:[#allocation24_spill] sm:$0xff]  ;;  %v1672_v4 = vld [vmem:[%s5703_s3 + $0x8] sm:$0xff] }
 0x1f2   :  { %3081 = vmatpush3.bf16.msra.mxu0 %v6035_v12  ;;  %v6037_v29 = vpack.c.bf16 %v4737_v7, %v6036_v9  ;;  %v1105_v26 = vadd.f32 %v1097_v54, %v1007_v3  ;;  %v1098_v13 = vmul.f32 %v3757_v41, %v1086_v50  ;;  %v1099_v62 = vmul.f32 %v3757_v41, %v1087_v19  ;;  %v1674_v12 = vld [vmem:[%s5703_s3 + $0x18] sm:$0xff] }
 0x1f3   :  { %v1125_v27 = vsel %vm1124_vm7, %v1121_v22, %v1123_v14  ;;  %v1132_v7 = vsel %vm1124_vm7, %v1123_v14, %v6038_v34  ;;  %v1104_v63 = vadd.f32 %v1096_v36, %v1006_v57  ;;  %v3088_v3 = vpack.c.bf16 %v1299_v0, %v1298_v48  ;;  %v6039_v22 = vld [vmem:[#allocation9_spill] sm:$0xff] }
 0x1f4   :  { %3083 = vmatprep.subr.bf16.mxu0 %v6037_v29  ;;  %v1184_v31 = vmul.f32 %v4784_v51, %v1125_v27  ;;  %v1185_v49 = vmul.f32 %v4795_v40, %v1132_v7  ;;  %v1203_v25 = vadd.f32 %v1195_v28, %v1105_v26  ;;  %v1106_v43 = vadd.f32 %v1098_v13, %v1008_v8  ;;  %v1671_v57 = vld [vmem:[%s5703_s3] sm:$0xff] }
 0x1f5   :  { %v1107_v52 = vadd.f32 %v1099_v62, %v1009_v55  ;;  %v1202_v50 = vadd.f32 %v1194_v60, %v1104_v63  ;;  %v1679_v32 = vcombine.high %v1671_v57, %v1671_v57  ;;  %v1680_v8 = vcombine.high %v1672_v4, %v1672_v4  ;;  %v1673_v55 = vld [vmem:[%s5703_s3 + $0x10] sm:$0xff] }
 0x1f6   :  { %3085 = vmatpush3.bf16.msra.mxu0 %v3084_v35  ;;  %v1196_v41 = vmul.f32 %v3767_v44, %v1184_v31  ;;  %v1197_v19 = vmul.f32 %v3767_v44, %v1185_v49  ;;  %v4951_v42 = vadd.f32 %v6039_v22, %v1203_v25  ;;  %v6040_v44 = vmov 0.0  }
 0x1f7   :  { %3087 = vmatprep.subr.bf16.mxu0 %v3086_v61  ;;  %v4955_v2 = vadd.f32 %v6039_v22, %v1202_v50  ;;  %2841 = vmatprep.subr.msk.mxu1 %vm1686_vm9, %v1680_v8  ;;  %v1681_v35 = vcombine.high %v1673_v55, %v1673_v55  ;;  %v1682_v61 = vcombine.high %v1674_v12, %v1674_v12  ;;  %v1655_v8 = vpop.permute.xlu1 %1654 }
 0x1f8   :  { %v1204_v47 = vadd.f32 %v1196_v41, %v1106_v43  ;;  %1552 = vmatprep.mubr.f32.mxu0 %v4951_v42  ;;  %v1205_v24 = vadd.f32 %v1197_v19, %v1107_v52 }
 0x1fa   :  { %3089 = vmatpush3.bf16.msra.mxu0 %v3088_v3  ;;  %v4958_v16 = vadd.f32 %v6039_v22, %v1205_v24  ;;  %v4961_v39 = vadd.f32 %v6039_v22, %v1204_v47 }
 0x1fb   :  { %2838 = vmatprep.subr.msk.mxu0 %vm1686_vm9, %v1679_v32 }
 0x1fc   :  { %1622 = vmatprep.mubr.f32.mxu1 %v4958_v16 }
 0x1fd   :  { %1553 = vmatmul.mubr.f32.vlgmr.msra.gmra.mrb[6].mxu0 %v4955_v2  ;;  %1623 = vmatmul.mubr.f32.vlgmr.msra.gmra.mrb[6].mxu1 %v4961_v39 }
 0x1fe   :  { %1767 = vmatprep.mubr.f32.mxu0 %v6040_v44  ;;  %1838 = vmatprep.mubr.f32.mxu1 %v6040_v44 }
 0x1ff   :  { %2839 = vmatpush1.msk.msra.mxu0 %vm1686_vm9, %v1671_v57  ;;  %2842 = vmatpush1.msk.msra.mxu1 %vm1686_vm9, %v1672_v4 }
 0x200   :  { %2844 = vmatprep.subr.msk.mxu0 %vm1686_vm9, %v1681_v35  ;;  %2847 = vmatprep.subr.msk.mxu1 %vm1686_vm9, %v1682_v61  ;;  %v1662_v61 = vpop.permute.xlu0 %1661 }
 0x28c   :  { %v2921_v56 = vpop.f32.mrb[4].mxu1 }
 0x28d   :  { %v2922_v46 = vpop.f32.mrb[5].mxu1 }
 0x28e   :  { %v2923_v54 = vadd.f32 %v2922_v46, %v2921_v56 }
 0x2ad   :  { %v2886_v36 = vpop.f32.mrb[4].mxu0 }
 0x2ae   :  { %v2887_v60 = vpop.f32.mrb[5].mxu0 }
 0x2af   :  { %v2888_v28 = vadd.f32 %v2887_v60, %v2886_v36 }
 0x2b1   :  { %v1485_v14 = vadd.f32 %v2923_v54, %v2888_v28 }
 0x2d0   :  { %v2956_v9 = vpop.f32.mrb[6].mxu0  ;;  %v2991_v48 = vpop.f32.mrb[6].mxu1 }
 0x2d1   :  { %v2957_v29 = vpop.f32.mrb[7].mxu0  ;;  %v2992_v26 = vpop.f32.mrb[7].mxu1 }
 0x2d2   :  { %v2958_v0 = vadd.f32 %v2957_v29, %v2956_v9  ;;  %v2993_v13 = vadd.f32 %v2992_v26, %v2991_v48  ;;  %v2337_v29 = vld [vmem:[%s5712_s12] sm:$0xff]  ;;  %v6042_v48 = vmov 7   ;;  %v6045_v26 = vmov 5  }
 0x2d3   :  { %2340 = vperm.xlu0 %3153, %v2337_v29   ;;  %2644 = vperm.xlu1 %3158, %v2337_v29  }
 0x2d4   :  { %v1555_v62 = vadd.f32 %v2958_v0, %v1485_v14  ;;  %v6044_v0 = vmov 3  }
 0x2d6   :  { %v1625_v27 = vadd.f32 %v2993_v13, %v1555_v62  ;;  %v6046_v13 = vmov 8   ;;  %v6047_v62 = vmov 0  }
 0x2d7   :  { %3159 = vset.pattern.permute.xlu1 %v6042_v48 }
 0x2d8   :  { %v1629_v34 = vsel %vm1628_vm10, %v1625_v27, 0.0  ;;  %2696 = vperm.xlu1 %3159, %v2337_v29  }
 0x2d9   :  { %v1630_v7 = vrot.slane %v1629_v34, 4 }
 0x2db   :  { %v1631_v63 = vadd.f32 %v1630_v7, %v1629_v34  ;;  %v6048_v7 = vld [vmem:[#allocation35_spill] sm:$0xff] }
 0x2dd   :  { %v1632_v31 = vrot.slane %v1631_v63, 2 }
 0x2df   :  { %v1633_v49 = vadd.f32 %v1632_v31, %v1631_v63  ;;  %v6049_v31 = vld [vmem:[#allocation59_spill] sm:$0xff] }
 0x2e1   :  { %v1634_v25 = vrot.slane %v1633_v49, 1 }
 0x2e3   :  { %v1635_v43 = vadd.f32 %v1634_v25, %v1633_v49 }
 0x2e5   :  { %v1637_v3 = vmul.f32 0.125, %v1635_v43 }
 0x2e7   :  { %v1638_v52 = vsub.f32 %v1625_v27, %v1637_v3  ;;  %v6050_v3 = vld [vmem:[#allocation56_spill] sm:$0xff] }
 0x2e9   :  { %v1639_v50 = vmul.f32 %v1638_v52, %v1638_v52 }
 0x2eb   :  { %v1640_v41 = vsel %vm1628_vm10, %v1639_v50, 0.0  ;;  %v6051_v50 = vld [vmem:[#allocation58_spill] sm:$0xff] }
 0x2ec   :  { %v1641_v19 = vrot.slane %v1640_v41, 4 }
 0x2ee   :  { %v1642_v22 = vadd.f32 %v1641_v19, %v1640_v41  ;;  %v5015_v19 = vld [vmem:[%s5700_s0 + $0x8] sm:$0xff] }
 0x2f0   :  { %v1643_v47 = vrot.slane %v1642_v22, 2 }
 0x2f2   :  { %v1644_v24 = vadd.f32 %v1643_v47, %v1642_v22  ;;  %v5021_v47 = vld [vmem:[%s5700_s0 + $0x18] sm:$0xff] }
 0x2f4   :  { %v1645_v56 = vrot.slane %v1644_v24, 1 }
 0x2f6   :  { %v1646_v46 = vadd.f32 %v1645_v56, %v1644_v24 }
 0x2f8   :  { %v1647_v54 = vmul.f32 0.125, %v1646_v46 }
 0x2fa   :  { %v1648_v57 = vadd.f32 1e-05, %v1647_v54  ;;  %v5027_v54 = vld [vmem:[%s5700_s0] sm:$0xff] }
 0x2fb   :  { %6052 = vst [vmem:[#allocation73_spill] sm:$0xff] %v5027_v54 }
 0x2fc   :  { %3198 = vrsqrt.f32 %v1648_v57 }
 0x306   :  { %v3199_v4 = vpop.eup %3198 }
 0x307   :  { %v1650_v32 = vmul.f32 %v3199_v4, %v1638_v52  ;;  %v5033_v4 = vld [vmem:[%s5700_s0 + $0x10] sm:$0xff] }
 0x309   :  { %v1657_v35 = vmul.f32 %v1655_v8, %v1650_v32 }
 0x30b   :  { %v1664_v36 = vadd.f32 %v1662_v61, %v1657_v35 }
 0x30d   :  { %v2837_v60 = vmul.f32 -1.442695, %v1664_v36 }
 0x30f   :  { %3200 = vpow2.f32 %v2837_v60  ;;  %v2003_v60 = vld [vmem:[%s5710_s10] sm:$0xff] }
 0x319   :  { %v3201_v28 = vpop.eup %3200 }
 0x31a   :  { %v1668_v14 = vadd.f32 1.0, %v3201_v28 }
 0x31c   :  { %3202 = vrcp.f32 %v1668_v14 }
 0x326   :  { %v3203_v9 = vpop.eup %3202 }
 0x327   :  { %2840 = vmatmul.mubr.msk.f32.vlgmr.msra.gmra.mrb[8].mxu0 %vm1628_vm10, %v3203_v9  ;;  %2843 = vmatmul.mubr.msk.f32.vlgmr.msra.gmra.mrb[8].mxu1 %vm1628_vm10, %v3203_v9 }
 0x328   :  { %2845 = vmatpush1.msk.msra.mxu0 %vm1686_vm9, %v1673_v55  ;;  %1909 = vmatprep.mubr.f32.mxu0 %v6040_v44  ;;  %v6041_v55 = vmov 1  }
 0x329   :  { %2848 = vmatpush1.msk.msra.mxu1 %vm1686_vm9, %v1674_v12  ;;  %1980 = vmatprep.mubr.f32.mxu1 %v6040_v44  ;;  %v6043_v12 = vmov 2  }
 0x32a   :  { %3154 = vset.pattern.permute.xlu0 %v6041_v55  ;;  %v5066_v55 = vld [vmem:[%s5700_s0 + $0x30] sm:$0xff] }
 0x32b   :  { %2846 = vmatmul.mubr.msk.f32.vlgmr.msra.gmra.mrb[10].mxu0 %vm1628_vm10, %v3203_v9  ;;  %2849 = vmatmul.mubr.msk.f32.vlgmr.msra.gmra.mrb[10].mxu1 %vm1628_vm10, %v3203_v9  ;;  %v5052_v9 = vld [vmem:[%s5700_s0 + $0x38] sm:$0xff]  ;;  %6056 = vst [vmem:[#allocation84_spill] sm:$0xff] %v5066_v55 }
 0x32c   :  { %2077 = vmatprep.mubr.f32.mxu0 %v6040_v44  ;;  %2148 = vmatprep.mubr.f32.mxu1 %v6040_v44  ;;  %6054 = vst [vmem:[#allocation77_spill] sm:$0xff] %v5052_v9 }
 0x32d   :  { %2436 = vperm.xlu0 %3154, %v2337_v29  }
 0x331   :  { %3155 = vset.pattern.permute.xlu0 %v6043_v12  ;;  %v2008_v12 = vpop.permute.xlu1 %2007 }
 0x332   :  { %2488 = vperm.xlu0 %3155, %v2337_v29  }
 0x336   :  { %3156 = vset.pattern.permute.xlu0 %v6044_v0 }
 0x337   :  { %2540 = vperm.xlu0 %3156, %v2337_v29  }
 0x33b   :  { %3157 = vset.pattern.permute.xlu0 %v6045_v26 }
 0x33c   :  { %2592 = vperm.xlu0 %3157, %v2337_v29  }
 0x340   :  { %3160 = vset.pattern.permute.xlu0 %v6046_v13 }
 0x341   :  { %2748 = vperm.xlu0 %3160, %v2337_v29  }
 0x345   :  { %3161 = vset.pattern.permute.xlu0 %v6047_v62 }
 0x346   :  { %2384 = vperm.xlu0 %3161, %v2337_v29  }
 0x3fa   :  { %v1769_v27 = vpop.f32.mrb[8].mxu0  ;;  %v1840_v34 = vpop.f32.mrb[8].mxu1 }
 0x3fb   :  { %v1987_v63 = vmul.f32 %v1769_v27, %v6048_v7  ;;  %v1989_v49 = vmul.f32 %v1840_v34, %v6049_v31  ;;  %v1771_v25 = vpop.f32.mrb[9].mxu0  ;;  %v1842_v43 = vpop.f32.mrb[9].mxu1 }
 0x3fc   :  { %v1988_v52 = vmul.f32 %v1771_v25, %v6050_v3  ;;  %v1990_v41 = vmul.f32 %v1842_v43, %v6051_v50 }
 0x3fd   :  { %v1995_v57 = vadd.f32 %v5027_v54, %v1987_v63  ;;  %v1997_v32 = vadd.f32 %v5033_v4, %v1989_v49 }
 0x3fe   :  { %v1996_v22 = vadd.f32 %v5015_v19, %v1988_v52  ;;  %v1998_v24 = vadd.f32 %v5021_v47, %v1990_v41  ;;  %v1911_v56 = vpop.f32.mrb[10].mxu0  ;;  %v1982_v46 = vpop.f32.mrb[10].mxu1 }
 0x3ff   :  { %v1991_v8 = vmul.f32 %v1911_v56, %v4955_v2  ;;  %v1993_v35 = vmul.f32 %v1982_v46, %v4961_v39  ;;  %v1913_v61 = vpop.f32.mrb[11].mxu0  ;;  %v1984_v36 = vpop.f32.mrb[11].mxu1  ;;  %v5046_v2 = vld [vmem:[%s5700_s0 + $0x28] sm:$0xff] }
 0x400   :  { %v1992_v28 = vmul.f32 %v1913_v61, %v4951_v42  ;;  %v1994_v14 = vmul.f32 %v1984_v36, %v4958_v16  ;;  %2013 = vmatprep.subr.mxu0 %v1996_v22  ;;  %2084 = vmatprep.subr.mxu1 %v1998_v24  ;;  %6053 = vst [vmem:[#allocation72_spill] sm:$0xff] %v5046_v2  ;;  %v5060_v16 = vld [vmem:[%s5700_s0 + $0x20] sm:$0xff]  ;;  %v5077_v46 = vpop.permute.xlu0 %2340 }
 0x401   :  { %2014 = vmatpush1.msra.mxu0 %v1995_v57  ;;  %2085 = vmatpush1.msra.mxu1 %v1997_v32  ;;  %6055 = vst [vmem:[#allocation74_spill] sm:$0xff] %v5060_v16  ;;  %v1999_v29 = vadd.f32 %v5060_v16, %v1991_v8  ;;  %v2001_v48 = vadd.f32 %v5066_v55, %v1993_v35 }
 0x402   :  { %v2000_v39 = vadd.f32 %v5046_v2, %v1992_v28  ;;  %v2002_v42 = vadd.f32 %v5052_v9, %v1994_v14  ;;  %2850 = vmatmul.mubr.msk.f32.vlgmr.msra.gmra.mrb[12].mxu0 %vm63_vm0, %v2003_v60  ;;  %2851 = vmatmul.mubr.msk.f32.vlgmr.msra.gmra.mrb[12].mxu1 %vm63_vm0, %v2003_v60  ;;  %v6058_v9 = vld [vmem:[#allocation22_spill] sm:$0xff]  ;;  %v6059_v2 = vld [vmem:[#allocation23_spill] sm:$0xff] }
 0x403   :  { %2219 = vmatprep.mubr.f32.mxu0 %v6040_v44  ;;  %2290 = vmatprep.mubr.f32.mxu1 %v6040_v44 }
 0x404   :  { %2155 = vmatprep.subr.mxu0 %v2000_v39  ;;  %2226 = vmatprep.subr.mxu1 %v2002_v42 }
 0x405   :  { %2156 = vmatpush1.msra.mxu0 %v1999_v29  ;;  %2227 = vmatpush1.msra.mxu1 %v2001_v48 }
 0x406   :  { %2852 = vmatmul.mubr.msk.f32.vlgmr.msra.gmra.mrb[14].mxu0 %vm63_vm0, %v2003_v60  ;;  %2853 = vmatmul.mubr.msk.f32.vlgmr.msra.gmra.mrb[14].mxu1 %vm63_vm0, %v2003_v60 }
 0x407   :  { %v6129_v10 = vld [vmem:[#allocation72_spill] sm:$0xff] }
 0x4d5   :  { %v2079_v0 = vpop.f32.mrb[12].mxu0  ;;  %v2150_v26 = vpop.f32.mrb[12].mxu1 }
 0x4d6   :  { %v2080_v13 = vadd.f32 %v2079_v0, %v2008_v12  ;;  %v2151_v62 = vadd.f32 %v2150_v26, %v2008_v12  ;;  %v2081_v27 = vpop.f32.mrb[13].mxu0  ;;  %v2152_v34 = vpop.f32.mrb[13].mxu1 }
 0x4d7   :  { %v2082_v61 = vadd.f32 %v2081_v27, %v2008_v12  ;;  %v2153_v60 = vadd.f32 %v2152_v34, %v2008_v12 }
 0x4d8   :  { %v2297_v7 = vadd.f32 3.0, %v2080_v13  ;;  %v2299_v63 = vadd.f32 3.0, %v2151_v62 }
 0x4d9   :  { %v2221_v31 = vpop.f32.mrb[14].mxu0  ;;  %v2292_v49 = vpop.f32.mrb[14].mxu1  ;;  %v2298_v36 = vadd.f32 3.0, %v2082_v61  ;;  %v2300_v14 = vadd.f32 3.0, %v2153_v60 }
 0x4da   :  { %v2305_v44 = vmax.f32 %v2297_v7, 0.0  ;;  %v2307_v25 = vmax.f32 %v2299_v63, 0.0  ;;  %v2223_v43 = vpop.f32.mrb[15].mxu0  ;;  %v2294_v3 = vpop.f32.mrb[15].mxu1  ;;  %v2222_v29 = vadd.f32 %v2221_v31, %v2008_v12 }
 0x4db   :  { %v5073_v52 = vadd.f32 %v2223_v43, %v2008_v12  ;;  %v5075_v50 = vadd.f32 %v2294_v3, %v2008_v12  ;;  %v2306_v28 = vmax.f32 %v2298_v36, 0.0  ;;  %v2308_v42 = vmax.f32 %v2300_v14, 0.0 }
 0x4dc   :  { %v2313_v41 = vmin.f32 %v2305_v44, 6.0  ;;  %v2315_v22 = vmin.f32 %v2307_v25, 6.0  ;;  %v2301_v26 = vadd.f32 3.0, %v2222_v29 }
 0x4dd   :  { %v2314_v39 = vmin.f32 %v2306_v28, 6.0  ;;  %v2316_v0 = vmin.f32 %v2308_v42, 6.0 }
 0x4de   :  { %v2321_v24 = vmul.f32 %v2313_v41, %v2080_v13  ;;  %v2323_v56 = vmul.f32 %v2315_v22, %v2151_v62  ;;  %v2293_v13 = vadd.f32 %v2292_v49, %v2008_v12  ;;  %v2309_v34 = vmax.f32 %v2301_v26, 0.0 }
 0x4df   :  { %v2322_v48 = vmul.f32 %v2314_v39, %v2082_v61  ;;  %v2324_v27 = vmul.f32 %v2316_v0, %v2153_v60  ;;  %v2302_v41 = vadd.f32 3.0, %v5073_v52 }
 0x4e0   :  { %v2329_v57 = vmul.f32 0.16666667, %v2321_v24  ;;  %v2331_v32 = vmul.f32 0.16666667, %v2323_v56  ;;  %v2303_v7 = vadd.f32 3.0, %v2293_v13  ;;  %v2317_v31 = vmin.f32 %v2309_v34, 6.0  ;;  %v5159_v56 = vpop.permute.xlu0 %2436 }
 0x4e1   :  { %v5099_v62 = vmul.f32 0.16666667, %v2322_v48  ;;  %v5104_v63 = vmul.f32 0.16666667, %v2324_v27  ;;  %v2310_v22 = vmax.f32 %v2302_v41, 0.0  ;;  %v2304_v24 = vadd.f32 3.0, %v5075_v50  ;;  %v5202_v48 = vpop.permute.xlu1 %2644 }
 0x4e2   :  { %2355 = vrot.lane.b32.xlu0 %v2331_v32, %s3246_s7  ;;  %2351 = vrot.lane.b32.xlu1 %v2329_v57, %s3246_s7  ;;  %v5082_v8 = vmul.f32 %v5077_v46, %v2331_v32  ;;  %v5085_v35 = vmul.f32 %v5077_v46, %v2329_v57  ;;  %v2311_v44 = vmax.f32 %v2303_v7, 0.0  ;;  %v2325_v12 = vmul.f32 %v2317_v31, %v2222_v29 }
 0x4e3   :  { %v2344_v40 = vmul.f32 %v5077_v46, %v5099_v62 }
 0x4e4   :  { %v2319_v49 = vmin.f32 %v2311_v44, 6.0  ;;  %v5113_v25 = vmul.f32 0.16666667, %v2325_v12  ;;  %v5169_v61 = vpop.permute.xlu0 %2488 }
 0x4e5   :  { %v5210_v26 = vpop.permute.xlu1 %2696 }
 0x4e6   :  { %2407 = vrot.lane.b32.xlu0 %v2331_v32, %s3248_s19  ;;  %2403 = vrot.lane.b32.xlu1 %v2329_v57, %s3248_s19  ;;  %v2327_v43 = vmul.f32 %v2319_v49, %v2293_v13 }
 0x4e8   :  { %v5119_v3 = vmul.f32 0.16666667, %v2327_v43  ;;  %v5179_v39 = vpop.permute.xlu0 %2540 }
 0x4ea   :  { %2459 = vrot.lane.b32.xlu0 %v2331_v32, %s3250_s21  ;;  %2455 = vrot.lane.b32.xlu1 %v2329_v57, %s3250_s21 }
 0x4ec   :  { %v5191_v42 = vpop.permute.xlu0 %2592 }
 0x4ee   :  { %2511 = vrot.lane.b32.xlu0 %v2331_v32, %s3252_s23  ;;  %2507 = vrot.lane.b32.xlu1 %v2329_v57, %s3252_s23 }
 0x4f0   :  { %v5200_v29 = vpop.permute.xlu0 %2748 }
 0x4f2   :  { %2611 = vrot.lane.b32.xlu0 %v2329_v57, %s3249_s20  ;;  %2559 = vrot.lane.b32.xlu1 %v2329_v57, %s3247_s18 }
 0x4f4   :  { %v5208_v0 = vpop.permute.xlu0 %2384 }
 0x4f6   :  { %2615 = vrot.lane.b32.xlu0 %v2331_v32, %s3249_s20  ;;  %2563 = vrot.lane.b32.xlu1 %v2331_v32, %s3247_s18 }
 0x4fa   :  { %2667 = vrot.lane.b32.xlu0 %v2331_v32, %s3251_s22  ;;  %2663 = vrot.lane.b32.xlu1 %v2329_v57, %s3251_s22 }
 0x4fe   :  { %2715 = vrot.lane.b32.xlu0 %v2329_v57, %s3253_s15  ;;  %2353 = vrot.lane.b32.xlu1 %v5099_v62, %s3246_s7  ;;  %v2318_v57 = vmin.f32 %v2310_v22, 6.0 }
 0x500   :  { %v2326_v36 = vmul.f32 %v2318_v57, %v5073_v52 }
 0x502   :  { %2719 = vrot.lane.b32.xlu0 %v2331_v32, %s3253_s15  ;;  %2357 = vrot.lane.b32.xlu1 %v5104_v63, %s3246_s7  ;;  %v2312_v32 = vmax.f32 %v2304_v24, 0.0  ;;  %v5176_v28 = vmul.f32 0.16666667, %v2326_v36 }
 0x504   :  { %v2320_v60 = vmin.f32 %v2312_v32, 6.0 }
 0x506   :  { %2565 = vrot.lane.b32.xlu0 %v5104_v63, %s3247_s18  ;;  %2405 = vrot.lane.b32.xlu1 %v5099_v62, %s3248_s19  ;;  %v2328_v14 = vmul.f32 %v2320_v60, %v5075_v50  ;;  %v2767_v50 = vld [vmem:[%s5713_s13] sm:$0xff]  ;;  %s3254_s13 = smov [#allocation2]  }
 0x508   :  { %v5185_v52 = vmul.f32 0.16666667, %v2328_v14 }
 0x50a   :  { %2409 = vrot.lane.b32.xlu1 %v5104_v63, %s3248_s19  ;;  %2359 = vrot.lane.b32.xlu0 %v5113_v25, %s3246_s7 }
 0x50e   :  { %2457 = vrot.lane.b32.xlu1 %v5099_v62, %s3250_s21  ;;  %2363 = vrot.lane.b32.xlu0 %v5119_v3, %s3246_s7 }
 0x512   :  { %2461 = vrot.lane.b32.xlu1 %v5104_v63, %s3250_s21  ;;  %2411 = vrot.lane.b32.xlu0 %v5113_v25, %s3248_s19 }
 0x516   :  { %2509 = vrot.lane.b32.xlu1 %v5099_v62, %s3252_s23  ;;  %2415 = vrot.lane.b32.xlu0 %v5119_v3, %s3248_s19 }
 0x51a   :  { %2513 = vrot.lane.b32.xlu1 %v5104_v63, %s3252_s23  ;;  %2463 = vrot.lane.b32.xlu0 %v5113_v25, %s3250_s21 }
 0x51e   :  { %2561 = vrot.lane.b32.xlu1 %v5099_v62, %s3247_s18  ;;  %2467 = vrot.lane.b32.xlu0 %v5119_v3, %s3250_s21 }
 0x522   :  { %2613 = vrot.lane.b32.xlu1 %v5099_v62, %s3249_s20  ;;  %2515 = vrot.lane.b32.xlu0 %v5113_v25, %s3252_s23 }
 0x526   :  { %2617 = vrot.lane.b32.xlu1 %v5104_v63, %s3249_s20  ;;  %2519 = vrot.lane.b32.xlu0 %v5119_v3, %s3252_s23 }
 0x52a   :  { %2665 = vrot.lane.b32.xlu1 %v5099_v62, %s3251_s22  ;;  %2619 = vrot.lane.b32.xlu0 %v5113_v25, %s3249_s20 }
 0x52e   :  { %2669 = vrot.lane.b32.xlu1 %v5104_v63, %s3251_s22  ;;  %2623 = vrot.lane.b32.xlu0 %v5119_v3, %s3249_s20 }
 0x532   :  { %2717 = vrot.lane.b32.xlu1 %v5099_v62, %s3253_s15  ;;  %2671 = vrot.lane.b32.xlu0 %v5113_v25, %s3251_s22 }
 0x536   :  { %2721 = vrot.lane.b32.xlu1 %v5104_v63, %s3253_s15  ;;  %2675 = vrot.lane.b32.xlu0 %v5119_v3, %s3251_s22 }
 0x53a   :  { %2567 = vrot.lane.b32.xlu1 %v5113_v25, %s3247_s18  ;;  %2723 = vrot.lane.b32.xlu0 %v5113_v25, %s3253_s15 }
 0x53e   :  { %2571 = vrot.lane.b32.xlu1 %v5119_v3, %s3247_s18  ;;  %2569 = vrot.lane.b32.xlu0 %v5176_v28, %s3247_s18 }
 0x542   :  { %2361 = vrot.lane.b32.xlu1 %v5176_v28, %s3246_s7  ;;  %2573 = vrot.lane.b32.xlu0 %v5185_v52, %s3247_s18 }
 0x546   :  { %2365 = vrot.lane.b32.xlu1 %v5185_v52, %s3246_s7  ;;  %2727 = vrot.lane.b32.xlu0 %v5119_v3, %s3253_s15  ;;  %s2803_s7 = sshll.u32 %s3254_s13, 4  ;;  %s2804_s7 = int_to_ptr.vmem [resolvable:$true] %s2803_s7 }
 0x547   :  { %s3212_s18 = scalar_lea.vmem %s2804_s7, 1024  ;;  %p3217_p1 = scmp.lt.s32.totalorder %s2804_s7, %s2804_s7 }
 0x548   :  { %p3213_p0 = scmp.ne.s32.totalorder %s2804_s7, %s3212_s18  ;;  %p3218_p2 = scmp.lt.s32.totalorder %s3212_s18, %s3212_s18 }
 0x54a   :  { %2413 = vrot.lane.b32.xlu1 %v5176_v28, %s3248_s19  ;;  %2770 = vperm.xlu0 %3161, %v2767_v50   ;;  %p3219_p3 = por %p3218_p2, %p3217_p1 }
 0x54c   :  { %p3220_p4 = pnand %p3219_p3, %p3213_p0 }
 0x54e   :  { %2417 = vrot.lane.b32.xlu1 %v5185_v52, %s3248_s19 }
 0x552   :  { %2465 = vrot.lane.b32.xlu1 %v5176_v28, %s3250_s21 }
 0x554   :  { %v2356_v13 = vpop.permute.xlu0 %2355  ;;  %v5214_v27 = vpop.permute.xlu1 %2351 }
 0x556   :  { %2469 = vrot.lane.b32.xlu1 %v5185_v52, %s3250_s21 }
 0x558   :  { %v2408_v34 = vpop.permute.xlu0 %2407  ;;  %v5218_v7 = vpop.permute.xlu1 %2403 }
 0x55a   :  { %2517 = vrot.lane.b32.xlu1 %v5176_v28, %s3252_s23 }
 0x55c   :  { %v2460_v31 = vpop.permute.xlu0 %2459  ;;  %v5222_v44 = vpop.permute.xlu1 %2455 }
 0x55e   :  { %2521 = vrot.lane.b32.xlu1 %v5185_v52, %s3252_s23 }
 0x560   :  { %v5226_v12 = vpop.permute.xlu0 %2511  ;;  %v5228_v49 = vpop.permute.xlu1 %2507 }
 0x562   :  { %2621 = vrot.lane.b32.xlu1 %v5176_v28, %s3249_s20 }
 0x564   :  { %v5232_v43 = vpop.permute.xlu0 %2611  ;;  %v5234_v41 = vpop.permute.xlu1 %2559 }
 0x566   :  { %2625 = vrot.lane.b32.xlu1 %v5185_v52, %s3249_s20 }
 0x568   :  { %v5238_v22 = vpop.permute.xlu0 %2615  ;;  %v5240_v24 = vpop.permute.xlu1 %2563 }
 0x56a   :  { %2673 = vrot.lane.b32.xlu1 %v5176_v28, %s3251_s22 }
 0x56c   :  { %v5244_v57 = vpop.permute.xlu0 %2667  ;;  %v5246_v32 = vpop.permute.xlu1 %2663 }
 0x56e   :  { %2677 = vrot.lane.b32.xlu1 %v5185_v52, %s3251_s22 }
 0x570   :  { %v5250_v36 = vpop.permute.xlu0 %2715  ;;  %v2354_v60 = vpop.permute.xlu1 %2353 }
 0x571   :  { %6057 = vst [vmem:[#allocation14_spill] sm:$0xff] %v5250_v36  ;;  %v2372_v14 = vsel %vm439_vm1, %v2354_v60, %v2356_v13  ;;  %v2373_v50 = vsel %vm439_vm1, %v5214_v27, %v2354_v60 }
 0x572   :  { %v2376_v55 = vmul.f32 %v2373_v50, %v6058_v9  ;;  %v2377_v16 = vmul.f32 %v2372_v14, %v6059_v2  ;;  %2725 = vrot.lane.b32.xlu1 %v5176_v28, %s3253_s15  ;;  %v6060_v9 = vld [vmem:[#allocation26_spill] sm:$0xff] }
 0x574   :  { %v2388_v51 = vmul.f32 %v5208_v0, %v2376_v55  ;;  %v2389_v11 = vmul.f32 %v5208_v0, %v2377_v16  ;;  %v5265_v23 = vpop.permute.xlu0 %2719  ;;  %v2358_v58 = vpop.permute.xlu1 %2357  ;;  %v2346_v55 = vmul.f32 %v5077_v46, %v5104_v63 }
 0x575   :  { %v2371_v60 = vsel %vm439_vm1, %v2356_v13, %v2358_v58 }
 0x576   :  { %v5269_v6 = vadd.f32 %v2388_v51, %v2344_v40  ;;  %v2397_v2 = vadd.f32 %v2389_v11, %v5082_v8  ;;  %v2378_v14 = vmul.f32 %v2371_v60, %v6060_v9  ;;  %2729 = vrot.lane.b32.xlu1 %v5185_v52, %s3253_s15  ;;  %v6061_v40 = vld [vmem:[#allocation28_spill] sm:$0xff] }
 0x578   :  { %v2390_v16 = vmul.f32 %v5208_v0, %v2378_v14  ;;  %v5278_v62 = vpop.permute.xlu0 %2565  ;;  %v2406_v50 = vpop.permute.xlu1 %2405 }
 0x579   :  { %v2424_v13 = vsel %vm536_vm2, %v2406_v50, %v2408_v34 }
 0x57a   :  { %v2398_v51 = vadd.f32 %v2390_v16, %v2346_v55  ;;  %v2429_v54 = vmul.f32 %v2424_v13, %v6061_v40 }
 0x57c   :  { %v2441_v11 = vmul.f32 %v5159_v56, %v2429_v54  ;;  %v2410_v8 = vpop.permute.xlu1 %2409  ;;  %v5284_v60 = vpop.permute.xlu0 %2359  ;;  %v2347_v54 = vmul.f32 %v5077_v46, %v5113_v25 }
 0x57d   :  { %v2423_v9 = vsel %vm536_vm2, %v2408_v34, %v2410_v8  ;;  %v2370_v63 = vsel %vm439_vm1, %v2358_v58, %v5284_v60 }
 0x57e   :  { %v2449_v14 = vadd.f32 %v2441_v11, %v2397_v2  ;;  %v2430_v1 = vmul.f32 %v2423_v9, %v6062_v20  ;;  %v2379_v21 = vmul.f32 %v2370_v63, %v6063_v37  ;;  %v6064_v2 = vld [vmem:[#allocation31_spill] sm:$0xff]  ;;  %v2425_v20 = vsel %vm536_vm2, %v5218_v7, %v2406_v50 }
 0x580   :  { %v2442_v55 = vmul.f32 %v5159_v56, %v2430_v1  ;;  %v2391_v16 = vmul.f32 %v5208_v0, %v2379_v21  ;;  %v2458_v13 = vpop.permute.xlu1 %2457  ;;  %v5297_v40 = vpop.permute.xlu0 %2363 }
 0x581   :  { %v2476_v34 = vsel %vm634_vm3, %v2458_v13, %v2460_v31 }
 0x582   :  { %v2450_v33 = vadd.f32 %v2442_v55, %v2398_v51  ;;  %v2399_v58 = vadd.f32 %v2391_v16, %v2347_v54  ;;  %v2481_v11 = vmul.f32 %v2476_v34, %v6064_v2  ;;  %v2579_v51 = vsel %vm830_vm5, %v5240_v24, %v5278_v62  ;;  %v6065_v55 = vld [vmem:[#allocation32_spill] sm:$0xff]  ;;  %v6067_v34 = vld [vmem:[#allocation27_spill] sm:$0xff] }
 0x583   :  { %v6066_v54 = vld [vmem:[#allocation20_spill] sm:$0xff]  ;;  %v2428_v2 = vmul.f32 %v2425_v20, %v6067_v34  ;;  %v2585_v5 = vmul.f32 %v2579_v51, %v6068_v59 }
 0x584   :  { %v2493_v1 = vmul.f32 %v5169_v61, %v2481_v11  ;;  %v2462_v37 = vpop.permute.xlu1 %2461  ;;  %v5306_v25 = vpop.permute.xlu0 %2411 }
 0x585   :  { %v2475_v21 = vsel %vm634_vm3, %v2460_v31, %v2462_v37  ;;  %v2422_v9 = vsel %vm536_vm2, %v2410_v8, %v5306_v25  ;;  %v2477_v31 = vsel %vm634_vm3, %v5222_v44, %v2458_v13  ;;  %v2597_v36 = vmul.f32 %v5191_v42, %v2585_v5 }
 0x586   :  { %v2501_v63 = vadd.f32 %v2493_v1, %v2449_v14  ;;  %v2482_v50 = vmul.f32 %v2475_v21, %v6065_v55  ;;  %v2431_v16 = vmul.f32 %v2422_v9, %v6066_v54  ;;  %v6069_v1 = vld [vmem:[#allocation30_spill] sm:$0xff]  ;;  %v2440_v54 = vmul.f32 %v5159_v56, %v2428_v2 }
 0x587   :  { %v2480_v21 = vmul.f32 %v2477_v31, %v6069_v1  ;;  %v6070_v55 = vld [vmem:[#allocation34_spill] sm:$0xff]  ;;  %v6072_v31 = vld [vmem:[#allocation39_spill] sm:$0xff] }
 0x588   :  { %v2494_v11 = vmul.f32 %v5169_v61, %v2482_v50  ;;  %v2443_v8 = vmul.f32 %v5159_v56, %v2431_v16  ;;  %v2510_v45 = vpop.permute.xlu1 %2509  ;;  %v5325_v53 = vpop.permute.xlu0 %2415  ;;  %v6071_v16 = vld [vmem:[#allocation33_spill] sm:$0xff] }
 0x589   :  { %v2528_v14 = vsel %vm732_vm4, %v2510_v45, %v5226_v12  ;;  %v2529_v20 = vsel %vm732_vm4, %v5228_v49, %v2510_v45 }
 0x58a   :  { %v2502_v13 = vadd.f32 %v2494_v11, %v2450_v33  ;;  %v2451_v9 = vadd.f32 %v2443_v8, %v2399_v58  ;;  %v2533_v50 = vmul.f32 %v2528_v14, %v6070_v55  ;;  %v2532_v34 = vmul.f32 %v2529_v20, %v6071_v16  ;;  %v6073_v8 = vld [vmem:[#allocation21_spill] sm:$0xff] }
 0x58b   :  { %v2492_v58 = vmul.f32 %v5169_v61, %v2480_v21  ;;  %v2448_v20 = vadd.f32 %v2440_v54, %v5269_v6  ;;  %v6074_v54 = vld [vmem:[#allocation37_spill] sm:$0xff] }
 0x58c   :  { %v2545_v59 = vmul.f32 %v5179_v39, %v2533_v50  ;;  %v2514_v51 = vpop.permute.xlu1 %2513  ;;  %v5339_v30 = vpop.permute.xlu0 %2463  ;;  %v2544_v1 = vmul.f32 %v5179_v39, %v2532_v34 }
 0x58d   :  { %v2527_v45 = vsel %vm732_vm4, %v5226_v12, %v2514_v51  ;;  %v2474_v33 = vsel %vm634_vm3, %v2462_v37, %v5339_v30  ;;  %v2500_v21 = vadd.f32 %v2492_v58, %v2448_v20 }
 0x58e   :  { %v2553_v2 = vadd.f32 %v2545_v59, %v2501_v63  ;;  %v2534_v11 = vmul.f32 %v2527_v45, %v6072_v31  ;;  %v2483_v14 = vmul.f32 %v2474_v33, %v6073_v8 }
 0x58f   :  { %v2552_v59 = vadd.f32 %v2544_v1, %v2500_v21 }
 0x590   :  { %v2546_v5 = vmul.f32 %v5179_v39, %v2534_v11  ;;  %v2495_v55 = vmul.f32 %v5169_v61, %v2483_v14  ;;  %v5355_v12 = vpop.permute.xlu1 %2561  ;;  %v5357_v50 = vpop.permute.xlu0 %2467  ;;  %v2605_v37 = vadd.f32 %v2597_v36, %v2553_v2  ;;  %v6076_v2 = vld [vmem:[#allocation70_spill] sm:$0xff] }
 0x591   :  { %v2580_v63 = vsel %vm830_vm5, %v5355_v12, %v5240_v24 }
 0x592   :  { %v5363_v16 = vadd.f32 %v2546_v5, %v2502_v13  ;;  %v2503_v6 = vadd.f32 %v2495_v55, %v2451_v9  ;;  %v2584_v34 = vmul.f32 %v2580_v63, %v6074_v54  ;;  %v6075_v9 = vld [vmem:[#allocation42_spill] sm:$0xff] }
 0x594   :  { %v2596_v45 = vmul.f32 %v5191_v42, %v2584_v34  ;;  %v5367_v33 = vpop.permute.xlu1 %2613  ;;  %v5369_v31 = vpop.permute.xlu0 %2515 }
 0x595   :  { %v2632_v36 = vsel %vm928_vm6, %v5367_v33, %v5238_v22  ;;  %v2526_v24 = vsel %vm732_vm4, %v2514_v51, %v5369_v31  ;;  %v6078_v51 = vld [vmem:[#allocation44_spill] sm:$0xff] }
 0x596   :  { %v2604_v13 = vadd.f32 %v2596_v45, %v2552_v59  ;;  %v2636_v58 = vmul.f32 %v2632_v36, %v6075_v9  ;;  %v2535_v11 = vmul.f32 %v2526_v24, %v6076_v2  ;;  %v6080_v24 = vld [vmem:[#allocation46_spill] sm:$0xff] }
 0x598   :  { %v2648_v8 = vmul.f32 %v5202_v48, %v2636_v58  ;;  %v2547_v14 = vmul.f32 %v5179_v39, %v2535_v11  ;;  %v2618_v20 = vpop.permute.xlu1 %2617  ;;  %v5382_v1 = vpop.permute.xlu0 %2519  ;;  %v6082_v11 = vld [vmem:[#allocation41_spill] sm:$0xff] }
 0x599   :  { %v2631_v5 = vsel %vm928_vm6, %v5238_v22, %v2618_v20 }
 0x59a   :  { %v2656_v55 = vadd.f32 %v2648_v8, %v2604_v13  ;;  %v5387_v63 = vadd.f32 %v2547_v14, %v2503_v6  ;;  %v2637_v21 = vmul.f32 %v2631_v5, %v6078_v51 }
 0x59c   :  { %6077 = vst [vmem:[#allocation85_spill] sm:$0xff] %v5387_v63  ;;  %v2649_v54 = vmul.f32 %v5202_v48, %v2637_v21  ;;  %v5391_v34 = vpop.permute.xlu1 %2665  ;;  %v5393_v59 = vpop.permute.xlu0 %2619  ;;  %v6083_v21 = vld [vmem:[#allocation43_spill] sm:$0xff] }
 0x59d   :  { %6079 = vst [vmem:[#allocation83_spill] sm:$0xff] %v5393_v59  ;;  %v2684_v45 = vsel %vm1026_vm8, %v5391_v34, %v5244_v57 }
 0x59e   :  { %v2657_v36 = vadd.f32 %v2649_v54, %v2605_v37  ;;  %v2688_v9 = vmul.f32 %v2684_v45, %v6080_v24 }
 0x5a0   :  { %v2700_v22 = vmul.f32 %v5210_v26, %v2688_v9  ;;  %v2670_v6 = vpop.permute.xlu1 %2669  ;;  %v5404_v58 = vpop.permute.xlu0 %2623 }
 0x5a1   :  { %v2683_v13 = vsel %vm1026_vm8, %v5244_v57, %v2670_v6  ;;  %6081 = vst [vmem:[#allocation11_spill] sm:$0xff] %v5404_v58 }
 0x5a2   :  { %v2708_v2 = vadd.f32 %v2700_v22, %v2656_v55  ;;  %v2689_v8 = vmul.f32 %v2683_v13, %v6082_v11  ;;  %v6084_v22 = vld [vmem:[#allocation48_spill] sm:$0xff] }
 0x5a4   :  { %v2701_v14 = vmul.f32 %v5210_v26, %v2689_v8  ;;  %v5408_v5 = vpop.permute.xlu1 %2717  ;;  %v5415_v45 = vpop.permute.xlu0 %2671 }
 0x5a5   :  { %v2736_v37 = vsel %vm1124_vm7, %v5408_v5, %v5265_v23 }
 0x5a6   :  { %v2709_v51 = vadd.f32 %v2701_v14, %v2657_v36  ;;  %v2740_v54 = vmul.f32 %v2736_v37, %v6083_v21 }
 0x5a8   :  { %v2752_v57 = vmul.f32 %v5200_v29, %v2740_v54  ;;  %v2722_v24 = vpop.permute.xlu1 %2721  ;;  %v5427_v36 = vpop.permute.xlu0 %2675  ;;  %v6086_v54 = vld [vmem:[#allocation45_spill] sm:$0xff] }
 0x5a9   :  { %v2735_v55 = vsel %vm1124_vm7, %v5265_v23, %v2722_v24  ;;  %6085 = vst [vmem:[#allocation87_spill] sm:$0xff] %v5427_v36 }
 0x5aa   :  { %v5421_v9 = vadd.f32 %v2752_v57, %v2708_v2  ;;  %v2741_v13 = vmul.f32 %v2735_v55, %v6084_v22 }
 0x5ac   :  { %v2753_v11 = vmul.f32 %v5200_v29, %v2741_v13  ;;  %v5425_v8 = vpop.permute.xlu1 %2567  ;;  %v5437_v23 = vpop.permute.xlu0 %2723 }
 0x5ad   :  { %v2578_v21 = vsel %vm830_vm5, %v5278_v62, %v5425_v8  ;;  %v2349_v62 = vmul.f32 %v5077_v46, %v5119_v3 }
 0x5ae   :  { %v5429_v14 = vadd.f32 %v2753_v11, %v2709_v51  ;;  %v2586_v57 = vmul.f32 %v2578_v21, %v6086_v54  ;;  %v2630_v11 = vsel %vm928_vm6, %v2618_v20, %v5393_v59  ;;  %v2348_v21 = vmul.f32 %v5077_v46, %v5176_v28 }
 0x5af   :  { %v2682_v28 = vsel %vm1026_vm8, %v2670_v6, %v5415_v45  ;;  %v6090_v6 = vld [vmem:[#allocation69_spill] sm:$0xff] }
 0x5b0   :  { %v5431_v37 = vpop.permute.xlu1 %2571 }
 0x5b4   :  { %v2362_v2 = vpop.permute.xlu1 %2361 }
 0x5b5   :  { %v2368_v55 = vsel %vm439_vm1, %v2362_v2, %v5297_v40  ;;  %v2369_v51 = vsel %vm439_vm1, %v5284_v60, %v2362_v2  ;;  %v2598_v60 = vmul.f32 %v5191_v42, %v2586_v57 }
 0x5b6   :  { %v2380_v22 = vmul.f32 %v2369_v51, %v5999_v15  ;;  %v2381_v13 = vmul.f32 %v2368_v55, %v6000_v18  ;;  %v5458_v15 = vpop.permute.xlu0 %2569  ;;  %v6087_v55 = vld [vmem:[#allocation10_spill] sm:$0xff]  ;;  %v6088_v51 = vld [vmem:[#allocation47_spill] sm:$0xff] }
 0x5b7   :  { %v2638_v58 = vmul.f32 %v2630_v11, %v6088_v51  ;;  %v2606_v59 = vadd.f32 %v2598_v60, %v5363_v16  ;;  %v6089_v11 = vld [vmem:[#allocation68_spill] sm:$0xff]  ;;  %v2734_v16 = vsel %vm1124_vm7, %v2722_v24, %v5437_v23 }
 0x5b8   :  { %v2392_v54 = vmul.f32 %v5208_v0, %v2380_v22  ;;  %v2393_v63 = vmul.f32 %v5208_v0, %v2381_v13  ;;  %v2366_v36 = vpop.permute.xlu1 %2365  ;;  %v2350_v22 = vmul.f32 %v5077_v46, %v5185_v52  ;;  %v6091_v52 = vld [vmem:[#allocation51_spill] sm:$0xff] }
 0x5b9   :  { %v2367_v18 = vsel %vm439_vm1, %v5297_v40, %v2366_v36  ;;  %v2650_v46 = vmul.f32 %v5202_v48, %v2638_v58 }
 0x5ba   :  { %v2400_v3 = vadd.f32 %v2392_v54, %v2348_v21  ;;  %v2401_v2 = vadd.f32 %v2393_v63, %v2349_v62  ;;  %v2382_v20 = vmul.f32 %v2367_v18, %v6087_v55  ;;  %v2690_v18 = vmul.f32 %v2682_v28, %v6091_v52  ;;  %v5482_v55 = vpop.permute.xlu0 %2573 }
 0x5bb   :  { %v2658_v51 = vadd.f32 %v2650_v46, %v2606_v59  ;;  %v2374_v59 = vsel %vm439_vm1, %v2366_v36, %v5214_v27  ;;  %v6094_v36 = vld [vmem:[#allocation19_spill] sm:$0xff] }
 0x5bc   :  { %v2394_v57 = vmul.f32 %v5208_v0, %v2382_v20  ;;  %v2414_v13 = vpop.permute.xlu1 %2413 }
 0x5bd   :  { %v2420_v40 = vsel %vm536_vm2, %v2414_v13, %v5325_v53  ;;  %v2421_v63 = vsel %vm536_vm2, %v5306_v25, %v2414_v13  ;;  %v6092_v13 = vld [vmem:[#allocation65_spill] sm:$0xff] }
 0x5be   :  { %v2402_v62 = vadd.f32 %v2394_v57, %v2350_v22  ;;  %v2432_v21 = vmul.f32 %v2421_v63, %v6089_v11  ;;  %v2433_v54 = vmul.f32 %v2420_v40, %v6090_v6  ;;  %v2702_v40 = vmul.f32 %v5210_v26, %v2690_v18  ;;  %v6093_v63 = vld [vmem:[#allocation50_spill] sm:$0xff] }
 0x5bf   :  { %v2742_v11 = vmul.f32 %v2734_v16, %v6093_v63  ;;  %v2375_v16 = vmul.f32 %v2374_v59, %v6094_v36 }
 0x5c0   :  { %v2444_v60 = vmul.f32 %v5159_v56, %v2432_v21  ;;  %v2445_v20 = vmul.f32 %v5159_v56, %v2433_v54  ;;  %v2418_v25 = vpop.permute.xlu1 %2417  ;;  %v2710_v21 = vadd.f32 %v2702_v40, %v2658_v51  ;;  %v5499_v54 = vpop.permute.xlu0 %2727 }
 0x5c1   :  { %v2419_v22 = vsel %vm536_vm2, %v5325_v53, %v2418_v25  ;;  %v2754_v18 = vmul.f32 %v5200_v29, %v2742_v11  ;;  %v2426_v27 = vsel %vm536_vm2, %v2418_v25, %v5218_v7 }
 0x5c2   :  { %v2452_v57 = vadd.f32 %v2444_v60, %v2400_v3  ;;  %v2453_v58 = vadd.f32 %v2445_v20, %v2401_v2  ;;  %v2434_v28 = vmul.f32 %v2419_v22, %v6092_v13 }
 0x5c3   :  { %v2762_v22 = vadd.f32 %v2754_v18, %v2710_v21  ;;  %v6099_v18 = vld [vmem:[#allocation25_spill] sm:$0xff] }
 0x5c4   :  { %v2446_v24 = vmul.f32 %v5159_v56, %v2434_v28  ;;  %v2466_v6 = vpop.permute.xlu1 %2465  ;;  %v6096_v28 = vld [vmem:[#allocation67_spill] sm:$0xff] }
 0x5c5   :  { %v2472_v53 = vsel %vm634_vm3, %v2466_v6, %v5357_v50  ;;  %v2473_v3 = vsel %vm634_vm3, %v5339_v30, %v2466_v6 }
 0x5c6   :  { %v2454_v2 = vadd.f32 %v2446_v24, %v2402_v62  ;;  %v2484_v46 = vmul.f32 %v2473_v3, %v6011_v38  ;;  %v2485_v52 = vmul.f32 %v2472_v53, %v4546_v17  ;;  %v6095_v62 = vld [vmem:[#allocation64_spill] sm:$0xff]  ;;  %v6097_v24 = vld [vmem:[#allocation66_spill] sm:$0xff] }
 0x5c7   :  { %v2427_v7 = vmul.f32 %v2426_v27, %v6095_v62 }
 0x5c8   :  { %v2496_v60 = vmul.f32 %v5169_v61, %v2484_v46  ;;  %v2497_v20 = vmul.f32 %v5169_v61, %v2485_v52  ;;  %v2470_v51 = vpop.permute.xlu1 %2469 }
 0x5c9   :  { %v2471_v38 = vsel %vm634_vm3, %v5357_v50, %v2470_v51  ;;  %v2478_v17 = vsel %vm634_vm3, %v2470_v51, %v5222_v44  ;;  %v5522_v30 = vpop.permute.xlu0 %2770  ;;  %v2387_v44 = vmul.f32 %v5208_v0, %v2375_v16  ;;  %v2581_v0 = vsel %vm830_vm5, %v5234_v41, %v5355_v12  ;;  %v6102_v51 = vld [vmem:[#allocation62_spill] sm:$0xff] }
 0x5ca   :  { %v5525_v25 = vadd.f32 %v2496_v60, %v2452_v57  ;;  %v5527_v13 = vadd.f32 %v2497_v20, %v2453_v58  ;;  %v2486_v40 = vmul.f32 %v2471_v38, %v6096_v28  ;;  %v2774_v63 = vadd.f32 %v5522_v30, %v5421_v9 }
 0x5cb   :  { %v2775_v50 = vadd.f32 %v5522_v30, %v5429_v14  ;;  %v2776_v11 = vadd.f32 %v5522_v30, %v2762_v22  ;;  %v2479_v6 = vmul.f32 %v2478_v17, %v6097_v24  ;;  %v2439_v9 = vmul.f32 %v5159_v56, %v2427_v7  ;;  %v6103_v17 = vld [vmem:[#allocation61_spill] sm:$0xff] }
 0x5cc   :  { %v2498_v21 = vmul.f32 %v5169_v61, %v2486_v40  ;;  %v2518_v57 = vpop.permute.xlu1 %2517  ;;  %v2782_v58 = vadd.f32 %v5015_v19, %v2774_v63  ;;  %v2633_v19 = vsel %vm928_vm6, %v5232_v43, %v5367_v33  ;;  %v2685_v12 = vsel %vm1026_vm8, %v5246_v32, %v5391_v34  ;;  %v6100_v33 = vld [vmem:[#allocation36_spill] sm:$0xff] }
 0x5cd   :  { %v2783_v59 = vadd.f32 %v5033_v4, %v2775_v50  ;;  %v2784_v53 = vadd.f32 %v5021_v47, %v2776_v11  ;;  %v2395_v4 = vadd.f32 %v2387_v44, %v5085_v35  ;;  %v2491_v47 = vmul.f32 %v5169_v61, %v2479_v6  ;;  %v6101_v35 = vld [vmem:[#allocation14_spill] sm:$0xff]  ;;  %v6104_v40 = vld [vmem:[#allocation76_spill] sm:$0xff] }
 0x5ce   :  { %v5542_v3 = vadd.f32 %v2498_v21, %v2454_v2  ;;  %2790 = vst [vmem:[#allocation2 + $0x8] sm:$0xff] %v2782_v58  ;;  %v6098_v2 = vld [vmem:[#allocation60_spill] sm:$0xff]  ;;  %v2635_v36 = vmul.f32 %v2633_v19, %v6100_v33  ;;  %v2737_v61 = vsel %vm1124_vm7, %v6101_v35, %v5408_v5  ;;  %v2577_v34 = vsel %vm830_vm5, %v5425_v8, %v5458_v15  ;;  %v6105_v8 = vld [vmem:[#allocation79_spill] sm:$0xff] }
 0x5cf   :  { %2791 = vst [vmem:[#allocation2 + $0x10] sm:$0xff] %v2783_v59  ;;  %2792 = vst [vmem:[#allocation2 + $0x18] sm:$0xff] %v2784_v53  ;;  %v2583_v46 = vmul.f32 %v2581_v0, %v6098_v2  ;;  %v2447_v52 = vadd.f32 %v2439_v9, %v2395_v4  ;;  %v2687_v22 = vmul.f32 %v2685_v12, %v6102_v51  ;;  %v6106_v11 = vld [vmem:[#allocation12_spill] sm:$0xff]  ;;  %v6107_v9 = vld [vmem:[#allocation83_spill] sm:$0xff] }
 0x5d0   :  { %v2522_v56 = vpop.permute.xlu1 %2521  ;;  %v2525_v5 = vsel %vm732_vm4, %v5369_v31, %v2518_v57  ;;  %v2739_v62 = vmul.f32 %v2737_v61, %v6103_v17  ;;  %v2647_v28 = vmul.f32 %v5202_v48, %v2635_v36  ;;  %v2587_v63 = vmul.f32 %v2577_v34, %v6104_v40  ;;  %v6108_v19 = vld [vmem:[#allocation71_spill] sm:$0xff]  ;;  %v6115_v51 = vld [vmem:[#allocation85_spill] sm:$0xff] }
 0x5d1   :  { %v2530_v14 = vsel %vm732_vm4, %v2522_v56, %v5228_v49  ;;  %v2576_v49 = vsel %vm830_vm5, %v5458_v15, %v5431_v37  ;;  %v2499_v16 = vadd.f32 %v2491_v47, %v2447_v52  ;;  %v2595_v38 = vmul.f32 %v5191_v42, %v2583_v46  ;;  %v6109_v4 = vld [vmem:[#allocation75_spill] sm:$0xff] }
 0x5d2   :  { %v2531_v27 = vmul.f32 %v2530_v14, %v6099_v18  ;;  %v2588_v15 = vmul.f32 %v2576_v49, %v6105_v8  ;;  %v2524_v50 = vsel %vm732_vm4, %v2518_v57, %v5382_v1  ;;  %v2536_v44 = vmul.f32 %v2525_v5, %v6106_v11  ;;  %v6111_v18 = vld [vmem:[#allocation80_spill] sm:$0xff]  ;;  %v6112_v33 = vld [vmem:[#allocation15_spill] sm:$0xff]  ;;  %v6116_v5 = vld [vmem:[#allocation81_spill] sm:$0xff] }
 0x5d3   :  { %v2523_v31 = vsel %vm732_vm4, %v5382_v1, %v2522_v56  ;;  %v2699_v21 = vmul.f32 %v5210_v26, %v2687_v22  ;;  %v2751_v58 = vmul.f32 %v5200_v29, %v2739_v62  ;;  %v2575_v59 = vsel %vm830_vm5, %v5431_v37, %v5482_v55  ;;  %v6110_v56 = vld [vmem:[#allocation11_spill] sm:$0xff] }
 0x5d4   :  { %v2543_v60 = vmul.f32 %v5179_v39, %v2531_v27  ;;  %v2622_v20 = vpop.permute.xlu1 %2621  ;;  %v2599_v0 = vmul.f32 %v5191_v42, %v2587_v63  ;;  %v2537_v1 = vmul.f32 %v2524_v50, %v6108_v19  ;;  %v2538_v47 = vmul.f32 %v2523_v31, %v6109_v4  ;;  %v6113_v61 = vld [vmem:[#allocation87_spill] sm:$0xff]  ;;  %v6118_v63 = vld [vmem:[#allocation5_spill] sm:$0xff]  ;;  %v6119_v50 = vld [vmem:[#allocation92_spill] sm:$0xff] }
 0x5d5   :  { %v2629_v57 = vsel %vm928_vm6, %v6107_v9, %v2622_v20  ;;  %v2628_v14 = vsel %vm928_vm6, %v2622_v20, %v6110_v56  ;;  %v2600_v2 = vmul.f32 %v5191_v42, %v2588_v15  ;;  %v2582_v37 = vsel %vm830_vm5, %v5482_v55, %v5234_v41  ;;  %v6122_v9 = vld [vmem:[#allocation88_spill] sm:$0xff] }
 0x5d6   :  { %v2551_v7 = vadd.f32 %v2543_v60, %v2499_v16  ;;  %v2548_v46 = vmul.f32 %v5179_v39, %v2536_v44  ;;  %v2589_v27 = vmul.f32 %v2575_v59, %v6111_v18  ;;  %v2639_v36 = vmul.f32 %v2629_v57, %v6112_v33  ;;  %v6114_v60 = vld [vmem:[#allocation16_spill] sm:$0xff] }
 0x5d7   :  { %v2640_v20 = vmul.f32 %v2628_v14, %v6114_v60  ;;  %v2607_v22 = vadd.f32 %v2599_v0, %v6115_v51  ;;  %v2549_v17 = vmul.f32 %v5179_v39, %v2537_v1  ;;  %v2550_v62 = vmul.f32 %v5179_v39, %v2538_v47  ;;  %v6123_v0 = vld [vmem:[#allocation89_spill] sm:$0xff] }
 0x5d8   :  { %v2603_v24 = vadd.f32 %v2595_v38, %v2551_v7  ;;  %v2626_v6 = vpop.permute.xlu1 %2625  ;;  %v2590_v38 = vmul.f32 %v2582_v37, %v6116_v5 }
 0x5d9   :  { %v2627_v41 = vsel %vm928_vm6, %v6110_v56, %v2626_v6  ;;  %v2634_v55 = vsel %vm928_vm6, %v2626_v6, %v5232_v43  ;;  %v6120_v43 = vld [vmem:[#allocation18_spill] sm:$0xff]  ;;  %v2557_v59 = vadd.f32 %v2549_v17, %v5527_v13 }
 0x5da   :  { %v2655_v53 = vadd.f32 %v2647_v28, %v2603_v24  ;;  %v6117_v28 = vld [vmem:[#allocation82_spill] sm:$0xff]  ;;  %v2641_v11 = vmul.f32 %v2627_v41, %v6119_v50  ;;  %v2642_v44 = vmul.f32 %v2634_v55, %v6120_v43  ;;  %v6121_v24 = vld [vmem:[#allocation73_spill] sm:$0xff]  ;;  %v2602_v1 = vmul.f32 %v5191_v42, %v2590_v38  ;;  %v6127_v38 = vld [vmem:[#allocation52_spill] sm:$0xff] }
 0x5dc   :  { %v2707_v12 = vadd.f32 %v2699_v21, %v2655_v53  ;;  %v2674_v52 = vpop.permute.xlu1 %2673  ;;  %v2651_v21 = vmul.f32 %v5202_v48, %v2639_v36  ;;  %v2558_v53 = vadd.f32 %v2550_v62, %v5542_v3  ;;  %v2653_v14 = vmul.f32 %v5202_v48, %v2641_v11 }
 0x5dd   :  { %v2680_v49 = vsel %vm1026_vm8, %v2674_v52, %v6113_v61  ;;  %v2681_v34 = vsel %vm1026_vm8, %v5415_v45, %v2674_v52  ;;  %v2556_v45 = vadd.f32 %v2548_v46, %v5525_v25  ;;  %v2601_v25 = vmul.f32 %v5191_v42, %v2589_v27  ;;  %v6125_v52 = vld [vmem:[#allocation38_spill] sm:$0xff] }
 0x5de   :  { %v2759_v16 = vadd.f32 %v2751_v58, %v2707_v12  ;;  %v2691_v40 = vmul.f32 %v2681_v34, %v6117_v28  ;;  %v2692_v8 = vmul.f32 %v2680_v49, %v6118_v63  ;;  %v2652_v58 = vmul.f32 %v5202_v48, %v2640_v20  ;;  %v6128_v63 = vld [vmem:[#allocation74_spill] sm:$0xff] }
 0x5df   :  { %v2654_v37 = vmul.f32 %v5202_v48, %v2642_v44  ;;  %v2659_v42 = vadd.f32 %v2651_v21, %v2607_v22  ;;  %v2609_v27 = vadd.f32 %v2601_v25, %v2557_v59  ;;  %v2610_v33 = vadd.f32 %v2602_v1, %v2558_v53  ;;  %v6130_v44 = vld [vmem:[#allocation84_spill] sm:$0xff] }
 0x5e0   :  { %v2773_v7 = vadd.f32 %v5522_v30, %v2759_v16  ;;  %v2678_v15 = vpop.permute.xlu1 %2677  ;;  %v2703_v4 = vmul.f32 %v5210_v26, %v2691_v40  ;;  %v2704_v47 = vmul.f32 %v5210_v26, %v2692_v8 }
 0x5e1   :  { %v2679_v31 = vsel %vm1026_vm8, %v6113_v61, %v2678_v15  ;;  %v2686_v39 = vsel %vm1026_vm8, %v2678_v15, %v5246_v32  ;;  %v2608_v32 = vadd.f32 %v2600_v2, %v2556_v45  ;;  %v6124_v2 = vld [vmem:[#allocation57_spill] sm:$0xff]  ;;  %v2662_v20 = vadd.f32 %v2654_v37, %v2610_v33 }
 0x5e2   :  { %v2781_v6 = vadd.f32 %v6121_v24, %v2773_v7  ;;  %v2693_v57 = vmul.f32 %v2679_v31, %v6122_v9  ;;  %v2694_v19 = vmul.f32 %v2686_v39, %v6123_v0  ;;  %v2711_v61 = vadd.f32 %v2703_v4, %v2659_v42  ;;  %v6131_v39 = vld [vmem:[#allocation77_spill] sm:$0xff] }
 0x5e3   :  { %v2660_v46 = vadd.f32 %v2652_v58, %v2608_v32 }
 0x5e4   :  { %2789 = vst [vmem:[#allocation2] sm:$0xff] %v2781_v6  ;;  %v2726_v56 = vpop.permute.xlu1 %2725  ;;  %v2705_v36 = vmul.f32 %v5210_v26, %v2693_v57  ;;  %v2706_v48 = vmul.f32 %v5210_v26, %v2694_v19  ;;  %v6126_v26 = vld [vmem:[#allocation7_spill] sm:$0xff] }
 0x5e5   :  { %v2732_v13 = vsel %vm1124_vm7, %v2726_v56, %v5499_v54  ;;  %v2733_v3 = vsel %vm1124_vm7, %v5437_v23, %v2726_v56  ;;  %v2712_v49 = vadd.f32 %v2704_v47, %v2660_v46  ;;  %v2661_v23 = vadd.f32 %v2653_v14, %v2609_v27 }
 0x5e6   :  { %v2743_v12 = vmul.f32 %v2733_v3, %v6124_v2  ;;  %v2744_v18 = vmul.f32 %v2732_v13, %v6125_v52  ;;  %v2714_v45 = vadd.f32 %v2706_v48, %v2662_v20 }
 0x5e7   :  { %v2713_v62 = vadd.f32 %v2705_v36, %v2661_v23 }
 0x5e8   :  { %v2755_v34 = vmul.f32 %v5200_v29, %v2743_v12  ;;  %v2756_v16 = vmul.f32 %v5200_v29, %v2744_v18  ;;  %v2730_v60 = vpop.permute.xlu1 %2729 }
 0x5e9   :  { %v2731_v41 = vsel %vm1124_vm7, %v5499_v54, %v2730_v60  ;;  %v2738_v55 = vsel %vm1124_vm7, %v2730_v60, %v6101_v35 }
 0x5ea   :  { %v2763_v51 = vadd.f32 %v2755_v34, %v2711_v61  ;;  %v2764_v22 = vadd.f32 %v2756_v16, %v2712_v49  ;;  %v2745_v5 = vmul.f32 %v2731_v41, %v6126_v26  ;;  %v2746_v17 = vmul.f32 %v2738_v55, %v6127_v38 }
 0x5ec   :  { %v2777_v7 = vadd.f32 %v5522_v30, %v2763_v51  ;;  %v2778_v28 = vadd.f32 %v5522_v30, %v2764_v22  ;;  %v2757_v40 = vmul.f32 %v5200_v29, %v2745_v5  ;;  %v2758_v54 = vmul.f32 %v5200_v29, %v2746_v17 }
 0x5ee   :  { %v2785_v8 = vadd.f32 %v6128_v63, %v2777_v7  ;;  %v2786_v35 = vadd.f32 %v6129_v10, %v2778_v28  ;;  %v2765_v15 = vadd.f32 %v2757_v40, %v2713_v62  ;;  %v2766_v50 = vadd.f32 %v2758_v54, %v2714_v45 }
 0x5f0   :  { %2793 = vst [vmem:[#allocation2 + $0x20] sm:$0xff] %v2785_v8  ;;  %2794 = vst [vmem:[#allocation2 + $0x28] sm:$0xff] %v2786_v35  ;;  %v2779_v11 = vadd.f32 %v5522_v30, %v2765_v15  ;;  %v2780_v43 = vadd.f32 %v5522_v30, %v2766_v50 }
 0x5f2   :  { %v2787_v31 = vadd.f32 %v6130_v44, %v2779_v11  ;;  %v2788_v25 = vadd.f32 %v6131_v39, %v2780_v43 }
 0x5f4   :  { %2795 = vst [vmem:[#allocation2 + $0x30] sm:$0xff] %v2787_v31  ;;  %2796 = vst [vmem:[#allocation2 + $0x38] sm:$0xff] %v2788_v25 }
 0x5f5   :  { %3223 = shalt.err (!%p3220_p4)
}
 0x5f6   :  { %s3224_s21 = scalar_lea.hbm %s5714_s14, 1024 }
 0x5f7   :  { %p3225_p5 = scmp.ne.s32.totalorder %s5714_s14, %s3224_s21  ;;  %p3228_p6 = scmp.lt.u32.totalorder %s3224_s21, %s5714_s14 }
 0x5f9   :  { %p3230_p7 = pnand %p3228_p6, %p3225_p5 }
 0x5fb   :  { %3233 = shalt.err (!%p3230_p7)
}
 0x5fc   :  { %2806 = dma.vmem_to_hbm [thread:$0]  %s2804_s7, 1024, %s5714_s14, [#allocation3]  }
 0x5fd   :  { %3234 = dma.done.wait [#allocation3], 1024  }
 0x5fe   :  { %3235 = vsyncadd [#allocation3], 4294966272 }
 0x5ff   :  { %2810 = vsyncpa [#allocation3], 1 }

</bundles_post_ra>
